<compile_context>
chip_gen: v7x
topology: tpu7x:2x2x1
jax: 0.10.0
libtpu: 0.0.40
codegen_flags: <defaults>
</compile_context>

<pallas_src>
import functools

import jax
import jax.numpy as jnp
import numpy as np
from jax import lax
from jax.experimental import pallas as pl
from jax.experimental.pallas import tpu as pltpu


# ---------------------------------------------------------------------------
# Fused Pallas kernel: the whole network for one block of batch elements
# ---------------------------------------------------------------------------
def _fused_kernel(x_ref, w1_ref, w2_ref, w3_ref, wf_ref, vec_ref, o_ref,
                  cat_ref, *, bb, dd, hh, ksz):
    # x_ref  : (R, Lmid)             R = bb*D*H rows, lanes = (w, cin) zero-padded
    # w*_ref : (K*K*Lmid, Lmid)      banded weights, (kd,kh) taps stacked on rows
    # wf_ref : (Lmid, Lout)          block-diagonal 1x1x1 head
    # vec_ref: (8, Lmid)             rows: b1, a1, b2, a2, b3, bf, 0, 0
    # o_ref  : (R, Lout)
    # cat_ref: (bb, D, H, K*K*Lmid)  VMEM scratch holding the lane-concatenated,
    #                                circularly shifted activation copies
    p = ksz // 2
    n_taps = ksz * ksz
    rows = x_ref.shape[0]
    lmid = wf_ref.shape[0]
    lout = o_ref.shape[-1]

    def conv_kkk(act2d, w_ref, b_row, a_row):
        """KxKxK circular conv (+bias, +optional PReLU) as ONE deep matmul."""
        lc = act2d.shape[-1]
        act4 = act2d.reshape(bb, dd, hh, lc)
        for kd in range(ksz):
            sd = (p - kd) % dd
            # D-shift: roll of whole (H, lane) blocks along a leading dim.
            rolled = act4 if sd == 0 else jnp.roll(act4, sd, axis=1)
            for kh in range(ksz):
                lo = (kd * ksz + kh) * lc
                sh = (p - kh) % hh
                # H-shift: write the two wrap-around pieces directly into the
                # lane-aligned slot of the cat scratch (no permutation matmul,
                # no lane-dim concatenate).
                if sh == 0:
                    cat_ref[:, :, :, lo:lo + lc] = rolled
                else:
                    cat_ref[:, :, sh:, lo:lo + lc] = rolled[:, :, :hh - sh, :]
                    cat_ref[:, :, :sh, lo:lo + lc] = rolled[:, :, hh - sh:, :]
        cat = cat_ref[...].reshape(rows, n_taps * lc)
        # One deep, lane-dense MXU matmul per layer (contraction = K*K*Lmid),
        # W-circularity already folded into the banded weight.
        y = jnp.dot(cat.astype(w_ref.dtype), w_ref[...],
                    preferred_element_type=jnp.float32)
        y = y + b_row                                    # bias (VPU)
        if a_row is not None:                            # per-channel PReLU
            y = jnp.where(y >= 0.0, y, a_row * y)
        return y

    act = x_ref[...]
    act = conv_kkk(act, w1_ref, vec_ref[0:1, :lmid], vec_ref[1:2, :lmid])
    act = conv_kkk(act, w2_ref, vec_ref[2:3, :lmid], vec_ref[3:4, :lmid])
    act = conv_kkk(act, w3_ref, vec_ref[4:5, :lmid], None)
    out = jnp.dot(act.astype(wf_ref.dtype), wf_ref[...],      # 1x1x1 head
                  preferred_element_type=jnp.float32) + vec_ref[5:6, :lout]
    o_ref[...] = out.astype(o_ref.dtype)


# ---------------------------------------------------------------------------
# Host-side weight preprocessing — call ONCE per parameter set and reuse
# (review: redoing this per forward dwarfs the microsecond-scale kernel).
# ---------------------------------------------------------------------------
def _band_matrix_deep(w_dhwio, W, lin_pad):
    """Per-(kd,kh) banded matrices folding the circular W shift, stacked along
    the contraction dim (rows zero-padded to lin_pad per tap)."""
    K = w_dhwio.shape[0]
    Cin, Cout = w_dhwio.shape[3], w_dhwio.shape[4]
    p = K // 2
    wn = np.asarray(w_dhwio, np.float32)
    blocks = []
    for kd in range(K):
        for kh in range(K):
            M = np.zeros((lin_pad, W * Cout), np.float32)
            for kw in range(K):
                for w in range(W):
                    ws = (w + kw - p) % W
                    M[ws * Cin:(ws + 1) * Cin,
                      w * Cout:(w + 1) * Cout] += wn[kd, kh, kw]
            blocks.append(M)
    return np.concatenate(blocks, axis=0)           # (K*K*lin_pad, W*Cout)


def _pointwise_matrix(w_dhwio, W):
    Cin, Cout = w_dhwio.shape[3], w_dhwio.shape[4]
    w2 = np.asarray(w_dhwio, np.float32).reshape(Cin, Cout)
    M = np.zeros((W * Cin, W * Cout), np.float32)
    for w in range(W):
        M[w * Cin:(w + 1) * Cin, w * Cout:(w + 1) * Cout] = w2
    return M


def prepare_operands(params, *, W, ks=3, mxu_dtype=jnp.float32):
    d1 = params["w1"].shape[4]
    d2 = params["w2"].shape[4]
    d3 = params["w3"].shape[4]
    cin = params["w1"].shape[3]
    cout = params["wf"].shape[4]
    assert d1 == d2 == d3 and cin <= d1 and cout <= d1, \
        "kernel assumes SimpleLayerNet's 16-channel trunk"
    lmid = W * d1                                   # lane width of the trunk
    # All six bias / PReLU vectors packed into ONE (8, Lmid) tile (one DMA).
    vec = np.zeros((8, lmid), np.float32)
    vec[0, :] = np.tile(np.asarray(params["b1"], np.float32), W)
    vec[1, :] = np.tile(np.asarray(params["a1"], np.float32), W)
    vec[2, :] = np.tile(np.asarray(params["b2"], np.float32), W)
    vec[3, :] = np.tile(np.asarray(params["a2"], np.float32), W)
    vec[4, :] = np.tile(np.asarray(params["b3"], np.float32), W)
    vec[5, :W * cout] = np.tile(np.asarray(params["bf"], np.float32), W)
    # mxu_dtype=jnp.bfloat16 hits the single-pass MXU path on v6e/v7x (keep the
    # f32 accumulate); expect ~1e-2-level deviation from the f32 reference.
    return dict(
        W1=jnp.asarray(_band_matrix_deep(params["w1"], W, lmid), mxu_dtype),
        W2=jnp.asarray(_band_matrix_deep(params["w2"], W, lmid), mxu_dtype),
        W3=jnp.asarray(_band_matrix_deep(params["w3"], W, lmid), mxu_dtype),
        Wf=jnp.asarray(_pointwise_matrix(params["wf"], W), mxu_dtype),
        vec=jnp.asarray(vec, jnp.float32),
    )


# ---------------------------------------------------------------------------
# Forward pass wrapper (single pallas_call)
# ---------------------------------------------------------------------------
def _pick_block_batch(N, dh, max_rows=512):
    """Fold batch into the matmul M-dim (target >=128 rows) while keeping
    >= 2 grid steps when the batch allows it (both v7x TensorCores busy)."""
    divs = [b for b in range(1, N + 1) if N % b == 0 and b * dh <= max_rows]
    if not divs:
        return 1
    cands = [b for b in divs if N // b >= 2] or divs
    for b in cands:
        if b * dh >= 128:
            return b
    return cands[-1]


def simple_layer_net_forward(x_ndhwc, ops, *, ks=3, block_batch=None):
    N, D, H, W, Cin = x_ndhwc.shape
    n_taps = ks * ks
    lcat = ops["W1"].shape[0] // n_taps      # padded per-tap contraction width
    lmid = ops["W1"].shape[1]                # W * 16
    lout = ops["Wf"].shape[1]                # W * Cout
    assert lcat == lmid
    dh = D * H
    if block_batch is None:
        block_batch = _pick_block_batch(N, dh)
    assert N % block_batch == 0
    rows = block_batch * dh

    # (N,D,H,W,Cin) -> (N*D*H, W*Cin); zero-pad lanes to the trunk width so
    # every per-tap slot of the cat scratch is a full lane-aligned block.
    x2 = x_ndhwc.reshape(N * dh, W * Cin).astype(jnp.float32)
    if W * Cin < lcat:
        x2 = jnp.pad(x2, ((0, 0), (0, lcat - W * Cin)))

    kernel = functools.partial(_fused_kernel, bb=block_batch, dd=D, hh=H,
                               ksz=ks)

    out2 = pl.pallas_call(
        kernel,
        out_shape=jax.ShapeDtypeStruct((N * dh, lout), jnp.float32),
        grid=(N // block_batch,),
        in_specs=[
            pl.BlockSpec((rows, lcat), lambda n: (n, 0)),
            # Constants: block index is (0, 0) for every grid step, so Pallas
            # copies them in once and skips the re-DMA afterwards.  (At this
            # size double-buffering them is harmless; pl.Buffered(1) / bf16
            # storage only matters if W/D/H grow the ~1.7 MiB of weights.)
            pl.BlockSpec(tuple(ops["W1"].shape), lambda n: (0, 0)),
            pl.BlockSpec(tuple(ops["W2"].shape), lambda n: (0, 0)),
            pl.BlockSpec(tuple(ops["W3"].shape), lambda n: (0, 0)),
            pl.BlockSpec(tuple(ops["Wf"].shape), lambda n: (0, 0)),
            pl.BlockSpec(tuple(ops["vec"].shape), lambda n: (0, 0)),
        ],
        out_specs=pl.BlockSpec((rows, lout), lambda n: (n, 0)),
        scratch_shapes=[
            pltpu.VMEM((block_batch, D, H, n_taps * lcat), jnp.float32),
        ],
        compiler_params=pltpu.CompilerParams(
            dimension_semantics=("parallel",)),      # batch blocks across TCs
    )(x2, ops["W1"], ops["W2"], ops["W3"], ops["Wf"], ops["vec"])

    return out2.reshape(N, D, H, W, lout // W)       # free row-major reshape


# ---------------------------------------------------------------------------
# Pure-JAX reference (for correctness check)
# ---------------------------------------------------------------------------
def circ_pad(x, p):
    if p == 0:
        return x
    return jnp.pad(x, ((0, 0), (p, p), (p, p), (p, p), (0, 0)), mode="wrap")


def _ref_conv(x, w, b):
    y = lax.conv_general_dilated(
        x, w, window_strides=(1, 1, 1), padding="VALID",
        dimension_numbers=("NDHWC", "DHWIO", "NDHWC"),
        precision=lax.Precision.HIGHEST)
    return y + b.reshape(1, 1, 1, 1, -1)


def _ref_prelu(x, a):
    a = a.reshape(1, 1, 1, 1, -1)
    return jnp.where(x >= 0.0, x, a * x)


def reference_forward(x, params, ks=3):
    p = ks // 2
    x = circ_pad(x, p)
    x = _ref_prelu(_ref_conv(x, params["w1"], params["b1"]), params["a1"])
    x = circ_pad(x, p)
    x = _ref_prelu(_ref_conv(x, params["w2"], params["b2"]), params["a2"])
    x = circ_pad(x, p)
    x = _ref_conv(x, params["w3"], params["b3"])
    x = _ref_conv(x, params["wf"], params["bf"])
    return x


# ---------------------------------------------------------------------------
# Deterministic parameter init (matches torch Conv3d default fan-in scaling)
# ---------------------------------------------------------------------------
def init_conv(key, k, cin, cout):
    kw_, kb_ = jax.random.split(key)
    fan_in = cin * k ** 3
    bound = 1.0 / np.sqrt(fan_in)
    w = jax.random.uniform(kw_, (k, k, k, cin, cout), jnp.float32, -bound, bound)
    b = jax.random.uniform(kb_, (cout,), jnp.float32, -bound, bound)
    return w, b


if __name__ == "__main__":
    # SimpleLayerNet(dim_size, channels_in=4, channels_out=4, kernel_size=3)
    N, Cin, D, H, W = 4, 4, 8, 8, 8
    d1 = d2 = d3 = 16
    Cout = 4
    ks = 3

    key = jax.random.PRNGKey(0)
    kx, k1, k2, k3, kf = jax.random.split(key, 5)

    # PyTorch-style NCDHW input, moved once to the kernel's NDHWC layout.
    x_ncdhw = jax.random.normal(kx, (N, Cin, D, H, W), jnp.float32)
    x = jnp.transpose(x_ncdhw, (0, 2, 3, 4, 1))  # NDHWC

    w1, b1 = init_conv(k1, ks, Cin, d1)
    w2, b2 = init_conv(k2, ks, d1, d2)
    w3, b3 = init_conv(k3, ks, d2, d3)
    wf, bf = init_conv(kf, 1, d3, Cout)

    params = dict(
        w1=w1, b1=b1, a1=0.25 * jnp.ones((d1,), jnp.float32),  # PReLU default
        w2=w2, b2=b2, a2=0.25 * jnp.ones((d2,), jnp.float32),
        w3=w3, b3=b3,
        wf=wf, bf=bf,
    )

    # Host-side preprocessing done ONCE, outside the per-call path.
    ops = prepare_operands(params, W=W, ks=ks)

    fwd = jax.jit(functools.partial(simple_layer_net_forward, ks=ks))
    out = jax.block_until_ready(fwd(x, ops))

    ref = jax.block_until_ready(reference_forward(x, params, ks=ks))
    np.testing.assert_allclose(np.asarray(out), np.asarray(ref),
                               rtol=2e-4, atol=2e-4)

    assert out.shape == (N, D, H, W, Cout)
    print("KERNEL_OK")
</pallas_src>

<mosaic_0001>
module attributes {stable_mosaic.version = 11 : i64} {
  func.func @_fused_kernel(%arg0: i32, %arg1: memref<128x128xf32, #tpu.memory_space<vmem>>, %arg2: memref<1152x128xf32, #tpu.memory_space<vmem>>, %arg3: memref<1152x128xf32, #tpu.memory_space<vmem>>, %arg4: memref<1152x128xf32, #tpu.memory_space<vmem>>, %arg5: memref<128x32xf32, #tpu.memory_space<vmem>>, %arg6: memref<8x128xf32, #tpu.memory_space<vmem>>, %arg7: memref<128x32xf32, #tpu.memory_space<vmem>>, %arg8: memref<2x8x8x1152xf32, #tpu.memory_space<vmem>>) attributes {dimension_semantics = [#tpu.dimension_semantics<parallel>], iteration_bounds = array<i64: 2>, scalar_prefetch = 0 : i64, scratch_operands = 1 : i64, tpu.core_type = #tpu.core_type<tc>, window_params = [{transform_indices = @transform_0, window_bounds = array<i64: 128, 128>}, {pipeline_mode = #tpu.pipeline_mode<synchronous>, transform_indices = @transform_1, window_bounds = array<i64: 1152, 128>}, {pipeline_mode = #tpu.pipeline_mode<synchronous>, transform_indices = @transform_2, window_bounds = array<i64: 1152, 128>}, {pipeline_mode = #tpu.pipeline_mode<synchronous>, transform_indices = @transform_3, window_bounds = array<i64: 1152, 128>}, {pipeline_mode = #tpu.pipeline_mode<synchronous>, transform_indices = @transform_4, window_bounds = array<i64: 128, 32>}, {pipeline_mode = #tpu.pipeline_mode<synchronous>, transform_indices = @transform_5, window_bounds = array<i64: 8, 128>}, {transform_indices = @transform_6, window_bounds = array<i64: 128, 32>}]} {
    %c0 = arith.constant 0 : index
    %c0_0 = arith.constant 0 : index
    %0 = vector.load %arg1[%c0, %c0_0] : memref<128x128xf32, #tpu.memory_space<vmem>>, vector<128x128xf32>
    %c0_1 = arith.constant 0 : index
    %c0_2 = arith.constant 0 : index
    %1 = vector.load %arg6[%c0_1, %c0_2] : memref<8x128xf32, #tpu.memory_space<vmem>>, vector<1x128xf32>
    %c1 = arith.constant 1 : index
    %c0_3 = arith.constant 0 : index
    %2 = vector.load %arg6[%c1, %c0_3] : memref<8x128xf32, #tpu.memory_space<vmem>>, vector<1x128xf32>
    %3 = vector.shape_cast %0 : vector<128x128xf32> to vector<2x8x8x128xf32>
    %4 = vector.extract_strided_slice %3 {offsets = [0, 7, 0, 0], sizes = [2, 1, 8, 128], strides = [1, 1, 1, 1]} : vector<2x8x8x128xf32> to vector<2x1x8x128xf32>
    %5 = vector.extract_strided_slice %3 {offsets = [0, 0, 0, 0], sizes = [2, 7, 8, 128], strides = [1, 1, 1, 1]} : vector<2x8x8x128xf32> to vector<2x7x8x128xf32>
    %6 = tpu.concatenate %4, %5 in 1 : vector<2x1x8x128xf32>, vector<2x7x8x128xf32> -> vector<2x8x8x128xf32>
    %7 = vector.extract_strided_slice %6 {offsets = [0, 0, 0, 0], sizes = [2, 8, 7, 128], strides = [1, 1, 1, 1]} : vector<2x8x8x128xf32> to vector<2x8x7x128xf32>
    %c0_4 = arith.constant 0 : index
    %c0_5 = arith.constant 0 : index
    %c1_6 = arith.constant 1 : index
    %c0_7 = arith.constant 0 : index
    %8 = vector.load %arg8[%c0_4, %c0_5, %c1_6, %c0_7] : memref<2x8x8x1152xf32, #tpu.memory_space<vmem>>, vector<2x8x7x128xf32>
    tpu.vector_store %arg8[%c0_4, %c0_5, %c1_6, %c0_7], %7 {strides = array<i32>} : memref<2x8x8x1152xf32, #tpu.memory_space<vmem>>, vector<2x8x7x128xf32>,
    %9 = vector.extract_strided_slice %6 {offsets = [0, 0, 7, 0], sizes = [2, 8, 1, 128], strides = [1, 1, 1, 1]} : vector<2x8x8x128xf32> to vector<2x8x1x128xf32>
    %c0_8 = arith.constant 0 : index
    %c0_9 = arith.constant 0 : index
    %c0_10 = arith.constant 0 : index
    %c0_11 = arith.constant 0 : index
    %10 = vector.load %arg8[%c0_8, %c0_9, %c0_10, %c0_11] : memref<2x8x8x1152xf32, #tpu.memory_space<vmem>>, vector<2x8x1x128xf32>
    tpu.vector_store %arg8[%c0_8, %c0_9, %c0_10, %c0_11], %9 {strides = array<i32>} : memref<2x8x8x1152xf32, #tpu.memory_space<vmem>>, vector<2x8x1x128xf32>,
    %c0_12 = arith.constant 0 : index
    %c0_13 = arith.constant 0 : index
    %c0_14 = arith.constant 0 : index
    %c128 = arith.constant 128 : index
    %11 = vector.load %arg8[%c0_12, %c0_13, %c0_14, %c128] : memref<2x8x8x1152xf32, #tpu.memory_space<vmem>>, vector<2x8x8x128xf32>
    tpu.vector_store %arg8[%c0_12, %c0_13, %c0_14, %c128], %6 {strides = array<i32>} : memref<2x8x8x1152xf32, #tpu.memory_space<vmem>>, vector<2x8x8x128xf32>,
    %12 = vector.extract_strided_slice %6 {offsets = [0, 0, 0, 0], sizes = [2, 8, 1, 128], strides = [1, 1, 1, 1]} : vector<2x8x8x128xf32> to vector<2x8x1x128xf32>
    %c0_15 = arith.constant 0 : index
    %c0_16 = arith.constant 0 : index
    %c7 = arith.constant 7 : index
    %c256 = arith.constant 256 : index
    %13 = vector.load %arg8[%c0_15, %c0_16, %c7, %c256] : memref<2x8x8x1152xf32, #tpu.memory_space<vmem>>, vector<2x8x1x128xf32>
    tpu.vector_store %arg8[%c0_15, %c0_16, %c7, %c256], %12 {strides = array<i32>} : memref<2x8x8x1152xf32, #tpu.memory_space<vmem>>, vector<2x8x1x128xf32>,
    %14 = vector.extract_strided_slice %6 {offsets = [0, 0, 1, 0], sizes = [2, 8, 7, 128], strides = [1, 1, 1, 1]} : vector<2x8x8x128xf32> to vector<2x8x7x128xf32>
    %c0_17 = arith.constant 0 : index
    %c0_18 = arith.constant 0 : index
    %c0_19 = arith.constant 0 : index
    %c256_20 = arith.constant 256 : index
    %15 = vector.load %arg8[%c0_17, %c0_18, %c0_19, %c256_20] : memref<2x8x8x1152xf32, #tpu.memory_space<vmem>>, vector<2x8x7x128xf32>
    tpu.vector_store %arg8[%c0_17, %c0_18, %c0_19, %c256_20], %14 {strides = array<i32>} : memref<2x8x8x1152xf32, #tpu.memory_space<vmem>>, vector<2x8x7x128xf32>,
    %16 = vector.extract_strided_slice %3 {offsets = [0, 0, 0, 0], sizes = [2, 8, 7, 128], strides = [1, 1, 1, 1]} : vector<2x8x8x128xf32> to vector<2x8x7x128xf32>
    %c0_21 = arith.constant 0 : index
    %c0_22 = arith.constant 0 : index
    %c1_23 = arith.constant 1 : index
    %c384 = arith.constant 384 : index
    %17 = vector.load %arg8[%c0_21, %c0_22, %c1_23, %c384] : memref<2x8x8x1152xf32, #tpu.memory_space<vmem>>, vector<2x8x7x128xf32>
    tpu.vector_store %arg8[%c0_21, %c0_22, %c1_23, %c384], %16 {strides = array<i32>} : memref<2x8x8x1152xf32, #tpu.memory_space<vmem>>, vector<2x8x7x128xf32>,
    %18 = vector.extract_strided_slice %3 {offsets = [0, 0, 7, 0], sizes = [2, 8, 1, 128], strides = [1, 1, 1, 1]} : vector<2x8x8x128xf32> to vector<2x8x1x128xf32>
    %c0_24 = arith.constant 0 : index
    %c0_25 = arith.constant 0 : index
    %c0_26 = arith.constant 0 : index
    %c384_27 = arith.constant 384 : index
    %19 = vector.load %arg8[%c0_24, %c0_25, %c0_26, %c384_27] : memref<2x8x8x1152xf32, #tpu.memory_space<vmem>>, vector<2x8x1x128xf32>
    tpu.vector_store %arg8[%c0_24, %c0_25, %c0_26, %c384_27], %18 {strides = array<i32>} : memref<2x8x8x1152xf32, #tpu.memory_space<vmem>>, vector<2x8x1x128xf32>,
    %c0_28 = arith.constant 0 : index
    %c0_29 = arith.constant 0 : index
    %c0_30 = arith.constant 0 : index
    %c512 = arith.constant 512 : index
    %20 = vector.load %arg8[%c0_28, %c0_29, %c0_30, %c512] : memref<2x8x8x1152xf32, #tpu.memory_space<vmem>>, vector<2x8x8x128xf32>
    tpu.vector_store %arg8[%c0_28, %c0_29, %c0_30, %c512], %3 {strides = array<i32>} : memref<2x8x8x1152xf32, #tpu.memory_space<vmem>>, vector<2x8x8x128xf32>,
    %21 = vector.extract_strided_slice %3 {offsets = [0, 0, 0, 0], sizes = [2, 8, 1, 128], strides = [1, 1, 1, 1]} : vector<2x8x8x128xf32> to vector<2x8x1x128xf32>
    %c0_31 = arith.constant 0 : index
    %c0_32 = arith.constant 0 : index
    %c7_33 = arith.constant 7 : index
    %c640 = arith.constant 640 : index
    %22 = vector.load %arg8[%c0_31, %c0_32, %c7_33, %c640] : memref<2x8x8x1152xf32, #tpu.memory_space<vmem>>, vector<2x8x1x128xf32>
    tpu.vector_store %arg8[%c0_31, %c0_32, %c7_33, %c640], %21 {strides = array<i32>} : memref<2x8x8x1152xf32, #tpu.memory_space<vmem>>, vector<2x8x1x128xf32>,
    %23 = vector.extract_strided_slice %3 {offsets = [0, 0, 1, 0], sizes = [2, 8, 7, 128], strides = [1, 1, 1, 1]} : vector<2x8x8x128xf32> to vector<2x8x7x128xf32>
    %c0_34 = arith.constant 0 : index
    %c0_35 = arith.constant 0 : index
    %c0_36 = arith.constant 0 : index
    %c640_37 = arith.constant 640 : index
    %24 = vector.load %arg8[%c0_34, %c0_35, %c0_36, %c640_37] : memref<2x8x8x1152xf32, #tpu.memory_space<vmem>>, vector<2x8x7x128xf32>
    tpu.vector_store %arg8[%c0_34, %c0_35, %c0_36, %c640_37], %23 {strides = array<i32>} : memref<2x8x8x1152xf32, #tpu.memory_space<vmem>>, vector<2x8x7x128xf32>,
    %25 = vector.extract_strided_slice %3 {offsets = [0, 1, 0, 0], sizes = [2, 7, 8, 128], strides = [1, 1, 1, 1]} : vector<2x8x8x128xf32> to vector<2x7x8x128xf32>
    %26 = vector.extract_strided_slice %3 {offsets = [0, 0, 0, 0], sizes = [2, 1, 8, 128], strides = [1, 1, 1, 1]} : vector<2x8x8x128xf32> to vector<2x1x8x128xf32>
    %27 = tpu.concatenate %25, %26 in 1 : vector<2x7x8x128xf32>, vector<2x1x8x128xf32> -> vector<2x8x8x128xf32>
    %28 = vector.extract_strided_slice %27 {offsets = [0, 0, 0, 0], sizes = [2, 8, 7, 128], strides = [1, 1, 1, 1]} : vector<2x8x8x128xf32> to vector<2x8x7x128xf32>
    %c0_38 = arith.constant 0 : index
    %c0_39 = arith.constant 0 : index
    %c1_40 = arith.constant 1 : index
    %c768 = arith.constant 768 : index
    %29 = vector.load %arg8[%c0_38, %c0_39, %c1_40, %c768] : memref<2x8x8x1152xf32, #tpu.memory_space<vmem>>, vector<2x8x7x128xf32>
    tpu.vector_store %arg8[%c0_38, %c0_39, %c1_40, %c768], %28 {strides = array<i32>} : memref<2x8x8x1152xf32, #tpu.memory_space<vmem>>, vector<2x8x7x128xf32>,
    %30 = vector.extract_strided_slice %27 {offsets = [0, 0, 7, 0], sizes = [2, 8, 1, 128], strides = [1, 1, 1, 1]} : vector<2x8x8x128xf32> to vector<2x8x1x128xf32>
    %c0_41 = arith.constant 0 : index
    %c0_42 = arith.constant 0 : index
    %c0_43 = arith.constant 0 : index
    %c768_44 = arith.constant 768 : index
    %31 = vector.load %arg8[%c0_41, %c0_42, %c0_43, %c768_44] : memref<2x8x8x1152xf32, #tpu.memory_space<vmem>>, vector<2x8x1x128xf32>
    tpu.vector_store %arg8[%c0_41, %c0_42, %c0_43, %c768_44], %30 {strides = array<i32>} : memref<2x8x8x1152xf32, #tpu.memory_space<vmem>>, vector<2x8x1x128xf32>,
    %c0_45 = arith.constant 0 : index
    %c0_46 = arith.constant 0 : index
    %c0_47 = arith.constant 0 : index
    %c896 = arith.constant 896 : index
    %32 = vector.load %arg8[%c0_45, %c0_46, %c0_47, %c896] : memref<2x8x8x1152xf32, #tpu.memory_space<vmem>>, vector<2x8x8x128xf32>
    tpu.vector_store %arg8[%c0_45, %c0_46, %c0_47, %c896], %27 {strides = array<i32>} : memref<2x8x8x1152xf32, #tpu.memory_space<vmem>>, vector<2x8x8x128xf32>,
    %33 = vector.extract_strided_slice %27 {offsets = [0, 0, 0, 0], sizes = [2, 8, 1, 128], strides = [1, 1, 1, 1]} : vector<2x8x8x128xf32> to vector<2x8x1x128xf32>
    %c0_48 = arith.constant 0 : index
    %c0_49 = arith.constant 0 : index
    %c7_50 = arith.constant 7 : index
    %c1024 = arith.constant 1024 : index
    %34 = vector.load %arg8[%c0_48, %c0_49, %c7_50, %c1024] : memref<2x8x8x1152xf32, #tpu.memory_space<vmem>>, vector<2x8x1x128xf32>
    tpu.vector_store %arg8[%c0_48, %c0_49, %c7_50, %c1024], %33 {strides = array<i32>} : memref<2x8x8x1152xf32, #tpu.memory_space<vmem>>, vector<2x8x1x128xf32>,
    %35 = vector.extract_strided_slice %27 {offsets = [0, 0, 1, 0], sizes = [2, 8, 7, 128], strides = [1, 1, 1, 1]} : vector<2x8x8x128xf32> to vector<2x8x7x128xf32>
    %c0_51 = arith.constant 0 : index
    %c0_52 = arith.constant 0 : index
    %c0_53 = arith.constant 0 : index
    %c1024_54 = arith.constant 1024 : index
    %36 = vector.load %arg8[%c0_51, %c0_52, %c0_53, %c1024_54] : memref<2x8x8x1152xf32, #tpu.memory_space<vmem>>, vector<2x8x7x128xf32>
    tpu.vector_store %arg8[%c0_51, %c0_52, %c0_53, %c1024_54], %35 {strides = array<i32>} : memref<2x8x8x1152xf32, #tpu.memory_space<vmem>>, vector<2x8x7x128xf32>,
    %c0_55 = arith.constant 0 : index
    %c0_56 = arith.constant 0 : index
    %c0_57 = arith.constant 0 : index
    %c0_58 = arith.constant 0 : index
    %37 = vector.load %arg8[%c0_55, %c0_56, %c0_57, %c0_58] : memref<2x8x8x1152xf32, #tpu.memory_space<vmem>>, vector<2x8x8x1152xf32>
    %38 = vector.shape_cast %37 : vector<2x8x8x1152xf32> to vector<128x1152xf32>
    %c0_59 = arith.constant 0 : index
    %c0_60 = arith.constant 0 : index
    %39 = vector.load %arg2[%c0_59, %c0_60] : memref<1152x128xf32, #tpu.memory_space<vmem>>, vector<1152x128xf32>
    %cst = arith.constant dense<0.000000e+00> : vector<128x128xf32>
    %40 = tpu.matmul %38, %39, %cst {dimension_numbers = #tpu.dot_dimension_numbers<[1], [0], [0], [1], [0, 0, 1, 1], [], []>} : vector<128x1152xf32>, vector<1152x128xf32>, vector<128x128xf32> -> vector<128x128xf32>
    %41 = vector.broadcast %1 : vector<1x128xf32> to vector<128x128xf32>
    %42 = arith.addf %40, %41 : vector<128x128xf32>
    %cst_61 = arith.constant 0.000000e+00 : f32
    %43 = vector.broadcast %cst_61 : f32 to vector<128x128xf32>
    %44 = arith.cmpf oge, %42, %43 : vector<128x128xf32>
    %45 = vector.broadcast %2 : vector<1x128xf32> to vector<128x128xf32>
    %46 = arith.mulf %45, %42 : vector<128x128xf32>
    %47 = arith.select %44, %42, %46 : vector<128x128xi1>, vector<128x128xf32>
    %c2 = arith.constant 2 : index
    %c0_62 = arith.constant 0 : index
    %48 = vector.load %arg6[%c2, %c0_62] : memref<8x128xf32, #tpu.memory_space<vmem>>, vector<1x128xf32>
    %c3 = arith.constant 3 : index
    %c0_63 = arith.constant 0 : index
    %49 = vector.load %arg6[%c3, %c0_63] : memref<8x128xf32, #tpu.memory_space<vmem>>, vector<1x128xf32>
    %50 = vector.shape_cast %47 : vector<128x128xf32> to vector<2x8x8x128xf32>
    %51 = vector.extract_strided_slice %50 {offsets = [0, 7, 0, 0], sizes = [2, 1, 8, 128], strides = [1, 1, 1, 1]} : vector<2x8x8x128xf32> to vector<2x1x8x128xf32>
    %52 = vector.extract_strided_slice %50 {offsets = [0, 0, 0, 0], sizes = [2, 7, 8, 128], strides = [1, 1, 1, 1]} : vector<2x8x8x128xf32> to vector<2x7x8x128xf32>
    %53 = tpu.concatenate %51, %52 in 1 : vector<2x1x8x128xf32>, vector<2x7x8x128xf32> -> vector<2x8x8x128xf32>
    %54 = vector.extract_strided_slice %53 {offsets = [0, 0, 0, 0], sizes = [2, 8, 7, 128], strides = [1, 1, 1, 1]} : vector<2x8x8x128xf32> to vector<2x8x7x128xf32>
    %c0_64 = arith.constant 0 : index
    %c0_65 = arith.constant 0 : index
    %c1_66 = arith.constant 1 : index
    %c0_67 = arith.constant 0 : index
    %55 = vector.load %arg8[%c0_64, %c0_65, %c1_66, %c0_67] : memref<2x8x8x1152xf32, #tpu.memory_space<vmem>>, vector<2x8x7x128xf32>
    tpu.vector_store %arg8[%c0_64, %c0_65, %c1_66, %c0_67], %54 {strides = array<i32>} : memref<2x8x8x1152xf32, #tpu.memory_space<vmem>>, vector<2x8x7x128xf32>,
    %56 = vector.extract_strided_slice %53 {offsets = [0, 0, 7, 0], sizes = [2, 8, 1, 128], strides = [1, 1, 1, 1]} : vector<2x8x8x128xf32> to vector<2x8x1x128xf32>
    %c0_68 = arith.constant 0 : index
    %c0_69 = arith.constant 0 : index
    %c0_70 = arith.constant 0 : index
    %c0_71 = arith.constant 0 : index
    %57 = vector.load %arg8[%c0_68, %c0_69, %c0_70, %c0_71] : memref<2x8x8x1152xf32, #tpu.memory_space<vmem>>, vector<2x8x1x128xf32>
    tpu.vector_store %arg8[%c0_68, %c0_69, %c0_70, %c0_71], %56 {strides = array<i32>} : memref<2x8x8x1152xf32, #tpu.memory_space<vmem>>, vector<2x8x1x128xf32>,
    %c0_72 = arith.constant 0 : index
    %c0_73 = arith.constant 0 : index
    %c0_74 = arith.constant 0 : index
    %c128_75 = arith.constant 128 : index
    %58 = vector.load %arg8[%c0_72, %c0_73, %c0_74, %c128_75] : memref<2x8x8x1152xf32, #tpu.memory_space<vmem>>, vector<2x8x8x128xf32>
    tpu.vector_store %arg8[%c0_72, %c0_73, %c0_74, %c128_75], %53 {strides = array<i32>} : memref<2x8x8x1152xf32, #tpu.memory_space<vmem>>, vector<2x8x8x128xf32>,
    %59 = vector.extract_strided_slice %53 {offsets = [0, 0, 0, 0], sizes = [2, 8, 1, 128], strides = [1, 1, 1, 1]} : vector<2x8x8x128xf32> to vector<2x8x1x128xf32>
    %c0_76 = arith.constant 0 : index
    %c0_77 = arith.constant 0 : index
    %c7_78 = arith.constant 7 : index
    %c256_79 = arith.constant 256 : index
    %60 = vector.load %arg8[%c0_76, %c0_77, %c7_78, %c256_79] : memref<2x8x8x1152xf32, #tpu.memory_space<vmem>>, vector<2x8x1x128xf32>
    tpu.vector_store %arg8[%c0_76, %c0_77, %c7_78, %c256_79], %59 {strides = array<i32>} : memref<2x8x8x1152xf32, #tpu.memory_space<vmem>>, vector<2x8x1x128xf32>,
    %61 = vector.extract_strided_slice %53 {offsets = [0, 0, 1, 0], sizes = [2, 8, 7, 128], strides = [1, 1, 1, 1]} : vector<2x8x8x128xf32> to vector<2x8x7x128xf32>
    %c0_80 = arith.constant 0 : index
    %c0_81 = arith.constant 0 : index
    %c0_82 = arith.constant 0 : index
    %c256_83 = arith.constant 256 : index
    %62 = vector.load %arg8[%c0_80, %c0_81, %c0_82, %c256_83] : memref<2x8x8x1152xf32, #tpu.memory_space<vmem>>, vector<2x8x7x128xf32>
    tpu.vector_store %arg8[%c0_80, %c0_81, %c0_82, %c256_83], %61 {strides = array<i32>} : memref<2x8x8x1152xf32, #tpu.memory_space<vmem>>, vector<2x8x7x128xf32>,
    %63 = vector.extract_strided_slice %50 {offsets = [0, 0, 0, 0], sizes = [2, 8, 7, 128], strides = [1, 1, 1, 1]} : vector<2x8x8x128xf32> to vector<2x8x7x128xf32>
    %c0_84 = arith.constant 0 : index
    %c0_85 = arith.constant 0 : index
    %c1_86 = arith.constant 1 : index
    %c384_87 = arith.constant 384 : index
    %64 = vector.load %arg8[%c0_84, %c0_85, %c1_86, %c384_87] : memref<2x8x8x1152xf32, #tpu.memory_space<vmem>>, vector<2x8x7x128xf32>
    tpu.vector_store %arg8[%c0_84, %c0_85, %c1_86, %c384_87], %63 {strides = array<i32>} : memref<2x8x8x1152xf32, #tpu.memory_space<vmem>>, vector<2x8x7x128xf32>,
    %65 = vector.extract_strided_slice %50 {offsets = [0, 0, 7, 0], sizes = [2, 8, 1, 128], strides = [1, 1, 1, 1]} : vector<2x8x8x128xf32> to vector<2x8x1x128xf32>
    %c0_88 = arith.constant 0 : index
    %c0_89 = arith.constant 0 : index
    %c0_90 = arith.constant 0 : index
    %c384_91 = arith.constant 384 : index
    %66 = vector.load %arg8[%c0_88, %c0_89, %c0_90, %c384_91] : memref<2x8x8x1152xf32, #tpu.memory_space<vmem>>, vector<2x8x1x128xf32>
    tpu.vector_store %arg8[%c0_88, %c0_89, %c0_90, %c384_91], %65 {strides = array<i32>} : memref<2x8x8x1152xf32, #tpu.memory_space<vmem>>, vector<2x8x1x128xf32>,
    %c0_92 = arith.constant 0 : index
    %c0_93 = arith.constant 0 : index
    %c0_94 = arith.constant 0 : index
    %c512_95 = arith.constant 512 : index
    %67 = vector.load %arg8[%c0_92, %c0_93, %c0_94, %c512_95] : memref<2x8x8x1152xf32, #tpu.memory_space<vmem>>, vector<2x8x8x128xf32>
    tpu.vector_store %arg8[%c0_92, %c0_93, %c0_94, %c512_95], %50 {strides = array<i32>} : memref<2x8x8x1152xf32, #tpu.memory_space<vmem>>, vector<2x8x8x128xf32>,
    %68 = vector.extract_strided_slice %50 {offsets = [0, 0, 0, 0], sizes = [2, 8, 1, 128], strides = [1, 1, 1, 1]} : vector<2x8x8x128xf32> to vector<2x8x1x128xf32>
    %c0_96 = arith.constant 0 : index
    %c0_97 = arith.constant 0 : index
    %c7_98 = arith.constant 7 : index
    %c640_99 = arith.constant 640 : index
    %69 = vector.load %arg8[%c0_96, %c0_97, %c7_98, %c640_99] : memref<2x8x8x1152xf32, #tpu.memory_space<vmem>>, vector<2x8x1x128xf32>
    tpu.vector_store %arg8[%c0_96, %c0_97, %c7_98, %c640_99], %68 {strides = array<i32>} : memref<2x8x8x1152xf32, #tpu.memory_space<vmem>>, vector<2x8x1x128xf32>,
    %70 = vector.extract_strided_slice %50 {offsets = [0, 0, 1, 0], sizes = [2, 8, 7, 128], strides = [1, 1, 1, 1]} : vector<2x8x8x128xf32> to vector<2x8x7x128xf32>
    %c0_100 = arith.constant 0 : index
    %c0_101 = arith.constant 0 : index
    %c0_102 = arith.constant 0 : index
    %c640_103 = arith.constant 640 : index
    %71 = vector.load %arg8[%c0_100, %c0_101, %c0_102, %c640_103] : memref<2x8x8x1152xf32, #tpu.memory_space<vmem>>, vector<2x8x7x128xf32>
    tpu.vector_store %arg8[%c0_100, %c0_101, %c0_102, %c640_103], %70 {strides = array<i32>} : memref<2x8x8x1152xf32, #tpu.memory_space<vmem>>, vector<2x8x7x128xf32>,
    %72 = vector.extract_strided_slice %50 {offsets = [0, 1, 0, 0], sizes = [2, 7, 8, 128], strides = [1, 1, 1, 1]} : vector<2x8x8x128xf32> to vector<2x7x8x128xf32>
    %73 = vector.extract_strided_slice %50 {offsets = [0, 0, 0, 0], sizes = [2, 1, 8, 128], strides = [1, 1, 1, 1]} : vector<2x8x8x128xf32> to vector<2x1x8x128xf32>
    %74 = tpu.concatenate %72, %73 in 1 : vector<2x7x8x128xf32>, vector<2x1x8x128xf32> -> vector<2x8x8x128xf32>
    %75 = vector.extract_strided_slice %74 {offsets = [0, 0, 0, 0], sizes = [2, 8, 7, 128], strides = [1, 1, 1, 1]} : vector<2x8x8x128xf32> to vector<2x8x7x128xf32>
    %c0_104 = arith.constant 0 : index
    %c0_105 = arith.constant 0 : index
    %c1_106 = arith.constant 1 : index
    %c768_107 = arith.constant 768 : index
    %76 = vector.load %arg8[%c0_104, %c0_105, %c1_106, %c768_107] : memref<2x8x8x1152xf32, #tpu.memory_space<vmem>>, vector<2x8x7x128xf32>
    tpu.vector_store %arg8[%c0_104, %c0_105, %c1_106, %c768_107], %75 {strides = array<i32>} : memref<2x8x8x1152xf32, #tpu.memory_space<vmem>>, vector<2x8x7x128xf32>,
    %77 = vector.extract_strided_slice %74 {offsets = [0, 0, 7, 0], sizes = [2, 8, 1, 128], strides = [1, 1, 1, 1]} : vector<2x8x8x128xf32> to vector<2x8x1x128xf32>
    %c0_108 = arith.constant 0 : index
    %c0_109 = arith.constant 0 : index
    %c0_110 = arith.constant 0 : index
    %c768_111 = arith.constant 768 : index
    %78 = vector.load %arg8[%c0_108, %c0_109, %c0_110, %c768_111] : memref<2x8x8x1152xf32, #tpu.memory_space<vmem>>, vector<2x8x1x128xf32>
    tpu.vector_store %arg8[%c0_108, %c0_109, %c0_110, %c768_111], %77 {strides = array<i32>} : memref<2x8x8x1152xf32, #tpu.memory_space<vmem>>, vector<2x8x1x128xf32>,
    %c0_112 = arith.constant 0 : index
    %c0_113 = arith.constant 0 : index
    %c0_114 = arith.constant 0 : index
    %c896_115 = arith.constant 896 : index
    %79 = vector.load %arg8[%c0_112, %c0_113, %c0_114, %c896_115] : memref<2x8x8x1152xf32, #tpu.memory_space<vmem>>, vector<2x8x8x128xf32>
    tpu.vector_store %arg8[%c0_112, %c0_113, %c0_114, %c896_115], %74 {strides = array<i32>} : memref<2x8x8x1152xf32, #tpu.memory_space<vmem>>, vector<2x8x8x128xf32>,
    %80 = vector.extract_strided_slice %74 {offsets = [0, 0, 0, 0], sizes = [2, 8, 1, 128], strides = [1, 1, 1, 1]} : vector<2x8x8x128xf32> to vector<2x8x1x128xf32>
    %c0_116 = arith.constant 0 : index
    %c0_117 = arith.constant 0 : index
    %c7_118 = arith.constant 7 : index
    %c1024_119 = arith.constant 1024 : index
    %81 = vector.load %arg8[%c0_116, %c0_117, %c7_118, %c1024_119] : memref<2x8x8x1152xf32, #tpu.memory_space<vmem>>, vector<2x8x1x128xf32>
    tpu.vector_store %arg8[%c0_116, %c0_117, %c7_118, %c1024_119], %80 {strides = array<i32>} : memref<2x8x8x1152xf32, #tpu.memory_space<vmem>>, vector<2x8x1x128xf32>,
    %82 = vector.extract_strided_slice %74 {offsets = [0, 0, 1, 0], sizes = [2, 8, 7, 128], strides = [1, 1, 1, 1]} : vector<2x8x8x128xf32> to vector<2x8x7x128xf32>
    %c0_120 = arith.constant 0 : index
    %c0_121 = arith.constant 0 : index
    %c0_122 = arith.constant 0 : index
    %c1024_123 = arith.constant 1024 : index
    %83 = vector.load %arg8[%c0_120, %c0_121, %c0_122, %c1024_123] : memref<2x8x8x1152xf32, #tpu.memory_space<vmem>>, vector<2x8x7x128xf32>
    tpu.vector_store %arg8[%c0_120, %c0_121, %c0_122, %c1024_123], %82 {strides = array<i32>} : memref<2x8x8x1152xf32, #tpu.memory_space<vmem>>, vector<2x8x7x128xf32>,
    %c0_124 = arith.constant 0 : index
    %c0_125 = arith.constant 0 : index
    %c0_126 = arith.constant 0 : index
    %c0_127 = arith.constant 0 : index
    %84 = vector.load %arg8[%c0_124, %c0_125, %c0_126, %c0_127] : memref<2x8x8x1152xf32, #tpu.memory_space<vmem>>, vector<2x8x8x1152xf32>
    %85 = vector.shape_cast %84 : vector<2x8x8x1152xf32> to vector<128x1152xf32>
    %c0_128 = arith.constant 0 : index
    %c0_129 = arith.constant 0 : index
    %86 = vector.load %arg3[%c0_128, %c0_129] : memref<1152x128xf32, #tpu.memory_space<vmem>>, vector<1152x128xf32>
    %cst_130 = arith.constant dense<0.000000e+00> : vector<128x128xf32>
    %87 = tpu.matmul %85, %86, %cst_130 {dimension_numbers = #tpu.dot_dimension_numbers<[1], [0], [0], [1], [0, 0, 1, 1], [], []>} : vector<128x1152xf32>, vector<1152x128xf32>, vector<128x128xf32> -> vector<128x128xf32>
    %88 = vector.broadcast %48 : vector<1x128xf32> to vector<128x128xf32>
    %89 = arith.addf %87, %88 : vector<128x128xf32>
    %cst_131 = arith.constant 0.000000e+00 : f32
    %90 = vector.broadcast %cst_131 : f32 to vector<128x128xf32>
    %91 = arith.cmpf oge, %89, %90 : vector<128x128xf32>
    %92 = vector.broadcast %49 : vector<1x128xf32> to vector<128x128xf32>
    %93 = arith.mulf %92, %89 : vector<128x128xf32>
    %94 = arith.select %91, %89, %93 : vector<128x128xi1>, vector<128x128xf32>
    %c4 = arith.constant 4 : index
    %c0_132 = arith.constant 0 : index
    %95 = vector.load %arg6[%c4, %c0_132] : memref<8x128xf32, #tpu.memory_space<vmem>>, vector<1x128xf32>
    %96 = vector.shape_cast %94 : vector<128x128xf32> to vector<2x8x8x128xf32>
    %97 = vector.extract_strided_slice %96 {offsets = [0, 7, 0, 0], sizes = [2, 1, 8, 128], strides = [1, 1, 1, 1]} : vector<2x8x8x128xf32> to vector<2x1x8x128xf32>
    %98 = vector.extract_strided_slice %96 {offsets = [0, 0, 0, 0], sizes = [2, 7, 8, 128], strides = [1, 1, 1, 1]} : vector<2x8x8x128xf32> to vector<2x7x8x128xf32>
    %99 = tpu.concatenate %97, %98 in 1 : vector<2x1x8x128xf32>, vector<2x7x8x128xf32> -> vector<2x8x8x128xf32>
    %100 = vector.extract_strided_slice %99 {offsets = [0, 0, 0, 0], sizes = [2, 8, 7, 128], strides = [1, 1, 1, 1]} : vector<2x8x8x128xf32> to vector<2x8x7x128xf32>
    %c0_133 = arith.constant 0 : index
    %c0_134 = arith.constant 0 : index
    %c1_135 = arith.constant 1 : index
    %c0_136 = arith.constant 0 : index
    %101 = vector.load %arg8[%c0_133, %c0_134, %c1_135, %c0_136] : memref<2x8x8x1152xf32, #tpu.memory_space<vmem>>, vector<2x8x7x128xf32>
    tpu.vector_store %arg8[%c0_133, %c0_134, %c1_135, %c0_136], %100 {strides = array<i32>} : memref<2x8x8x1152xf32, #tpu.memory_space<vmem>>, vector<2x8x7x128xf32>,
    %102 = vector.extract_strided_slice %99 {offsets = [0, 0, 7, 0], sizes = [2, 8, 1, 128], strides = [1, 1, 1, 1]} : vector<2x8x8x128xf32> to vector<2x8x1x128xf32>
    %c0_137 = arith.constant 0 : index
    %c0_138 = arith.constant 0 : index
    %c0_139 = arith.constant 0 : index
    %c0_140 = arith.constant 0 : index
    %103 = vector.load %arg8[%c0_137, %c0_138, %c0_139, %c0_140] : memref<2x8x8x1152xf32, #tpu.memory_space<vmem>>, vector<2x8x1x128xf32>
    tpu.vector_store %arg8[%c0_137, %c0_138, %c0_139, %c0_140], %102 {strides = array<i32>} : memref<2x8x8x1152xf32, #tpu.memory_space<vmem>>, vector<2x8x1x128xf32>,
    %c0_141 = arith.constant 0 : index
    %c0_142 = arith.constant 0 : index
    %c0_143 = arith.constant 0 : index
    %c128_144 = arith.constant 128 : index
    %104 = vector.load %arg8[%c0_141, %c0_142, %c0_143, %c128_144] : memref<2x8x8x1152xf32, #tpu.memory_space<vmem>>, vector<2x8x8x128xf32>
    tpu.vector_store %arg8[%c0_141, %c0_142, %c0_143, %c128_144], %99 {strides = array<i32>} : memref<2x8x8x1152xf32, #tpu.memory_space<vmem>>, vector<2x8x8x128xf32>,
    %105 = vector.extract_strided_slice %99 {offsets = [0, 0, 0, 0], sizes = [2, 8, 1, 128], strides = [1, 1, 1, 1]} : vector<2x8x8x128xf32> to vector<2x8x1x128xf32>
    %c0_145 = arith.constant 0 : index
    %c0_146 = arith.constant 0 : index
    %c7_147 = arith.constant 7 : index
    %c256_148 = arith.constant 256 : index
    %106 = vector.load %arg8[%c0_145, %c0_146, %c7_147, %c256_148] : memref<2x8x8x1152xf32, #tpu.memory_space<vmem>>, vector<2x8x1x128xf32>
    tpu.vector_store %arg8[%c0_145, %c0_146, %c7_147, %c256_148], %105 {strides = array<i32>} : memref<2x8x8x1152xf32, #tpu.memory_space<vmem>>, vector<2x8x1x128xf32>,
    %107 = vector.extract_strided_slice %99 {offsets = [0, 0, 1, 0], sizes = [2, 8, 7, 128], strides = [1, 1, 1, 1]} : vector<2x8x8x128xf32> to vector<2x8x7x128xf32>
    %c0_149 = arith.constant 0 : index
    %c0_150 = arith.constant 0 : index
    %c0_151 = arith.constant 0 : index
    %c256_152 = arith.constant 256 : index
    %108 = vector.load %arg8[%c0_149, %c0_150, %c0_151, %c256_152] : memref<2x8x8x1152xf32, #tpu.memory_space<vmem>>, vector<2x8x7x128xf32>
    tpu.vector_store %arg8[%c0_149, %c0_150, %c0_151, %c256_152], %107 {strides = array<i32>} : memref<2x8x8x1152xf32, #tpu.memory_space<vmem>>, vector<2x8x7x128xf32>,
    %109 = vector.extract_strided_slice %96 {offsets = [0, 0, 0, 0], sizes = [2, 8, 7, 128], strides = [1, 1, 1, 1]} : vector<2x8x8x128xf32> to vector<2x8x7x128xf32>
    %c0_153 = arith.constant 0 : index
    %c0_154 = arith.constant 0 : index
    %c1_155 = arith.constant 1 : index
    %c384_156 = arith.constant 384 : index
    %110 = vector.load %arg8[%c0_153, %c0_154, %c1_155, %c384_156] : memref<2x8x8x1152xf32, #tpu.memory_space<vmem>>, vector<2x8x7x128xf32>
    tpu.vector_store %arg8[%c0_153, %c0_154, %c1_155, %c384_156], %109 {strides = array<i32>} : memref<2x8x8x1152xf32, #tpu.memory_space<vmem>>, vector<2x8x7x128xf32>,
    %111 = vector.extract_strided_slice %96 {offsets = [0, 0, 7, 0], sizes = [2, 8, 1, 128], strides = [1, 1, 1, 1]} : vector<2x8x8x128xf32> to vector<2x8x1x128xf32>
    %c0_157 = arith.constant 0 : index
    %c0_158 = arith.constant 0 : index
    %c0_159 = arith.constant 0 : index
    %c384_160 = arith.constant 384 : index
    %112 = vector.load %arg8[%c0_157, %c0_158, %c0_159, %c384_160] : memref<2x8x8x1152xf32, #tpu.memory_space<vmem>>, vector<2x8x1x128xf32>
    tpu.vector_store %arg8[%c0_157, %c0_158, %c0_159, %c384_160], %111 {strides = array<i32>} : memref<2x8x8x1152xf32, #tpu.memory_space<vmem>>, vector<2x8x1x128xf32>,
    %c0_161 = arith.constant 0 : index
    %c0_162 = arith.constant 0 : index
    %c0_163 = arith.constant 0 : index
    %c512_164 = arith.constant 512 : index
    %113 = vector.load %arg8[%c0_161, %c0_162, %c0_163, %c512_164] : memref<2x8x8x1152xf32, #tpu.memory_space<vmem>>, vector<2x8x8x128xf32>
    tpu.vector_store %arg8[%c0_161, %c0_162, %c0_163, %c512_164], %96 {strides = array<i32>} : memref<2x8x8x1152xf32, #tpu.memory_space<vmem>>, vector<2x8x8x128xf32>,
    %114 = vector.extract_strided_slice %96 {offsets = [0, 0, 0, 0], sizes = [2, 8, 1, 128], strides = [1, 1, 1, 1]} : vector<2x8x8x128xf32> to vector<2x8x1x128xf32>
    %c0_165 = arith.constant 0 : index
    %c0_166 = arith.constant 0 : index
    %c7_167 = arith.constant 7 : index
    %c640_168 = arith.constant 640 : index
    %115 = vector.load %arg8[%c0_165, %c0_166, %c7_167, %c640_168] : memref<2x8x8x1152xf32, #tpu.memory_space<vmem>>, vector<2x8x1x128xf32>
    tpu.vector_store %arg8[%c0_165, %c0_166, %c7_167, %c640_168], %114 {strides = array<i32>} : memref<2x8x8x1152xf32, #tpu.memory_space<vmem>>, vector<2x8x1x128xf32>,
    %116 = vector.extract_strided_slice %96 {offsets = [0, 0, 1, 0], sizes = [2, 8, 7, 128], strides = [1, 1, 1, 1]} : vector<2x8x8x128xf32> to vector<2x8x7x128xf32>
    %c0_169 = arith.constant 0 : index
    %c0_170 = arith.constant 0 : index
    %c0_171 = arith.constant 0 : index
    %c640_172 = arith.constant 640 : index
    %117 = vector.load %arg8[%c0_169, %c0_170, %c0_171, %c640_172] : memref<2x8x8x1152xf32, #tpu.memory_space<vmem>>, vector<2x8x7x128xf32>
    tpu.vector_store %arg8[%c0_169, %c0_170, %c0_171, %c640_172], %116 {strides = array<i32>} : memref<2x8x8x1152xf32, #tpu.memory_space<vmem>>, vector<2x8x7x128xf32>,
    %118 = vector.extract_strided_slice %96 {offsets = [0, 1, 0, 0], sizes = [2, 7, 8, 128], strides = [1, 1, 1, 1]} : vector<2x8x8x128xf32> to vector<2x7x8x128xf32>
    %119 = vector.extract_strided_slice %96 {offsets = [0, 0, 0, 0], sizes = [2, 1, 8, 128], strides = [1, 1, 1, 1]} : vector<2x8x8x128xf32> to vector<2x1x8x128xf32>
    %120 = tpu.concatenate %118, %119 in 1 : vector<2x7x8x128xf32>, vector<2x1x8x128xf32> -> vector<2x8x8x128xf32>
    %121 = vector.extract_strided_slice %120 {offsets = [0, 0, 0, 0], sizes = [2, 8, 7, 128], strides = [1, 1, 1, 1]} : vector<2x8x8x128xf32> to vector<2x8x7x128xf32>
    %c0_173 = arith.constant 0 : index
    %c0_174 = arith.constant 0 : index
    %c1_175 = arith.constant 1 : index
    %c768_176 = arith.constant 768 : index
    %122 = vector.load %arg8[%c0_173, %c0_174, %c1_175, %c768_176] : memref<2x8x8x1152xf32, #tpu.memory_space<vmem>>, vector<2x8x7x128xf32>
    tpu.vector_store %arg8[%c0_173, %c0_174, %c1_175, %c768_176], %121 {strides = array<i32>} : memref<2x8x8x1152xf32, #tpu.memory_space<vmem>>, vector<2x8x7x128xf32>,
    %123 = vector.extract_strided_slice %120 {offsets = [0, 0, 7, 0], sizes = [2, 8, 1, 128], strides = [1, 1, 1, 1]} : vector<2x8x8x128xf32> to vector<2x8x1x128xf32>
    %c0_177 = arith.constant 0 : index
    %c0_178 = arith.constant 0 : index
    %c0_179 = arith.constant 0 : index
    %c768_180 = arith.constant 768 : index
    %124 = vector.load %arg8[%c0_177, %c0_178, %c0_179, %c768_180] : memref<2x8x8x1152xf32, #tpu.memory_space<vmem>>, vector<2x8x1x128xf32>
    tpu.vector_store %arg8[%c0_177, %c0_178, %c0_179, %c768_180], %123 {strides = array<i32>} : memref<2x8x8x1152xf32, #tpu.memory_space<vmem>>, vector<2x8x1x128xf32>,
    %c0_181 = arith.constant 0 : index
    %c0_182 = arith.constant 0 : index
    %c0_183 = arith.constant 0 : index
    %c896_184 = arith.constant 896 : index
    %125 = vector.load %arg8[%c0_181, %c0_182, %c0_183, %c896_184] : memref<2x8x8x1152xf32, #tpu.memory_space<vmem>>, vector<2x8x8x128xf32>
    tpu.vector_store %arg8[%c0_181, %c0_182, %c0_183, %c896_184], %120 {strides = array<i32>} : memref<2x8x8x1152xf32, #tpu.memory_space<vmem>>, vector<2x8x8x128xf32>,
    %126 = vector.extract_strided_slice %120 {offsets = [0, 0, 0, 0], sizes = [2, 8, 1, 128], strides = [1, 1, 1, 1]} : vector<2x8x8x128xf32> to vector<2x8x1x128xf32>
    %c0_185 = arith.constant 0 : index
    %c0_186 = arith.constant 0 : index
    %c7_187 = arith.constant 7 : index
    %c1024_188 = arith.constant 1024 : index
    %127 = vector.load %arg8[%c0_185, %c0_186, %c7_187, %c1024_188] : memref<2x8x8x1152xf32, #tpu.memory_space<vmem>>, vector<2x8x1x128xf32>
    tpu.vector_store %arg8[%c0_185, %c0_186, %c7_187, %c1024_188], %126 {strides = array<i32>} : memref<2x8x8x1152xf32, #tpu.memory_space<vmem>>, vector<2x8x1x128xf32>,
    %128 = vector.extract_strided_slice %120 {offsets = [0, 0, 1, 0], sizes = [2, 8, 7, 128], strides = [1, 1, 1, 1]} : vector<2x8x8x128xf32> to vector<2x8x7x128xf32>
    %c0_189 = arith.constant 0 : index
    %c0_190 = arith.constant 0 : index
    %c0_191 = arith.constant 0 : index
    %c1024_192 = arith.constant 1024 : index
    %129 = vector.load %arg8[%c0_189, %c0_190, %c0_191, %c1024_192] : memref<2x8x8x1152xf32, #tpu.memory_space<vmem>>, vector<2x8x7x128xf32>
    tpu.vector_store %arg8[%c0_189, %c0_190, %c0_191, %c1024_192], %128 {strides = array<i32>} : memref<2x8x8x1152xf32, #tpu.memory_space<vmem>>, vector<2x8x7x128xf32>,
    %c0_193 = arith.constant 0 : index
    %c0_194 = arith.constant 0 : index
    %c0_195 = arith.constant 0 : index
    %c0_196 = arith.constant 0 : index
    %130 = vector.load %arg8[%c0_193, %c0_194, %c0_195, %c0_196] : memref<2x8x8x1152xf32, #tpu.memory_space<vmem>>, vector<2x8x8x1152xf32>
    %131 = vector.shape_cast %130 : vector<2x8x8x1152xf32> to vector<128x1152xf32>
    %c0_197 = arith.constant 0 : index
    %c0_198 = arith.constant 0 : index
    %132 = vector.load %arg4[%c0_197, %c0_198] : memref<1152x128xf32, #tpu.memory_space<vmem>>, vector<1152x128xf32>
    %cst_199 = arith.constant dense<0.000000e+00> : vector<128x128xf32>
    %133 = tpu.matmul %131, %132, %cst_199 {dimension_numbers = #tpu.dot_dimension_numbers<[1], [0], [0], [1], [0, 0, 1, 1], [], []>} : vector<128x1152xf32>, vector<1152x128xf32>, vector<128x128xf32> -> vector<128x128xf32>
    %134 = vector.broadcast %95 : vector<1x128xf32> to vector<128x128xf32>
    %135 = arith.addf %133, %134 : vector<128x128xf32>
    %c0_200 = arith.constant 0 : index
    %c0_201 = arith.constant 0 : index
    %136 = vector.load %arg5[%c0_200, %c0_201] : memref<128x32xf32, #tpu.memory_space<vmem>>, vector<128x32xf32>
    %cst_202 = arith.constant dense<0.000000e+00> : vector<128x32xf32>
    %137 = tpu.matmul %135, %136, %cst_202 {dimension_numbers = #tpu.dot_dimension_numbers<[1], [0], [0], [1], [0, 0, 1, 1], [], []>} : vector<128x128xf32>, vector<128x32xf32>, vector<128x32xf32> -> vector<128x32xf32>
    %c5 = arith.constant 5 : index
    %c0_203 = arith.constant 0 : index
    %138 = vector.load %arg6[%c5, %c0_203] : memref<8x128xf32, #tpu.memory_space<vmem>>, vector<1x32xf32>
    %139 = vector.broadcast %138 : vector<1x32xf32> to vector<128x32xf32>
    %140 = arith.addf %137, %139 : vector<128x32xf32>
    %c0_204 = arith.constant 0 : index
    %c0_205 = arith.constant 0 : index
    %141 = vector.load %arg7[%c0_204, %c0_205] : memref<128x32xf32, #tpu.memory_space<vmem>>, vector<128x32xf32>
    tpu.vector_store %arg7[%c0_204, %c0_205], %140 {strides = array<i32>} : memref<128x32xf32, #tpu.memory_space<vmem>>, vector<128x32xf32>,
    return
  }
  func.func @transform_0(%arg0: i32) -> (i32, i32) {
    %c0_i32 = arith.constant 0 : i32
    %c0_i32_0 = arith.constant 0 : i32
    return %arg0, %c0_i32 : i32, i32
  }
  func.func @transform_1(%arg0: i32) -> (i32, i32) {
    %c0_i32 = arith.constant 0 : i32
    %c0_i32_0 = arith.constant 0 : i32
    %c0_i32_1 = arith.constant 0 : i32
    return %c0_i32, %c0_i32_0 : i32, i32
  }
  func.func @transform_2(%arg0: i32) -> (i32, i32) {
    %c0_i32 = arith.constant 0 : i32
    %c0_i32_0 = arith.constant 0 : i32
    %c0_i32_1 = arith.constant 0 : i32
    return %c0_i32, %c0_i32_0 : i32, i32
  }
  func.func @transform_3(%arg0: i32) -> (i32, i32) {
    %c0_i32 = arith.constant 0 : i32
    %c0_i32_0 = arith.constant 0 : i32
    %c0_i32_1 = arith.constant 0 : i32
    return %c0_i32, %c0_i32_0 : i32, i32
  }
  func.func @transform_4(%arg0: i32) -> (i32, i32) {
    %c0_i32 = arith.constant 0 : i32
    %c0_i32_0 = arith.constant 0 : i32
    %c0_i32_1 = arith.constant 0 : i32
    return %c0_i32, %c0_i32_0 : i32, i32
  }
  func.func @transform_5(%arg0: i32) -> (i32, i32) {
    %c0_i32 = arith.constant 0 : i32
    %c0_i32_0 = arith.constant 0 : i32
    %c0_i32_1 = arith.constant 0 : i32
    return %c0_i32, %c0_i32_0 : i32, i32
  }
  func.func @transform_6(%arg0: i32) -> (i32, i32) {
    %c0_i32 = arith.constant 0 : i32
    %c0_i32_0 = arith.constant 0 : i32
    return %arg0, %c0_i32 : i32, i32
  }
}

</mosaic_0001>

<bundles_post_ra>
// kernel: simple_layer_net_forward.1
= control target key start
LH: loop header
LB: loop body
LE: loop exit
PB: predicated region body
PF: predicated region fallthrough
CT: control target
= control target key end

     0   :  { %s6522_s21 = smov 0   ;;  %s9137_s0 = inlined_call_operand.vmem [shape: f32[256,128], index: 0, kind: input, shape index: {}]   ;;  %s9138_s1 = inlined_call_operand.vmem [shape: f32[1152,128], index: 1, kind: input, shape index: {}]   ;;  %s9139_s2 = inlined_call_operand.vmem [shape: f32[1152,128], index: 2, kind: input, shape index: {}]   ;;  %s9140_s3 = inlined_call_operand.vmem [shape: f32[1152,128], index: 3, kind: input, shape index: {}]   ;;  %s9141_s4 = inlined_call_operand.vmem [shape: f32[128,32], index: 4, kind: input, shape index: {}]   ;;  %s9142_s5 = inlined_call_operand.vmem [shape: f32[8,128], index: 5, kind: input, shape index: {}]   ;;  %s9143_s6 = inlined_call_operand.vmem [shape: f32[256,32], index: 6, kind: output, shape index: {}]  }
   0x1 LB: > { %s4630_s22 = sadd.s32 4294967295, %s6485_s21   ;;  %p4634_p0 = scmp.ge.s32.totalorder %s6485_s21, 1  ;;  %s6485_s21 = sphi %s6522_s21, %s16_s21  }
   0x2   : > { %p213_p1 = scmp.lt.s32.totalorder %s6485_s21, 3 }
   0x4   : > { %p214_p2 = pnand %p4634_p0, %p213_p1 }
   0x5   : > { %v753_v0 = vld [vmem:[%s9138_s1 + $0x80] sm:$0xff] (!%p214_p2)  ;;  %v754_v1 = vld [vmem:[%s9138_s1 + $0x88] sm:$0xff] (!%p214_p2)  ;;  %v755_v11 = vld [vmem:[%s9138_s1 + $0x90] sm:$0xff] (!%p214_p2)  ;;  %s6566_s25 = sshll.u32 (!%p214_p2), %s4630_s22, 4 }
   0x6   : > { %217 = sbr.rel (%p214_p2) target bundleno = 1445 (0x5a5), region = 44  ;;  %v737_v2 = vld [vmem:[%s9138_s1] sm:$0xff] (!%p214_p2)  ;;  %v5959_v3 = vpack.c.bf16 (!%p214_p2), %v754_v1, %v753_v0  ;;  %v738_v4 = vld [vmem:[%s9138_s1 + $0x8] sm:$0xff] (!%p214_p2)  ;;  %v756_v13 = vld [vmem:[%s9138_s1 + $0x98] sm:$0xff] (!%p214_p2)  ;;  %p244_p3 = scmp.lt.s32.totalorder (!%p214_p2), %s6566_s25, 31 }
   0x7   : > { %v785_v5 = vld [vmem:[%s9138_s1 + $0x180] sm:$0xff] (!%p214_p2)  ;;  %v786_v6 = vld [vmem:[%s9138_s1 + $0x188] sm:$0xff] (!%p214_p2)  ;;  %v5961_v7 = vpack.c.bf16 (!%p214_p2), %v738_v4, %v737_v2  ;;  %v739_v14 = vld [vmem:[%s9138_s1 + $0x10] sm:$0xff] (!%p214_p2)  ;;  %v5963_v16 = vpack.c.bf16 (!%p214_p2), %v756_v13, %v755_v11 }
   0x8   : > { %v5991_v8 = vpack.c.bf16 (!%p214_p2), %v786_v6, %v785_v5  ;;  %v769_v9 = vld [vmem:[%s9138_s1 + $0x100] sm:$0xff] (!%p214_p2)  ;;  %v770_v10 = vld [vmem:[%s9138_s1 + $0x108] sm:$0xff] (!%p214_p2)  ;;  %5960 = vmatprep.subr.bf16.mxu0 (!%p214_p2), %v5959_v3  ;;  %v740_v15 = vld [vmem:[%s9138_s1 + $0x18] sm:$0xff] (!%p214_p2) }
   0x9   : > { %v5993_v12 = vpack.c.bf16 (!%p214_p2), %v770_v10, %v769_v9  ;;  %5962 = vmatpush3.bf16.msra.mxu0 (!%p214_p2), %v5961_v7  ;;  %v5965_v17 = vpack.c.bf16 (!%p214_p2), %v740_v15, %v739_v14  ;;  %v787_v18 = vld [vmem:[%s9138_s1 + $0x190] sm:$0xff] (!%p214_p2)  ;;  %v788_v19 = vld [vmem:[%s9138_s1 + $0x198] sm:$0xff] (!%p214_p2)  ;;  %v757_v23 = vld [vmem:[%s9138_s1 + $0xa0] sm:$0xff] (!%p214_p2) }
   0xa   : > { %5992 = vmatprep.subr.bf16.mxu1 (!%p214_p2), %v5991_v8  ;;  %v771_v20 = vld [vmem:[%s9138_s1 + $0x110] sm:$0xff] (!%p214_p2)  ;;  %v5995_v21 = vpack.c.bf16 (!%p214_p2), %v788_v19, %v787_v18  ;;  %v772_v22 = vld [vmem:[%s9138_s1 + $0x118] sm:$0xff] (!%p214_p2)  ;;  %v758_v24 = vld [vmem:[%s9138_s1 + $0xa8] sm:$0xff] (!%p214_p2)  ;;  %5964 = vmatprep.subr.bf16.mxu0 (!%p214_p2), %v5963_v16 }
   0xb   : > { %5994 = vmatpush3.bf16.msra.mxu1 (!%p214_p2), %v5993_v12  ;;  %v5997_v25 = vpack.c.bf16 (!%p214_p2), %v772_v22, %v771_v20  ;;  %v5967_v26 = vpack.c.bf16 (!%p214_p2), %v758_v24, %v757_v23  ;;  %v741_v27 = vld [vmem:[%s9138_s1 + $0x20] sm:$0xff] (!%p214_p2)  ;;  %v742_v28 = vld [vmem:[%s9138_s1 + $0x28] sm:$0xff] (!%p214_p2)  ;;  %v759_v35 = vld [vmem:[%s9138_s1 + $0xb0] sm:$0xff] (!%p214_p2) }
   0xc   : > { %v789_v29 = vld [vmem:[%s9138_s1 + $0x1a0] sm:$0xff] (!%p214_p2)  ;;  %5996 = vmatprep.subr.bf16.mxu1 (!%p214_p2), %v5995_v21  ;;  %v790_v30 = vld [vmem:[%s9138_s1 + $0x1a8] sm:$0xff] (!%p214_p2)  ;;  %v5969_v33 = vpack.c.bf16 (!%p214_p2), %v742_v28, %v741_v27  ;;  %v760_v36 = vld [vmem:[%s9138_s1 + $0xb8] sm:$0xff] (!%p214_p2) }
   0xd   : > { %v773_v31 = vld [vmem:[%s9138_s1 + $0x120] sm:$0xff]  ;;  %v774_v32 = vld [vmem:[%s9138_s1 + $0x128] sm:$0xff]  ;;  %5966 = vmatpush3.bf16.msra.mxu0 %v5965_v17  ;;  %v5999_v34 = vpack.c.bf16 %v790_v30, %v789_v29  ;;  %v743_v37 = vld [vmem:[%s9138_s1 + $0x30] sm:$0xff]  ;;  %v5971_v39 = vpack.c.bf16 %v760_v36, %v759_v35  ;;  %s9145_s25 = smov (!%p244_p3, %s6566_s25), 31 }
   0xe   : > { %5968 = vmatprep.subr.bf16.mxu0 %v5967_v26  ;;  %v6001_v38 = vpack.c.bf16 %v774_v32, %v773_v31  ;;  %v744_v40 = vld [vmem:[%s9138_s1 + $0x38] sm:$0xff]  ;;  %v791_v41 = vld [vmem:[%s9138_s1 + $0x1b0] sm:$0xff]  ;;  %v761_v46 = vld [vmem:[%s9138_s1 + $0xc0] sm:$0xff]  ;;  %s4636_s17 = sshll.u32 %s9145_s25, 3 }
   0xf   : > { %5998 = vmatpush3.bf16.msra.mxu1 %v5997_v25  ;;  %v792_v42 = vld [vmem:[%s9138_s1 + $0x1b8] sm:$0xff]  ;;  %v775_v44 = vld [vmem:[%s9138_s1 + $0x130] sm:$0xff]  ;;  %v762_v47 = vld [vmem:[%s9138_s1 + $0xc8] sm:$0xff]  ;;  %v5973_v48 = vpack.c.bf16 %v744_v40, %v743_v37  ;;  %s6685_s8 = scalar_lea.vmem %s9137_s0, %s4636_s17  ;;  %s9100_s12 = scalar_lea.vmem %s9143_s6, %s4636_s17 }
  0x10   : > { %6000 = vmatprep.subr.bf16.mxu1 %v5999_v34  ;;  %v6003_v43 = vpack.c.bf16 %v792_v42, %v791_v41  ;;  %v776_v45 = vld [vmem:[%s9138_s1 + $0x138] sm:$0xff]  ;;  %v793_v49 = vld [vmem:[%s9138_s1 + $0x1c0] sm:$0xff]  ;;  %v794_v50 = vld [vmem:[%s9138_s1 + $0x1c8] sm:$0xff]  ;;  %v5975_v52 = vpack.c.bf16 %v762_v47, %v761_v46 }
  0x11   : > { %5970 = vmatpush3.bf16.msra.mxu0 %v5969_v33  ;;  %v6005_v51 = vpack.c.bf16 %v776_v45, %v775_v44  ;;  %v745_v53 = vld [vmem:[%s9138_s1 + $0x40] sm:$0xff]  ;;  %v746_v54 = vld [vmem:[%s9138_s1 + $0x48] sm:$0xff]  ;;  %v6007_v56 = vpack.c.bf16 %v794_v50, %v793_v49  ;;  %v763_v58 = vld [vmem:[%s9138_s1 + $0xd0] sm:$0xff] }
  0x12   : > { %5972 = vmatprep.subr.bf16.mxu0 %v5971_v39  ;;  %v777_v55 = vld [vmem:[%s9138_s1 + $0x140] sm:$0xff]  ;;  %v778_v57 = vld [vmem:[%s9138_s1 + $0x148] sm:$0xff]  ;;  %v764_v59 = vld [vmem:[%s9138_s1 + $0xd8] sm:$0xff]  ;;  %v5977_v62 = vpack.c.bf16 %v746_v54, %v745_v53 }
  0x13   : > { %6002 = vmatpush3.bf16.msra.mxu1 %v6001_v38  ;;  %v795_v60 = vld [vmem:[%s9138_s1 + $0x1d0] sm:$0xff]  ;;  %v796_v61 = vld [vmem:[%s9138_s1 + $0x1d8] sm:$0xff]  ;;  %v6009_v63 = vpack.c.bf16 %v778_v57, %v777_v55  ;;  %v5979_v0 = vpack.c.bf16 %v764_v59, %v763_v58  ;;  %v765_v6 = vld [vmem:[%s9138_s1 + $0xe0] sm:$0xff] }
  0x14   : > { %6004 = vmatprep.subr.bf16.mxu1 %v6003_v43  ;;  %v747_v1 = vld [vmem:[%s9138_s1 + $0x50] sm:$0xff]  ;;  %v748_v2 = vld [vmem:[%s9138_s1 + $0x58] sm:$0xff]  ;;  %v6011_v4 = vpack.c.bf16 %v796_v61, %v795_v60  ;;  %v766_v7 = vld [vmem:[%s9138_s1 + $0xe8] sm:$0xff] }
  0x15   : > { %5974 = vmatpush3.bf16.msra.mxu0 %v5973_v48  ;;  %v779_v3 = vld [vmem:[%s9138_s1 + $0x150] sm:$0xff]  ;;  %v780_v5 = vld [vmem:[%s9138_s1 + $0x158] sm:$0xff]  ;;  %v6699_v8 = vld [vmem:[%s9138_s1 + $0x1e0] sm:$0xff]  ;;  %v5981_v10 = vpack.c.bf16 %v748_v2, %v747_v1  ;;  %v5983_v14 = vpack.c.bf16 %v766_v7, %v765_v6 }
  0x16   : > { %5976 = vmatprep.subr.bf16.mxu0 %v5975_v52  ;;  %v6704_v9 = vld [vmem:[%s9138_s1 + $0x1e8] sm:$0xff]  ;;  %v6709_v11 = vld [vmem:[%s9138_s1 + $0x60] sm:$0xff]  ;;  %v262_v12 = vld [vmem:[%s6685_s8 + $0x38] sm:$0xff]  ;;  %v6013_v13 = vpack.c.bf16 %v780_v5, %v779_v3 }
  0x17   : > { %6006 = vmatpush3.bf16.msra.mxu1 %v6005_v51  ;;  %v6715_v15 = vld [vmem:[%s9138_s1 + $0x68] sm:$0xff]  ;;  %v6720_v16 = vld [vmem:[%s9138_s1 + $0x160] sm:$0xff]  ;;  %369 = vst [vmem:[#allocation2 + $0x17] sm:$0x1] %v262_v12  ;;  %472 = vst [vmem:[#allocation2 + $0x218] sm:$0xff] %v262_v12  ;;  %v289_v18 = vrot.slane %v262_v12, 7  ;;  %v6015_v20 = vpack.c.bf16 %v6704_v9, %v6699_v8  ;;  %949 = vmatprep.mubr.f32.mxu0 %v262_v12 }
  0x18   : > { %6008 = vmatprep.subr.bf16.mxu1 %v6007_v56  ;;  %v6725_v17 = vld [vmem:[%s9138_s1 + $0x168] sm:$0xff]  ;;  %488 = vst [vmem:[#allocation2 + $0x227] sm:$0x1] %v262_v12  ;;  %551 = vst [vmem:[#allocation2 + $0x1e8] sm:$0xff] %v262_v12  ;;  %v385_v19 = vrot.slane %v262_v12, 1  ;;  %v6732_v21 = vld [vmem:[%s9138_s1 + $0xf0] sm:$0xff]  ;;  %v5985_v29 = vpack.c.bf16 %v6715_v15, %v6709_v11 }
  0x19   : > { %5978 = vmatpush3.bf16.msra.mxu0 %v5977_v62  ;;  %567 = vst [vmem:[#allocation2 + $0x1f7] sm:$0x1] %v262_v12  ;;  %v6737_v22 = vld [vmem:[%s9138_s1 + $0xf8] sm:$0xff]  ;;  %v6740_v23 = vld [vmem:[%s6685_s8] sm:$0xff]  ;;  %v6745_v24 = vld [vmem:[%s9138_s1 + $0x1f0] sm:$0xff]  ;;  %v6017_v35 = vpack.c.bf16 %v6725_v17, %v6720_v16 }
  0x1a   : > { %5980 = vmatprep.subr.bf16.mxu0 %v5979_v0  ;;  %v6750_v25 = vld [vmem:[%s9138_s1 + $0x1f8] sm:$0xff]  ;;  %321 = vst [vmem:[#allocation2] sm:$0xff] %v289_v18   ;;  %440 = vst [vmem:[#allocation2 + $0x210] sm:$0xff] %v289_v18   ;;  %v290_v26 = vrot.slane %v6740_v23, 7  ;;  %v6759_v27 = vld [vmem:[%s6685_s8 + $0x8] sm:$0xff]  ;;  %v386_v28 = vrot.slane %v6740_v23, 1  ;;  %v5987_v36 = vpack.c.bf16 %v6737_v22, %v6732_v21 }
  0x1b   : > { %6010 = vmatpush3.bf16.msra.mxu1 %v6009_v63  ;;  %519 = vst [vmem:[#allocation2 + $0x1e0] sm:$0xff] %v289_v18   ;;  %370 = vst [vmem:[#allocation2 + $0x5f] sm:$0x1] %v6740_v23  ;;  %v6767_v30 = vld [vmem:[%s9138_s1 + $0x70] sm:$0xff]  ;;  %v6772_v31 = vld [vmem:[%s9138_s1 + $0x78] sm:$0xff]  ;;  %v291_v32 = vrot.slane %v6759_v27, 7  ;;  %v6019_v42 = vpack.c.bf16 %v6750_v25, %v6745_v24 }
  0x1c   : > { %6012 = vmatprep.subr.bf16.mxu1 %v6011_v4  ;;  %465 = vst [vmem:[#allocation2 + $0x20] sm:$0xff] %v6740_v23  ;;  %481 = vst [vmem:[#allocation2 + $0x2f] sm:$0x1] %v6740_v23  ;;  %v6779_v33 = vld [vmem:[%s6685_s8 + $0x10] sm:$0xff]  ;;  %v387_v34 = vrot.slane %v6759_v27, 1  ;;  %v6794_v38 = vld [vmem:[%s9138_s1 + $0x178] sm:$0xff]  ;;  %v5989_v51 = vpack.c.bf16 %v6772_v31, %v6767_v30 }
  0x1d   : > { %552 = vst [vmem:[#allocation2 + $0x230] sm:$0xff] %v6740_v23  ;;  %568 = vst [vmem:[#allocation2 + $0x23f] sm:$0x1] %v6740_v23  ;;  %5982 = vmatpush3.bf16.msra.mxu0 %v5981_v10  ;;  %v6789_v37 = vld [vmem:[%s9138_s1 + $0x170] sm:$0xff]  ;;  %v292_v39 = vrot.slane %v6779_v33, 7  ;;  %v6801_v40 = vld [vmem:[%s6685_s8 + $0x18] sm:$0xff] }
  0x1e   : > { %417 = vst [vmem:[#allocation2 + $0x10] sm:$0x7f] %v385_v19  ;;  %504 = vst [vmem:[#allocation2 + $0x220] sm:$0x7f] %v385_v19  ;;  %5984 = vmatprep.subr.bf16.mxu0 %v5983_v14  ;;  %v388_v41 = vrot.slane %v6779_v33, 1  ;;  %v6809_v43 = vld [vmem:[%s9138_s1 + $0x280] sm:$0xff]  ;;  %v6021_v55 = vpack.c.bf16 %v6794_v38, %v6789_v37 }
  0x1f   : > { %583 = vst [vmem:[#allocation2 + $0x1f0] sm:$0x7f] %v385_v19  ;;  %371 = vst [vmem:[#allocation2 + $0xa7] sm:$0x1] %v6759_v27  ;;  %6014 = vmatpush3.bf16.msra.mxu1 %v6013_v13  ;;  %v6814_v44 = vld [vmem:[%s9138_s1 + $0x288] sm:$0xff]  ;;  %v293_v45 = vrot.slane %v6801_v40, 7 }
  0x20   : > { %482 = vst [vmem:[#allocation2 + $0x77] sm:$0x1] %v6759_v27  ;;  %561 = vst [vmem:[#allocation2 + $0x47] sm:$0x1] %v6759_v27  ;;  %6016 = vmatprep.subr.bf16.mxu1 %v6015_v20  ;;  %v6821_v46 = vld [vmem:[%s6685_s8 + $0x20] sm:$0xff]  ;;  %v389_v47 = vrot.slane %v6801_v40, 1  ;;  %v6023_v56 = vpack.c.bf16 %v6814_v44, %v6809_v43 }
  0x21   : > { %433 = vst [vmem:[#allocation2 + $0x18] sm:$0xff] %v290_v26   ;;  %322 = vst [vmem:[#allocation2 + $0x48] sm:$0xff] %v290_v26   ;;  %v294_v48 = vrot.slane %v6821_v46, 7  ;;  %v6829_v49 = vld [vmem:[%s6685_s8 + $0x28] sm:$0xff]  ;;  %v390_v50 = vrot.slane %v6821_v46, 1  ;;  %5986 = vmatpush3.bf16.msra.mxu0 %v5985_v29  ;;  %v6839_v53 = vld [vmem:[%s6685_s8 + $0x30] sm:$0xff] }
  0x22   : > { %520 = vst [vmem:[#allocation2 + $0x228] sm:$0xff] %v290_v26   ;;  %418 = vst [vmem:[#allocation2 + $0x58] sm:$0x7f] %v386_v28  ;;  %v295_v52 = vrot.slane %v6829_v49, 7  ;;  %v391_v54 = vrot.slane %v6829_v49, 1  ;;  %5988 = vmatprep.subr.bf16.mxu0 %v5987_v36  ;;  %v6849_v57 = vld [vmem:[%s9138_s1 + $0x200] sm:$0xff] }
  0x23   : > { %497 = vst [vmem:[#allocation2 + $0x28] sm:$0x7f] %v386_v28  ;;  %584 = vst [vmem:[#allocation2 + $0x238] sm:$0x7f] %v386_v28  ;;  %6018 = vmatpush3.bf16.msra.mxu1 %v6017_v35  ;;  %v6854_v58 = vld [vmem:[%s9138_s1 + $0x208] sm:$0xff]  ;;  %v296_v59 = vrot.slane %v6839_v53, 7 }
  0x24   : > { %372 = vst [vmem:[#allocation2 + $0xef] sm:$0x1] %v6779_v33  ;;  %483 = vst [vmem:[#allocation2 + $0xbf] sm:$0x1] %v6779_v33  ;;  %v392_v60 = vrot.slane %v6839_v53, 1  ;;  %v6862_v61 = vld [vmem:[%s6685_s8 + $0x78] sm:$0xff]  ;;  %6020 = vmatprep.subr.bf16.mxu1 %v6019_v42  ;;  %v6025_v5 = vpack.c.bf16 %v6854_v58, %v6849_v57 }
  0x25   : > { %562 = vst [vmem:[#allocation2 + $0x8f] sm:$0x1] %v6779_v33  ;;  %434 = vst [vmem:[#allocation2 + $0x60] sm:$0xff] %v291_v32   ;;  %v297_v62 = vrot.slane %v6862_v61, 7  ;;  %v393_v63 = vrot.slane %v6862_v61, 1  ;;  %v819_v0 = vld [vmem:[%s9138_s1 + $0x290] sm:$0xff]  ;;  %5990 = vmatpush3.bf16.msra.mxu0 %v5989_v51 }
  0x26   : > { %323 = vst [vmem:[#allocation2 + $0x90] sm:$0xff] %v291_v32   ;;  %513 = vst [vmem:[#allocation2 + $0x30] sm:$0xff] %v291_v32   ;;  %v820_v1 = vld [vmem:[%s9138_s1 + $0x298] sm:$0xff]  ;;  %v6876_v2 = vld [vmem:[%s6685_s8 + $0x40] sm:$0xff]  ;;  %6024 = vmatprep.subr.bf16.mxu0 %v6023_v56 }
  0x27   : > { %419 = vst [vmem:[#allocation2 + $0xa0] sm:$0x7f] %v387_v34  ;;  %498 = vst [vmem:[#allocation2 + $0x70] sm:$0x7f] %v387_v34  ;;  %v593_v3 = vld [vmem:[#allocation2] sm:$0xff]  ;;  %v298_v6 = vrot.slane %v6876_v2, 7  ;;  %6022 = vmatpush3.bf16.msra.mxu1 %v6021_v55  ;;  %v6027_v10 = vpack.c.bf16 %v820_v1, %v819_v0 }
  0x28   : > { %577 = vst [vmem:[#allocation2 + $0x40] sm:$0x7f] %v387_v34  ;;  %373 = vst [vmem:[#allocation2 + $0x137] sm:$0x1] %v6801_v40  ;;  %v596_v4 = vld [vmem:[#allocation2 + $0x18] sm:$0xff]  ;;  %v394_v7 = vrot.slane %v6876_v2, 1  ;;  %950 = vmatmul.mubr.f32.vlgmr.msra.gmra.mrb[0].mxu0 %v593_v3 }
  0x29   : > { %484 = vst [vmem:[#allocation2 + $0x107] sm:$0x1] %v6801_v40  ;;  %563 = vst [vmem:[#allocation2 + $0xd7] sm:$0x1] %v6801_v40  ;;  %v595_v8 = vld [vmem:[#allocation2 + $0x10] sm:$0xff]  ;;  %1094 = vmatprep.mubr.f32.mxu1 %v596_v4  ;;  %v804_v12 = vld [vmem:[%s9138_s1 + $0x218] sm:$0xff]  ;;  %6026 = vmatpush3.bf16.msra.mxu0 %v6025_v5 }
  0x2a   : > { %435 = vst [vmem:[#allocation2 + $0xa8] sm:$0xff] %v292_v39   ;;  %324 = vst [vmem:[#allocation2 + $0xd8] sm:$0xff] %v292_v39   ;;  %v803_v11 = vld [vmem:[%s9138_s1 + $0x210] sm:$0xff]  ;;  %v821_v13 = vld [vmem:[%s9138_s1 + $0x2a0] sm:$0xff]  ;;  %1095 = vmatmul.mubr.f32.vlgmr.msra.gmra.mrb[0].mxu1 %v595_v8  ;;  %954 = vmatprep.mubr.f32.mxu0 %v6740_v23 }
  0x2b   : > { %514 = vst [vmem:[#allocation2 + $0x78] sm:$0xff] %v292_v39   ;;  %420 = vst [vmem:[#allocation2 + $0xe8] sm:$0x7f] %v388_v41  ;;  %v822_v14 = vld [vmem:[%s9138_s1 + $0x2a8] sm:$0xff]  ;;  %v604_v16 = vld [vmem:[#allocation2 + $0x58] sm:$0xff]  ;;  %v6029_v17 = vpack.c.bf16 %v804_v12, %v803_v11  ;;  %6028 = vmatprep.subr.bf16.mxu0 %v6027_v10 }
  0x2c   : > { %499 = vst [vmem:[#allocation2 + $0xb8] sm:$0x7f] %v388_v41  ;;  %578 = vst [vmem:[#allocation2 + $0x88] sm:$0x7f] %v388_v41  ;;  %v605_v9 = vld [vmem:[#allocation2 + $0x60] sm:$0xff]  ;;  %v602_v15 = vld [vmem:[#allocation2 + $0x48] sm:$0xff]  ;;  %v6031_v19 = vpack.c.bf16 %v822_v14, %v821_v13 }
  0x2d   : > { %374 = vst [vmem:[#allocation2 + $0x17f] sm:$0x1] %v6821_v46  ;;  %485 = vst [vmem:[#allocation2 + $0x14f] sm:$0x1] %v6821_v46  ;;  %1099 = vmatprep.mubr.f32.mxu1 %v605_v9  ;;  %v805_v20 = vld [vmem:[%s9138_s1 + $0x220] sm:$0xff]  ;;  %v806_v21 = vld [vmem:[%s9138_s1 + $0x228] sm:$0xff]  ;;  %955 = vmatmul.mubr.f32.gmra.mrb[2].mxu0 %v602_v15 }
  0x2e   : > { %564 = vst [vmem:[#allocation2 + $0x11f] sm:$0x1] %v6821_v46  ;;  %436 = vst [vmem:[#allocation2 + $0xf0] sm:$0xff] %v293_v45   ;;  %v611_v22 = vld [vmem:[#allocation2 + $0x90] sm:$0xff]  ;;  %v824_v24 = vld [vmem:[%s9138_s1 + $0x2b8] sm:$0xff]  ;;  %1100 = vmatmul.mubr.f32.gmra.mrb[2].mxu1 %v604_v16  ;;  %959 = vmatprep.mubr.f32.mxu0 %v6759_v27  ;;  %v6033_v32 = vpack.c.bf16 %v806_v21, %v805_v20 }
  0x2f   : > { %325 = vst [vmem:[#allocation2 + $0x120] sm:$0xff] %v293_v45   ;;  %515 = vst [vmem:[#allocation2 + $0xc0] sm:$0xff] %v293_v45   ;;  %v823_v23 = vld [vmem:[%s9138_s1 + $0x2b0] sm:$0xff]  ;;  %v6919_v26 = vld [vmem:[%s9138_s1 + $0x238] sm:$0xff]  ;;  %6030 = vmatpush3.bf16.msra.mxu0 %v6029_v17 }
  0x30   : > { %421 = vst [vmem:[#allocation2 + $0x130] sm:$0x7f] %v389_v47  ;;  %500 = vst [vmem:[#allocation2 + $0x100] sm:$0x7f] %v389_v47  ;;  %v6914_v25 = vld [vmem:[%s9138_s1 + $0x230] sm:$0xff]  ;;  %v849_v28 = vld [vmem:[%s9138_s1 + $0x380] sm:$0xff]  ;;  %6032 = vmatprep.subr.bf16.mxu0 %v6031_v19  ;;  %v6035_v39 = vpack.c.bf16 %v824_v24, %v823_v23 }
  0x31   : > { %579 = vst [vmem:[#allocation2 + $0xd0] sm:$0x7f] %v389_v47  ;;  %375 = vst [vmem:[#allocation2 + $0x1c7] sm:$0x1] %v6829_v49  ;;  %v614_v18 = vld [vmem:[#allocation2 + $0xa8] sm:$0xff]  ;;  %v833_v30 = vld [vmem:[%s9138_s1 + $0x300] sm:$0xff]  ;;  %960 = vmatmul.mubr.f32.gmra.mrb[4].mxu0 %v611_v22  ;;  %v6037_v58 = vpack.c.bf16 %v6919_v26, %v6914_v25 }
  0x32   : > { %486 = vst [vmem:[#allocation2 + $0x197] sm:$0x1] %v6829_v49  ;;  %565 = vst [vmem:[#allocation2 + $0x167] sm:$0x1] %v6829_v49  ;;  %v850_v29 = vld [vmem:[%s9138_s1 + $0x388] sm:$0xff]  ;;  %1104 = vmatprep.mubr.f32.mxu1 %v614_v18  ;;  %v613_v31 = vld [vmem:[#allocation2 + $0xa0] sm:$0xff]  ;;  %964 = vmatprep.mubr.f32.mxu0 %v6779_v33 }
  0x33   : > { %437 = vst [vmem:[#allocation2 + $0x138] sm:$0xff] %v294_v48   ;;  %326 = vst [vmem:[#allocation2 + $0x168] sm:$0xff] %v294_v48   ;;  %v6933_v34 = vld [vmem:[%s9138_s1 + $0x2c0] sm:$0xff]  ;;  %v6938_v35 = vld [vmem:[%s9138_s1 + $0x2c8] sm:$0xff]  ;;  %v6055_v36 = vpack.c.bf16 %v850_v29, %v849_v28  ;;  %1105 = vmatmul.mubr.f32.gmra.mrb[4].mxu1 %v613_v31  ;;  %6034 = vmatpush3.bf16.msra.mxu0 %v6033_v32 }
  0x34   : > { %516 = vst [vmem:[#allocation2 + $0x108] sm:$0xff] %v294_v48   ;;  %422 = vst [vmem:[#allocation2 + $0x178] sm:$0x7f] %v390_v50  ;;  %v834_v37 = vld [vmem:[%s9138_s1 + $0x308] sm:$0xff]  ;;  %v851_v43 = vld [vmem:[%s9138_s1 + $0x390] sm:$0xff]  ;;  %6036 = vmatprep.subr.bf16.mxu0 %v6035_v39  ;;  %v6039_v1 = vpack.c.bf16 %v6938_v35, %v6933_v34 }
  0x35   : > { %501 = vst [vmem:[#allocation2 + $0x148] sm:$0x7f] %v390_v50  ;;  %580 = vst [vmem:[#allocation2 + $0x118] sm:$0x7f] %v390_v50  ;;  %v623_v38 = vld [vmem:[#allocation2 + $0xf0] sm:$0xff]  ;;  %v6057_v41 = vpack.c.bf16 %v834_v37, %v833_v30  ;;  %v6944_v42 = vld [vmem:[%s6685_s8 + $0x48] sm:$0xff]  ;;  %6056 = vmatprep.subr.bf16.mxu1 %v6055_v36 }
  0x36   : > { %376 = vst [vmem:[#allocation2 + $0x20f] sm:$0x1] %v6839_v53  ;;  %487 = vst [vmem:[#allocation2 + $0x1df] sm:$0x1] %v6839_v53  ;;  %v299_v44 = vrot.slane %v6944_v42, 7  ;;  %v852_v45 = vld [vmem:[%s9138_s1 + $0x398] sm:$0xff]  ;;  %1109 = vmatprep.mubr.f32.mxu1 %v623_v38 }
  0x37   : > { %566 = vst [vmem:[#allocation2 + $0x1af] sm:$0x1] %v6839_v53  ;;  %438 = vst [vmem:[#allocation2 + $0x180] sm:$0xff] %v295_v52   ;;  %v6959_v47 = vld [vmem:[%s9138_s1 + $0x310] sm:$0xff]  ;;  %v6964_v48 = vld [vmem:[%s9138_s1 + $0x318] sm:$0xff]  ;;  %v395_v50 = vrot.slane %v6944_v42, 1  ;;  %v6059_v55 = vpack.c.bf16 %v852_v45, %v851_v43  ;;  %6058 = vmatpush3.bf16.msra.mxu1 %v6057_v41  ;;  %6038 = vmatpush3.bf16.msra.mxu0 %v6037_v58 }
  0x38   : > { %327 = vst [vmem:[#allocation2 + $0x1b0] sm:$0xff] %v295_v52   ;;  %517 = vst [vmem:[#allocation2 + $0x150] sm:$0xff] %v295_v52   ;;  %v620_v51 = vld [vmem:[#allocation2 + $0xd8] sm:$0xff]  ;;  %v622_v52 = vld [vmem:[#allocation2 + $0xe8] sm:$0xff]  ;;  %v6061_v3 = vpack.c.bf16 %v6964_v48, %v6959_v47  ;;  %6040 = vmatprep.subr.bf16.mxu0 %v6039_v1 }
  0x39   : > { %423 = vst [vmem:[#allocation2 + $0x1c0] sm:$0x7f] %v391_v54  ;;  %502 = vst [vmem:[#allocation2 + $0x190] sm:$0x7f] %v391_v54  ;;  %v6974_v56 = vld [vmem:[%s6685_s8 + $0x50] sm:$0xff]  ;;  %v629_v0 = vld [vmem:[#allocation2 + $0x120] sm:$0xff]  ;;  %965 = vmatmul.mubr.f32.gmra.mrb[6].mxu0 %v620_v51  ;;  %6060 = vmatprep.subr.bf16.mxu1 %v6059_v55 }
  0x3a   : > { %581 = vst [vmem:[#allocation2 + $0x160] sm:$0x7f] %v391_v54  ;;  %377 = vst [vmem:[#allocation2 + $0x257] sm:$0x1] %v6862_v61  ;;  %v6971_v54 = vld [vmem:[%s9138_s1 + $0x240] sm:$0xff]  ;;  %v632_v57 = vld [vmem:[#allocation2 + $0x138] sm:$0xff]  ;;  %1110 = vmatmul.mubr.f32.gmra.mrb[6].mxu1 %v622_v52  ;;  %969 = vmatprep.mubr.f32.mxu0 %v6801_v40 }
  0x3b   : > { %496 = vst [vmem:[#allocation2 + $0x467] sm:$0x1] %v6862_v61  ;;  %575 = vst [vmem:[#allocation2 + $0x437] sm:$0x1] %v6862_v61  ;;  %v6998_v4 = vld [vmem:[%s9138_s1 + $0x2d0] sm:$0xff]  ;;  %v7003_v5 = vld [vmem:[%s9138_s1 + $0x2d8] sm:$0xff]  ;;  %1114 = vmatprep.mubr.f32.mxu1 %v632_v57  ;;  %6062 = vmatpush3.bf16.msra.mxu1 %v6061_v3 }
  0x3c   : > { %439 = vst [vmem:[#allocation2 + $0x1c8] sm:$0xff] %v296_v59   ;;  %328 = vst [vmem:[#allocation2 + $0x1f8] sm:$0xff] %v296_v59   ;;  %v7011_v8 = vld [vmem:[%s9138_s1 + $0x320] sm:$0xff]  ;;  %v7016_v9 = vld [vmem:[%s9138_s1 + $0x328] sm:$0xff]  ;;  %v6043_v20 = vpack.c.bf16 %v7003_v5, %v6998_v4 }
  0x3d   : > { %518 = vst [vmem:[#allocation2 + $0x198] sm:$0xff] %v296_v59   ;;  %424 = vst [vmem:[#allocation2 + $0x208] sm:$0x7f] %v392_v60  ;;  %v6981_v59 = vld [vmem:[%s9138_s1 + $0x248] sm:$0xff]  ;;  %v7019_v10 = vld [vmem:[%s6685_s8 + $0x58] sm:$0xff]  ;;  %v6065_v22 = vpack.c.bf16 %v7016_v9, %v7011_v8  ;;  %970 = vmatmul.mubr.f32.gmra.mrb[8].mxu0 %v629_v0 }
  0x3e   : > { %503 = vst [vmem:[#allocation2 + $0x1d8] sm:$0x7f] %v392_v60  ;;  %582 = vst [vmem:[#allocation2 + $0x1a8] sm:$0x7f] %v392_v60  ;;  %v300_v60 = vrot.slane %v6974_v56, 7  ;;  %v631_v11 = vld [vmem:[#allocation2 + $0x130] sm:$0xff]  ;;  %v6041_v17 = vpack.c.bf16 %v6981_v59, %v6971_v54  ;;  %974 = vmatprep.mubr.f32.mxu0 %v6821_v46 }
  0x3f   : > { %329 = vst [vmem:[#allocation2 + $0x240] sm:$0xff] %v297_v62   ;;  %448 = vst [vmem:[#allocation2 + $0x450] sm:$0xff] %v297_v62   ;;  %v301_v12 = vrot.slane %v7019_v10, 7  ;;  %v7029_v13 = vld [vmem:[%s9138_s1 + $0x3b0] sm:$0xff]  ;;  %v7034_v14 = vld [vmem:[%s9138_s1 + $0x3b8] sm:$0xff]  ;;  %v397_v15 = vrot.slane %v7019_v10, 1  ;;  %1115 = vmatmul.mubr.f32.gmra.mrb[8].mxu1 %v631_v11 }
  0x40   : > { %527 = vst [vmem:[#allocation2 + $0x420] sm:$0xff] %v297_v62   ;;  %378 = vst [vmem:[#allocation2 + $0x29f] sm:$0x1] %v6876_v2  ;;  %v853_v62 = vld [vmem:[%s9138_s1 + $0x3a0] sm:$0xff]  ;;  %v7042_v18 = vld [vmem:[%s9138_s1 + $0x250] sm:$0xff]  ;;  %v6067_v28 = vpack.c.bf16 %v7034_v14, %v7029_v13  ;;  %6042 = vmatpush3.bf16.msra.mxu0 %v6041_v17 }
  0x41   : > { %489 = vst [vmem:[#allocation2 + $0x26f] sm:$0x1] %v6876_v2  ;;  %576 = vst [vmem:[#allocation2 + $0x47f] sm:$0x1] %v6876_v2  ;;  %v641_v16 = vld [vmem:[#allocation2 + $0x180] sm:$0xff]  ;;  %v7052_v21 = vld [vmem:[%s9138_s1 + $0x258] sm:$0xff]  ;;  %6044 = vmatprep.subr.bf16.mxu0 %v6043_v20 }
  0x42   : > { %425 = vst [vmem:[#allocation2 + $0x250] sm:$0x7f] %v393_v63  ;;  %512 = vst [vmem:[#allocation2 + $0x460] sm:$0x7f] %v393_v63  ;;  %v7045_v19 = vld [vmem:[%s6685_s8 + $0x60] sm:$0xff]  ;;  %v7059_v23 = vld [vmem:[%s9138_s1 + $0x330] sm:$0xff]  ;;  %1119 = vmatprep.mubr.f32.mxu1 %v641_v16  ;;  %v6045_v41 = vpack.c.bf16 %v7052_v21, %v7042_v18 }
  0x43   : > { %591 = vst [vmem:[#allocation2 + $0x430] sm:$0x7f] %v393_v63  ;;  %441 = vst [vmem:[#allocation2 + $0x258] sm:$0xff] %v298_v6   ;;  %v396_v63 = vrot.slane %v6974_v56, 1  ;;  %v7064_v24 = vld [vmem:[%s9138_s1 + $0x338] sm:$0xff]  ;;  %v302_v25 = vrot.slane %v7045_v19, 7 }
  0x44   : > { %330 = vst [vmem:[#allocation2 + $0x288] sm:$0xff] %v298_v6   ;;  %528 = vst [vmem:[#allocation2 + $0x468] sm:$0xff] %v298_v6   ;;  %v854_v6 = vld [vmem:[%s9138_s1 + $0x3a8] sm:$0xff]  ;;  %v398_v26 = vrot.slane %v7045_v19, 1  ;;  %v829_v29 = vld [vmem:[%s9138_s1 + $0x2e0] sm:$0xff]  ;;  %6046 = vmatpush3.bf16.msra.mxu0 %v6045_v41 }
  0x45   : > { %426 = vst [vmem:[#allocation2 + $0x298] sm:$0x7f] %v394_v7  ;;  %505 = vst [vmem:[#allocation2 + $0x268] sm:$0x7f] %v394_v7  ;;  %v830_v30 = vld [vmem:[%s9138_s1 + $0x2e8] sm:$0xff]  ;;  %v857_v34 = vld [vmem:[%s9138_s1 + $0x3c0] sm:$0xff] }
  0x46   : > { %592 = vst [vmem:[#allocation2 + $0x478] sm:$0x7f] %v394_v7  ;;  %379 = vst [vmem:[#allocation2 + $0x2e7] sm:$0x1] %v6944_v42  ;;  %v6063_v7 = vpack.c.bf16 %v854_v6, %v853_v62  ;;  %v7080_v31 = vld [vmem:[%s6685_s8 + $0x68] sm:$0xff]  ;;  %v640_v38 = vld [vmem:[#allocation2 + $0x178] sm:$0xff]  ;;  %v6047_v45 = vpack.c.bf16 %v830_v30, %v829_v29 }
  0x47   : > { %490 = vst [vmem:[#allocation2 + $0x2b7] sm:$0x1] %v6944_v42  ;;  %569 = vst [vmem:[#allocation2 + $0x287] sm:$0x1] %v6944_v42  ;;  %v638_v32 = vld [vmem:[#allocation2 + $0x168] sm:$0xff]  ;;  %v303_v36 = vrot.slane %v7080_v31, 7  ;;  %1120 = vmatmul.mubr.f32.gmra.mrb[10].mxu1 %v640_v38 }
  0x48   : > { %442 = vst [vmem:[#allocation2 + $0x2a0] sm:$0xff] %v299_v44   ;;  %331 = vst [vmem:[#allocation2 + $0x2d0] sm:$0xff] %v299_v44   ;;  %6064 = vmatprep.subr.bf16.mxu1 %v6063_v7  ;;  %v858_v35 = vld [vmem:[%s9138_s1 + $0x3c8] sm:$0xff]  ;;  %v399_v37 = vrot.slane %v7080_v31, 1  ;;  %v647_v43 = vld [vmem:[#allocation2 + $0x1b0] sm:$0xff]  ;;  %975 = vmatmul.mubr.f32.gmra.mrb[10].mxu0 %v638_v32 }
  0x49   : > { %521 = vst [vmem:[#allocation2 + $0x270] sm:$0xff] %v299_v44   ;;  %380 = vst [vmem:[#allocation2 + $0x32f] sm:$0x1] %v6974_v56  ;;  %v650_v39 = vld [vmem:[#allocation2 + $0x1c8] sm:$0xff]  ;;  %6066 = vmatpush3.bf16.msra.mxu1 %v6065_v22  ;;  %v6069_v44 = vpack.c.bf16 %v7064_v24, %v7059_v23  ;;  %v813_v47 = vld [vmem:[%s9138_s1 + $0x260] sm:$0xff]  ;;  %v6071_v51 = vpack.c.bf16 %v858_v35, %v857_v34  ;;  %979 = vmatprep.mubr.f32.mxu0 %v6829_v49 }
  0x4a   : > { %491 = vst [vmem:[#allocation2 + $0x2ff] sm:$0x1] %v6974_v56  ;;  %570 = vst [vmem:[#allocation2 + $0x2cf] sm:$0x1] %v6974_v56  ;;  %v814_v48 = vld [vmem:[%s9138_s1 + $0x268] sm:$0xff]  ;;  %6068 = vmatprep.subr.bf16.mxu1 %v6067_v28  ;;  %v831_v54 = vld [vmem:[%s9138_s1 + $0x2f0] sm:$0xff]  ;;  %1124 = vmatprep.mubr.f32.mxu1 %v650_v39 }
  0x4b   : > { %427 = vst [vmem:[#allocation2 + $0x2e0] sm:$0x7f] %v395_v50  ;;  %506 = vst [vmem:[#allocation2 + $0x2b0] sm:$0x7f] %v395_v50  ;;  %v842_v52 = vld [vmem:[%s9138_s1 + $0x348] sm:$0xff]  ;;  %v832_v55 = vld [vmem:[%s9138_s1 + $0x2f8] sm:$0xff]  ;;  %v6049_v62 = vpack.c.bf16 %v814_v48, %v813_v47  ;;  %6048 = vmatprep.subr.bf16.mxu0 %v6047_v45 }
  0x4c   : > { %585 = vst [vmem:[#allocation2 + $0x280] sm:$0x7f] %v395_v50  ;;  %443 = vst [vmem:[#allocation2 + $0x2e8] sm:$0xff] %v300_v60   ;;  %v841_v50 = vld [vmem:[%s9138_s1 + $0x340] sm:$0xff]  ;;  %v859_v57 = vld [vmem:[%s9138_s1 + $0x3d0] sm:$0xff]  ;;  %v6051_v4 = vpack.c.bf16 %v832_v55, %v831_v54  ;;  %980 = vmatmul.mubr.f32.gmra.mrb[12].mxu0 %v647_v43 }
  0x4d   : > { %332 = vst [vmem:[#allocation2 + $0x318] sm:$0xff] %v300_v60   ;;  %522 = vst [vmem:[#allocation2 + $0x2b8] sm:$0xff] %v300_v60   ;;  %v860_v58 = vld [vmem:[%s9138_s1 + $0x3d8] sm:$0xff]  ;;  %v7124_v59 = vld [vmem:[%s6685_s8 + $0x70] sm:$0xff]  ;;  %6070 = vmatpush3.bf16.msra.mxu1 %v6069_v44  ;;  %v6073_v3 = vpack.c.bf16 %v842_v52, %v841_v50  ;;  %984 = vmatprep.mubr.f32.mxu0 %v6839_v53 }
  0x4e   : > { %428 = vst [vmem:[#allocation2 + $0x328] sm:$0x7f] %v396_v63  ;;  %507 = vst [vmem:[#allocation2 + $0x2f8] sm:$0x7f] %v396_v63  ;;  %v649_v60 = vld [vmem:[#allocation2 + $0x1c0] sm:$0xff]  ;;  %v400_v0 = vrot.slane %v7124_v59, 1  ;;  %6072 = vmatprep.subr.bf16.mxu1 %v6071_v51  ;;  %v6075_v7 = vpack.c.bf16 %v860_v58, %v859_v57  ;;  %6050 = vmatpush3.bf16.msra.mxu0 %v6049_v62 }
  0x4f   : > { %586 = vst [vmem:[#allocation2 + $0x2c8] sm:$0x7f] %v396_v63  ;;  %381 = vst [vmem:[#allocation2 + $0x377] sm:$0x1] %v7019_v10  ;;  %v304_v63 = vrot.slane %v7124_v59, 7  ;;  %v659_v1 = vld [vmem:[#allocation2 + $0x210] sm:$0xff]  ;;  %1125 = vmatmul.mubr.f32.gmra.mrb[12].mxu1 %v649_v60  ;;  %6052 = vmatprep.subr.bf16.mxu0 %v6051_v4 }
  0x50   : > { %492 = vst [vmem:[#allocation2 + $0x347] sm:$0x1] %v7019_v10  ;;  %571 = vst [vmem:[#allocation2 + $0x317] sm:$0x1] %v7019_v10  ;;  %v815_v5 = vld [vmem:[%s9138_s1 + $0x270] sm:$0xff]  ;;  %v816_v6 = vld [vmem:[%s9138_s1 + $0x278] sm:$0xff]  ;;  %1129 = vmatprep.mubr.f32.mxu1 %v659_v1 }
  0x51   : > { %444 = vst [vmem:[#allocation2 + $0x330] sm:$0xff] %v301_v12   ;;  %333 = vst [vmem:[#allocation2 + $0x360] sm:$0xff] %v301_v12   ;;  %v843_v8 = vld [vmem:[%s9138_s1 + $0x350] sm:$0xff]  ;;  %v844_v9 = vld [vmem:[%s9138_s1 + $0x358] sm:$0xff]  ;;  %6074 = vmatpush3.bf16.msra.mxu1 %v6073_v3 }
  0x52   : > { %523 = vst [vmem:[#allocation2 + $0x300] sm:$0xff] %v301_v12   ;;  %382 = vst [vmem:[#allocation2 + $0x3bf] sm:$0x1] %v7045_v19  ;;  %v656_v11 = vld [vmem:[#allocation2 + $0x1f8] sm:$0xff]  ;;  %v861_v12 = vld [vmem:[%s9138_s1 + $0x3e0] sm:$0xff]  ;;  %v6077_v18 = vpack.c.bf16 %v844_v9, %v843_v8  ;;  %6076 = vmatprep.subr.bf16.mxu1 %v6075_v7 }
  0x53   : > { %493 = vst [vmem:[#allocation2 + $0x38f] sm:$0x1] %v7045_v19  ;;  %572 = vst [vmem:[#allocation2 + $0x35f] sm:$0x1] %v7045_v19  ;;  %v862_v13 = vld [vmem:[%s9138_s1 + $0x3e8] sm:$0xff]  ;;  %v665_v16 = vld [vmem:[#allocation2 + $0x240] sm:$0xff]  ;;  %985 = vmatmul.mubr.f32.gmra.mrb[14].mxu0 %v656_v11 }
  0x54   : > { %429 = vst [vmem:[#allocation2 + $0x370] sm:$0x7f] %v397_v15  ;;  %508 = vst [vmem:[#allocation2 + $0x340] sm:$0x7f] %v397_v15  ;;  %v658_v14 = vld [vmem:[#allocation2 + $0x208] sm:$0xff]  ;;  %v668_v17 = vld [vmem:[#allocation2 + $0x258] sm:$0xff]  ;;  %v6079_v20 = vpack.c.bf16 %v862_v13, %v861_v12  ;;  %989 = vmatprep.mubr.f32.mxu0 %v6862_v61 }
  0x55   : > { %587 = vst [vmem:[#allocation2 + $0x310] sm:$0x7f] %v397_v15  ;;  %445 = vst [vmem:[#allocation2 + $0x378] sm:$0xff] %v302_v25   ;;  %v6053_v15 = vpack.c.bf16 %v816_v6, %v815_v5  ;;  %v845_v21 = vld [vmem:[%s9138_s1 + $0x360] sm:$0xff]  ;;  %v846_v22 = vld [vmem:[%s9138_s1 + $0x368] sm:$0xff]  ;;  %1130 = vmatmul.mubr.f32.gmra.mrb[14].mxu1 %v658_v14 }
  0x56   : > { %334 = vst [vmem:[#allocation2 + $0x3a8] sm:$0xff] %v302_v25   ;;  %524 = vst [vmem:[#allocation2 + $0x348] sm:$0xff] %v302_v25   ;;  %v865_v23 = vld [vmem:[%s9138_s1 + $0x400] sm:$0xff]  ;;  %v863_v24 = vld [vmem:[%s9138_s1 + $0x3f0] sm:$0xff]  ;;  %1134 = vmatprep.mubr.f32.mxu1 %v668_v17  ;;  %6078 = vmatpush3.bf16.msra.mxu1 %v6077_v18  ;;  %v6081_v32 = vpack.c.bf16 %v846_v22, %v845_v21 }
  0x57   : > { %383 = vst [vmem:[#allocation2 + $0x407] sm:$0x1] %v7080_v31  ;;  %494 = vst [vmem:[#allocation2 + $0x3d7] sm:$0x1] %v7080_v31  ;;  %v864_v25 = vld [vmem:[%s9138_s1 + $0x3f8] sm:$0xff]  ;;  %v667_v28 = vld [vmem:[#allocation2 + $0x250] sm:$0xff]  ;;  %6054 = vmatpush3.bf16.msra.mxu0 %v6053_v15  ;;  %6080 = vmatprep.subr.bf16.mxu1 %v6079_v20 }
  0x58   : > { %573 = vst [vmem:[#allocation2 + $0x3a7] sm:$0x1] %v7080_v31  ;;  %430 = vst [vmem:[#allocation2 + $0x3b8] sm:$0x7f] %v398_v26  ;;  %v677_v30 = vld [vmem:[#allocation2 + $0x2a0] sm:$0xff]  ;;  %990 = vmatmul.mubr.f32.gmra.mrb[16].mxu0 %v665_v16  ;;  %v6083_v34 = vpack.c.bf16 %v864_v25, %v863_v24  ;;  %v847_v35 = vld [vmem:[%s9138_s1 + $0x370] sm:$0xff] }
  0x59   : > { %509 = vst [vmem:[#allocation2 + $0x388] sm:$0x7f] %v398_v26  ;;  %588 = vst [vmem:[#allocation2 + $0x358] sm:$0x7f] %v398_v26  ;;  %v866_v26 = vld [vmem:[%s9138_s1 + $0x408] sm:$0xff]  ;;  %1135 = vmatmul.mubr.f32.gmra.mrb[16].mxu1 %v667_v28  ;;  %994 = vmatprep.mubr.f32.mxu0 %v6876_v2  ;;  %v676_v38 = vld [vmem:[#allocation2 + $0x298] sm:$0xff] }
  0x5a   : > { %446 = vst [vmem:[#allocation2 + $0x3c0] sm:$0xff] %v303_v36   ;;  %335 = vst [vmem:[#allocation2 + $0x3f0] sm:$0xff] %v303_v36   ;;  %v7169_v29 = vpack.c.bf16 %v866_v26, %v865_v23  ;;  %1139 = vmatprep.mubr.f32.mxu1 %v677_v30  ;;  %v686_v39 = vld [vmem:[#allocation2 + $0x2e8] sm:$0xff]  ;;  %6082 = vmatpush3.bf16.msra.mxu1 %v6081_v32  ;;  %v683_v43 = vld [vmem:[#allocation2 + $0x2d0] sm:$0xff] }
  0x5b   : > { %525 = vst [vmem:[#allocation2 + $0x390] sm:$0xff] %v303_v36   ;;  %431 = vst [vmem:[#allocation2 + $0x400] sm:$0x7f] %v399_v37  ;;  %v848_v36 = vld [vmem:[%s9138_s1 + $0x378] sm:$0xff]  ;;  %6084 = vmatprep.subr.bf16.mxu1 %v6083_v34  ;;  %v685_v44 = vld [vmem:[#allocation2 + $0x2e0] sm:$0xff] }
  0x5c   : > { %510 = vst [vmem:[#allocation2 + $0x3d0] sm:$0x7f] %v399_v37  ;;  %589 = vst [vmem:[#allocation2 + $0x3a0] sm:$0x7f] %v399_v37  ;;  %v674_v37 = vld [vmem:[#allocation2 + $0x288] sm:$0xff]  ;;  %6088 = vmatprep.subr.bf16.mxu0 %v7169_v29  ;;  %v6085_v41 = vpack.c.bf16 %v848_v36, %v847_v35  ;;  %v695_v45 = vld [vmem:[#allocation2 + $0x330] sm:$0xff] }
  0x5d   : > { %384 = vst [vmem:[#allocation2 + $0x44f] sm:$0x1] %v7124_v59  ;;  %495 = vst [vmem:[#allocation2 + $0x41f] sm:$0x1] %v7124_v59  ;;  %995 = vmatmul.mubr.f32.gmra.mrb[18].mxu0 %v674_v37  ;;  %1140 = vmatmul.mubr.f32.gmra.mrb[18].mxu1 %v676_v38  ;;  %v692_v47 = vld [vmem:[#allocation2 + $0x318] sm:$0xff]  ;;  %v694_v48 = vld [vmem:[#allocation2 + $0x328] sm:$0xff] }
  0x5e   : > { %574 = vst [vmem:[#allocation2 + $0x3ef] sm:$0x1] %v7124_v59  ;;  %447 = vst [vmem:[#allocation2 + $0x408] sm:$0xff] %v304_v63   ;;  %999 = vmatprep.mubr.f32.mxu0 %v6944_v42  ;;  %1144 = vmatprep.mubr.f32.mxu1 %v686_v39  ;;  %v704_v50 = vld [vmem:[#allocation2 + $0x378] sm:$0xff]  ;;  %v701_v51 = vld [vmem:[#allocation2 + $0x360] sm:$0xff] }
  0x5f   : > { %336 = vst [vmem:[#allocation2 + $0x438] sm:$0xff] %v304_v63   ;;  %526 = vst [vmem:[#allocation2 + $0x3d8] sm:$0xff] %v304_v63   ;;  %6086 = vmatpush3.bf16.msra.mxu1 %v6085_v41  ;;  %v703_v52 = vld [vmem:[#allocation2 + $0x370] sm:$0xff]  ;;  %v710_v55 = vld [vmem:[#allocation2 + $0x3a8] sm:$0xff] }
  0x60   : > { %432 = vst [vmem:[#allocation2 + $0x448] sm:$0x7f] %v400_v0  ;;  %511 = vst [vmem:[#allocation2 + $0x418] sm:$0x7f] %v400_v0  ;;  %v712_v57 = vld [vmem:[#allocation2 + $0x3b8] sm:$0xff]  ;;  %v731_v63 = vld [vmem:[#allocation2 + $0x450] sm:$0xff] }
  0x61   : > { %590 = vst [vmem:[#allocation2 + $0x3e8] sm:$0x7f] %v400_v0  ;;  %1000 = vmatmul.mubr.f32.gmra.mrb[20].mxu0 %v683_v43  ;;  %1145 = vmatmul.mubr.f32.gmra.mrb[20].mxu1 %v685_v44  ;;  %v713_v54 = vld [vmem:[#allocation2 + $0x3c0] sm:$0xff]  ;;  %v719_v60 = vld [vmem:[#allocation2 + $0x3f0] sm:$0xff]  ;;  %v598_v3 = vld [vmem:[#allocation2 + $0x28] sm:$0xff] }
  0x62   : > { %1004 = vmatprep.mubr.f32.mxu0 %v6974_v56  ;;  %1149 = vmatprep.mubr.f32.mxu1 %v695_v45  ;;  %v721_v62 = vld [vmem:[#allocation2 + $0x400] sm:$0xff]  ;;  %v867_v4 = vld [vmem:[%s9138_s1 + $0x410] sm:$0xff]  ;;  %v868_v5 = vld [vmem:[%s9138_s1 + $0x418] sm:$0xff] }
  0x63   : > { %v597_v6 = vld [vmem:[#allocation2 + $0x20] sm:$0xff]  ;;  %v599_v7 = vld [vmem:[#allocation2 + $0x30] sm:$0xff]  ;;  %v6091_v9 = vpack.c.bf16 %v868_v5, %v867_v4  ;;  %v870_v12 = vld [vmem:[%s9138_s1 + $0x428] sm:$0xff] }
  0x64   : > { %v607_v8 = vld [vmem:[#allocation2 + $0x70] sm:$0xff]  ;;  %v869_v11 = vld [vmem:[%s9138_s1 + $0x420] sm:$0xff]  ;;  %v608_v13 = vld [vmem:[#allocation2 + $0x78] sm:$0xff] }
  0x65   : > { %1005 = vmatmul.mubr.f32.gmra.mrb[22].mxu0 %v692_v47  ;;  %1150 = vmatmul.mubr.f32.gmra.mrb[22].mxu1 %v694_v48  ;;  %v722_v58 = vld [vmem:[#allocation2 + $0x408] sm:$0xff]  ;;  %v616_v14 = vld [vmem:[#allocation2 + $0xb8] sm:$0xff]  ;;  %v6095_v15 = vpack.c.bf16 %v870_v12, %v869_v11  ;;  %v871_v16 = vld [vmem:[%s9138_s1 + $0x430] sm:$0xff] }
  0x66   : > { %1009 = vmatprep.mubr.f32.mxu0 %v7019_v10  ;;  %1154 = vmatprep.mubr.f32.mxu1 %v704_v50  ;;  %v728_v0 = vld [vmem:[#allocation2 + $0x438] sm:$0xff]  ;;  %v617_v18 = vld [vmem:[#allocation2 + $0xc0] sm:$0xff]  ;;  %v874_v22 = vld [vmem:[%s9138_s1 + $0x448] sm:$0xff] }
  0x67   : > { %v730_v1 = vld [vmem:[#allocation2 + $0x448] sm:$0xff]  ;;  %v872_v17 = vld [vmem:[%s9138_s1 + $0x438] sm:$0xff]  ;;  %v625_v20 = vld [vmem:[#allocation2 + $0x100] sm:$0xff] }
  0x68   : > { %v6099_v21 = vpack.c.bf16 %v872_v17, %v871_v16  ;;  %v626_v23 = vld [vmem:[#allocation2 + $0x108] sm:$0xff]  ;;  %v876_v26 = vld [vmem:[%s9138_s1 + $0x458] sm:$0xff]  ;;  %v635_v28 = vld [vmem:[#allocation2 + $0x150] sm:$0xff] }
  0x69   : > { %1010 = vmatmul.mubr.f32.gmra.mrb[24].mxu0 %v701_v51  ;;  %1155 = vmatmul.mubr.f32.gmra.mrb[24].mxu1 %v703_v52  ;;  %v634_v24 = vld [vmem:[#allocation2 + $0x148] sm:$0xff]  ;;  %v644_v34 = vld [vmem:[#allocation2 + $0x198] sm:$0xff]  ;;  %v653_v39 = vld [vmem:[#allocation2 + $0x1e0] sm:$0xff] }
  0x6a   : > { %1014 = vmatprep.mubr.f32.mxu0 %v7045_v19  ;;  %1159 = vmatprep.mubr.f32.mxu1 %v713_v54  ;;  %v878_v32 = vld [vmem:[%s9138_s1 + $0x468] sm:$0xff]  ;;  %v652_v35 = vld [vmem:[#allocation2 + $0x1d8] sm:$0xff]  ;;  %v661_v41 = vld [vmem:[#allocation2 + $0x220] sm:$0xff] }
  0x6b   : > { %v654_v36 = vld [vmem:[#allocation2 + $0x1e8] sm:$0xff]  ;;  %v880_v38 = vld [vmem:[%s9138_s1 + $0x478] sm:$0xff]  ;;  %v663_v43 = vld [vmem:[#allocation2 + $0x230] sm:$0xff] }
  0x6c   : > { %v662_v45 = vld [vmem:[#allocation2 + $0x228] sm:$0xff]  ;;  %v671_v48 = vld [vmem:[#allocation2 + $0x270] sm:$0xff]  ;;  %v688_v51 = vld [vmem:[#allocation2 + $0x2f8] sm:$0xff] }
  0x6d   : > { %1015 = vmatmul.mubr.f32.gmra.mrb[26].mxu0 %v710_v55  ;;  %1160 = vmatmul.mubr.f32.gmra.mrb[26].mxu1 %v712_v57  ;;  %v670_v47 = vld [vmem:[#allocation2 + $0x268] sm:$0xff]  ;;  %v679_v50 = vld [vmem:[#allocation2 + $0x2b0] sm:$0xff]  ;;  %v689_v52 = vld [vmem:[#allocation2 + $0x300] sm:$0xff] }
  0x6e   : > { %1019 = vmatprep.mubr.f32.mxu0 %v7080_v31  ;;  %1164 = vmatprep.mubr.f32.mxu1 %v722_v58  ;;  %v697_v54 = vld [vmem:[#allocation2 + $0x340] sm:$0xff]  ;;  %v698_v55 = vld [vmem:[#allocation2 + $0x348] sm:$0xff]  ;;  %v715_v58 = vld [vmem:[#allocation2 + $0x3d0] sm:$0xff] }
  0x6f   : > { %v706_v57 = vld [vmem:[#allocation2 + $0x388] sm:$0xff]  ;;  %v664_v5 = vld [vmem:[#allocation2 + $0x238] sm:$0xff]  ;;  %v727_v11 = vld [vmem:[#allocation2 + $0x430] sm:$0xff] }
  0x70   : > { %v646_v4 = vld [vmem:[#allocation2 + $0x1a8] sm:$0xff]  ;;  %v736_v12 = vld [vmem:[#allocation2 + $0x478] sm:$0xff]  ;;  %v2128_v16 = vld [vmem:[%s9139_s2] sm:$0xff] }
  0x71   : > { %1020 = vmatmul.mubr.f32.gmra.mrb[28].mxu0 %v719_v60  ;;  %1165 = vmatmul.mubr.f32.gmra.mrb[28].mxu1 %v721_v62  ;;  %v724_v60 = vld [vmem:[#allocation2 + $0x418] sm:$0xff]  ;;  %v733_v62 = vld [vmem:[#allocation2 + $0x460] sm:$0xff]  ;;  %v2129_v17 = vld [vmem:[%s9139_s2 + $0x8] sm:$0xff] }
  0x72   : > { %1024 = vmatprep.mubr.f32.mxu0 %v7124_v59  ;;  %1169 = vmatprep.mubr.f32.mxu1 %v731_v63  ;;  %v601_v63 = vld [vmem:[#allocation2 + $0x40] sm:$0xff] }
  0x75   : > { %1025 = vmatmul.mubr.f32.gmra.mrb[30].mxu0 %v728_v0  ;;  %1170 = vmatmul.mubr.f32.gmra.mrb[30].mxu1 %v730_v1  ;;  %v610_v0 = vld [vmem:[#allocation2 + $0x88] sm:$0xff]  ;;  %v628_v1 = vld [vmem:[#allocation2 + $0x118] sm:$0xff] }
  0x76   : > { %1239 = vmatprep.mubr.f32.mxu0 %v598_v3  ;;  %1384 = vmatprep.mubr.f32.mxu1 %v6759_v27  ;;  %v637_v3 = vld [vmem:[#allocation2 + $0x160] sm:$0xff] }
  0x79   : > { %1240 = vmatmul.mubr.f32.vlgmr.msra.gmra.mrb[32].mxu0 %v597_v6  ;;  %1385 = vmatmul.mubr.f32.vlgmr.msra.gmra.mrb[32].mxu1 %v599_v7  ;;  %v682_v6 = vld [vmem:[#allocation2 + $0x2c8] sm:$0xff]  ;;  %v700_v7 = vld [vmem:[#allocation2 + $0x358] sm:$0xff] }
  0x7a   : > { %6090 = vmatpush3.bf16.msra.mxu0 %v7169_v29  ;;  %1244 = vmatprep.mubr.f32.mxu0 %v607_v8  ;;  %v643_v29 = vld [vmem:[#allocation2 + $0x190] sm:$0xff]  ;;  %v709_v8 = vld [vmem:[#allocation2 + $0x3a0] sm:$0xff] }
  0x7b   : > { %1389 = vmatprep.mubr.f32.mxu1 %v6779_v33  ;;  %6092 = vmatprep.subr.bf16.mxu0 %v6091_v9 }
  0x7d   : > { %1245 = vmatmul.mubr.f32.gmra.mrb[34].mxu0 %v6759_v27  ;;  %1390 = vmatmul.mubr.f32.gmra.mrb[34].mxu1 %v608_v13  ;;  %v873_v27 = vld [vmem:[%s9138_s1 + $0x440] sm:$0xff] }
  0x7e   : > { %1249 = vmatprep.mubr.f32.mxu0 %v616_v14  ;;  %1394 = vmatprep.mubr.f32.mxu1 %v6801_v40  ;;  %v6103_v25 = vpack.c.bf16 %v874_v22, %v873_v27  ;;  %v2144_v13 = vld [vmem:[%s9139_s2 + $0x80] sm:$0xff]  ;;  %v2145_v14 = vld [vmem:[%s9139_s2 + $0x88] sm:$0xff]  ;;  %v2130_v22 = vld [vmem:[%s9139_s2 + $0x10] sm:$0xff] }
  0x7f   : > { %6094 = vmatpush3.bf16.msra.mxu0 %v6091_v9  ;;  %v718_v9 = vld [vmem:[#allocation2 + $0x3e8] sm:$0xff] }
  0x80   : > { %6096 = vmatprep.subr.bf16.mxu0 %v6095_v15 }
  0x81   : > { %1250 = vmatmul.mubr.f32.gmra.mrb[36].mxu0 %v6779_v33  ;;  %1395 = vmatmul.mubr.f32.gmra.mrb[36].mxu1 %v617_v18  ;;  %v875_v33 = vld [vmem:[%s9138_s1 + $0x450] sm:$0xff]  ;;  %v6121_v18 = vpack.c.bf16 %v2129_v17, %v2128_v16 }
  0x82   : > { %1254 = vmatprep.mubr.f32.mxu0 %v625_v20  ;;  %1399 = vmatprep.mubr.f32.mxu1 %v6821_v46  ;;  %v6107_v30 = vpack.c.bf16 %v876_v26, %v875_v33  ;;  %v2146_v20 = vld [vmem:[%s9139_s2 + $0x90] sm:$0xff]  ;;  %v2149_v33 = vld [vmem:[%s9139_s2 + $0xa8] sm:$0xff] }
  0x83   : > { %6098 = vmatpush3.bf16.msra.mxu0 %v6095_v15  ;;  %v6119_v15 = vpack.c.bf16 %v2145_v14, %v2144_v13  ;;  %v2166_v14 = vld [vmem:[%s9139_s2 + $0x130] sm:$0xff] }
  0x84   : > { %6100 = vmatprep.subr.bf16.mxu0 %v6099_v21 }
  0x85   : > { %1255 = vmatmul.mubr.f32.gmra.mrb[38].mxu0 %v6801_v40  ;;  %1400 = vmatmul.mubr.f32.gmra.mrb[38].mxu1 %v626_v23  ;;  %v877_v40 = vld [vmem:[%s9138_s1 + $0x460] sm:$0xff]  ;;  %v2131_v23 = vld [vmem:[%s9139_s2 + $0x18] sm:$0xff] }
  0x86   : > { %1259 = vmatprep.mubr.f32.mxu0 %v634_v24  ;;  %1404 = vmatprep.mubr.f32.mxu1 %v6829_v49  ;;  %v6111_v37 = vpack.c.bf16 %v878_v32, %v877_v40  ;;  %v6125_v24 = vpack.c.bf16 %v2131_v23, %v2130_v22  ;;  %v2150_v40 = vld [vmem:[%s9139_s2 + $0xb0] sm:$0xff]  ;;  %v2151_v32 = vld [vmem:[%s9139_s2 + $0xb8] sm:$0xff]  ;;  %v2184_v22 = vld [vmem:[%s9139_s2 + $0x1c0] sm:$0xff] }
  0x87   : > { %6102 = vmatpush3.bf16.msra.mxu0 %v6099_v21  ;;  %6120 = vmatprep.subr.bf16.mxu1 %v6119_v15  ;;  %v2147_v21 = vld [vmem:[%s9139_s2 + $0x98] sm:$0xff]  ;;  %v2185_v23 = vld [vmem:[%s9139_s2 + $0x1c8] sm:$0xff] }
  0x88   : > { %6104 = vmatprep.subr.bf16.mxu0 %v6103_v25  ;;  %6122 = vmatpush3.bf16.msra.mxu1 %v6121_v18  ;;  %v6123_v27 = vpack.c.bf16 %v2147_v21, %v2146_v20  ;;  %v2167_v15 = vld [vmem:[%s9139_s2 + $0x138] sm:$0xff] }
  0x89   : > { %1260 = vmatmul.mubr.f32.gmra.mrb[40].mxu0 %v6821_v46  ;;  %1405 = vmatmul.mubr.f32.gmra.mrb[40].mxu1 %v635_v28  ;;  %v879_v46 = vld [vmem:[%s9138_s1 + $0x470] sm:$0xff]  ;;  %v2132_v28 = vld [vmem:[%s9139_s2 + $0x20] sm:$0xff]  ;;  %v6165_v17 = vpack.c.bf16 %v2167_v15, %v2166_v14  ;;  %v2159_v15 = vld [vmem:[%s9139_s2 + $0xf8] sm:$0xff] }
  0x8a   : > { %1264 = vmatprep.mubr.f32.mxu0 %v643_v29  ;;  %1409 = vmatprep.mubr.f32.mxu1 %v6839_v53  ;;  %v6115_v44 = vpack.c.bf16 %v880_v38, %v879_v46  ;;  %v2133_v29 = vld [vmem:[%s9139_s2 + $0x28] sm:$0xff]  ;;  %v2176_v46 = vld [vmem:[%s9139_s2 + $0x180] sm:$0xff]  ;;  %v2158_v14 = vld [vmem:[%s9139_s2 + $0xf0] sm:$0xff] }
  0x8b   : > { %6106 = vmatpush3.bf16.msra.mxu0 %v6103_v25  ;;  %6124 = vmatprep.subr.bf16.mxu1 %v6123_v27  ;;  %v2148_v25 = vld [vmem:[%s9139_s2 + $0xa0] sm:$0xff]  ;;  %v2177_v38 = vld [vmem:[%s9139_s2 + $0x188] sm:$0xff] }
  0x8c   : > { %6108 = vmatprep.subr.bf16.mxu0 %v6107_v30  ;;  %6126 = vmatpush3.bf16.msra.mxu1 %v6125_v24  ;;  %v6127_v26 = vpack.c.bf16 %v2149_v33, %v2148_v25 }
  0x8d   : > { %1265 = vmatmul.mubr.f32.gmra.mrb[42].mxu0 %v6829_v49  ;;  %1410 = vmatmul.mubr.f32.gmra.mrb[42].mxu1 %v644_v34  ;;  %v660_v49 = vld [vmem:[#allocation2 + $0x218] sm:$0xff]  ;;  %v6131_v34 = vpack.c.bf16 %v2151_v32, %v2150_v40 }
  0x8e   : > { %1269 = vmatprep.mubr.f32.mxu0 %v652_v35  ;;  %1414 = vmatprep.mubr.f32.mxu1 %v654_v36  ;;  %v2134_v35 = vld [vmem:[%s9139_s2 + $0x30] sm:$0xff]  ;;  %v2135_v36 = vld [vmem:[%s9139_s2 + $0x38] sm:$0xff] }
  0x8f   : > { %6110 = vmatpush3.bf16.msra.mxu0 %v6107_v30  ;;  %6128 = vmatprep.subr.bf16.mxu1 %v6127_v26  ;;  %v6129_v30 = vpack.c.bf16 %v2133_v29, %v2132_v28  ;;  %v6167_v26 = vpack.c.bf16 %v2185_v23, %v2184_v22  ;;  %v2168_v28 = vld [vmem:[%s9139_s2 + $0x140] sm:$0xff]  ;;  %v2169_v29 = vld [vmem:[%s9139_s2 + $0x148] sm:$0xff]  ;;  %v2143_v22 = vld [vmem:[%s9139_s2 + $0x78] sm:$0xff] }
  0x90   : > { %6112 = vmatprep.subr.bf16.mxu0 %v6111_v37  ;;  %v6169_v40 = vpack.c.bf16 %v2169_v29, %v2168_v28  ;;  %v2191_v23 = vld [vmem:[%s9139_s2 + $0x1f8] sm:$0xff]  ;;  %v2174_v28 = vld [vmem:[%s9139_s2 + $0x170] sm:$0xff] }
  0x91   : > { %1270 = vmatmul.mubr.f32.gmra.mrb[44].mxu0 %v6839_v53  ;;  %1415 = vmatmul.mubr.f32.gmra.mrb[44].mxu1 %v653_v39  ;;  %v680_v53 = vld [vmem:[#allocation2 + $0x2b8] sm:$0xff]  ;;  %v6151_v39 = vpack.c.bf16 %v2177_v38, %v2176_v46 }
  0x92   : > { %1274 = vmatprep.mubr.f32.mxu0 %v661_v41  ;;  %1419 = vmatprep.mubr.f32.mxu1 %v663_v43  ;;  %v2160_v41 = vld [vmem:[%s9139_s2 + $0x100] sm:$0xff]  ;;  %v2161_v43 = vld [vmem:[%s9139_s2 + $0x108] sm:$0xff]  ;;  %v2175_v29 = vld [vmem:[%s9139_s2 + $0x178] sm:$0xff] }
  0x93   : > { %6114 = vmatpush3.bf16.msra.mxu0 %v6111_v37  ;;  %6130 = vmatpush3.bf16.msra.mxu1 %v6129_v30  ;;  %v6133_v37 = vpack.c.bf16 %v2135_v36, %v2134_v35  ;;  %v2154_v35 = vld [vmem:[%s9139_s2 + $0xd0] sm:$0xff]  ;;  %v2155_v36 = vld [vmem:[%s9139_s2 + $0xd8] sm:$0xff] }
  0x94   : > { %6116 = vmatprep.subr.bf16.mxu0 %v6115_v44  ;;  %6132 = vmatprep.subr.bf16.mxu1 %v6131_v34  ;;  %v6139_v38 = vpack.c.bf16 %v2155_v36, %v2154_v35 }
  0x95   : > { %1275 = vmatmul.mubr.f32.gmra.mrb[46].mxu0 %v660_v49  ;;  %1420 = vmatmul.mubr.f32.gmra.mrb[46].mxu1 %v662_v45  ;;  %v2152_v49 = vld [vmem:[%s9139_s2 + $0xc0] sm:$0xff]  ;;  %v2153_v45 = vld [vmem:[%s9139_s2 + $0xc8] sm:$0xff] }
  0x96   : > { %1279 = vmatprep.mubr.f32.mxu0 %v670_v47  ;;  %1424 = vmatprep.mubr.f32.mxu1 %v6944_v42  ;;  %v6135_v47 = vpack.c.bf16 %v2153_v45, %v2152_v49 }
  0x97   : > { %6118 = vmatpush3.bf16.msra.mxu0 %v6115_v44  ;;  %6134 = vmatpush3.bf16.msra.mxu1 %v6133_v37  ;;  %v6153_v44 = vpack.c.bf16 %v2161_v43, %v2160_v41  ;;  %v2139_v41 = vld [vmem:[%s9139_s2 + $0x58] sm:$0xff]  ;;  %v2186_v43 = vld [vmem:[%s9139_s2 + $0x1d0] sm:$0xff] }
  0x98   : > { %6152 = vmatprep.subr.bf16.mxu0 %v6151_v39  ;;  %6136 = vmatprep.subr.bf16.mxu1 %v6135_v47  ;;  %v2138_v39 = vld [vmem:[%s9139_s2 + $0x50] sm:$0xff] }
  0x99   : > { %1280 = vmatmul.mubr.f32.gmra.mrb[48].mxu0 %v6876_v2  ;;  %1425 = vmatmul.mubr.f32.gmra.mrb[48].mxu1 %v671_v48  ;;  %v2178_v48 = vld [vmem:[%s9139_s2 + $0x190] sm:$0xff]  ;;  %v6141_v47 = vpack.c.bf16 %v2139_v41, %v2138_v39 }
  0x9a   : > { %1284 = vmatprep.mubr.f32.mxu0 %v679_v50  ;;  %1429 = vmatprep.mubr.f32.mxu1 %v6974_v56  ;;  %v2179_v50 = vld [vmem:[%s9139_s2 + $0x198] sm:$0xff] }
  0x9d   : > { %1285 = vmatmul.mubr.f32.gmra.mrb[50].mxu0 %v6944_v42  ;;  %1430 = vmatmul.mubr.f32.gmra.mrb[50].mxu1 %v680_v53  ;;  %v707_v42 = vld [vmem:[#allocation2 + $0x390] sm:$0xff]  ;;  %v6155_v53 = vpack.c.bf16 %v2179_v50, %v2178_v48  ;;  %v2187_v48 = vld [vmem:[%s9139_s2 + $0x1d8] sm:$0xff] }
  0x9e   : > { %1289 = vmatprep.mubr.f32.mxu0 %v688_v51  ;;  %1434 = vmatprep.mubr.f32.mxu1 %v7019_v10  ;;  %v2162_v51 = vld [vmem:[%s9139_s2 + $0x110] sm:$0xff] }
  0x9f   : > { %v2170_v50 = vld [vmem:[%s9139_s2 + $0x150] sm:$0xff] }
  0xa1   : > { %1290 = vmatmul.mubr.f32.gmra.mrb[52].mxu0 %v6974_v56  ;;  %1435 = vmatmul.mubr.f32.gmra.mrb[52].mxu1 %v689_v52  ;;  %v716_v56 = vld [vmem:[#allocation2 + $0x3d8] sm:$0xff] }
  0xa2   : > { %1294 = vmatprep.mubr.f32.mxu0 %v697_v54  ;;  %1439 = vmatprep.mubr.f32.mxu1 %v7045_v19  ;;  %v2163_v52 = vld [vmem:[%s9139_s2 + $0x118] sm:$0xff] }
  0xa3   : > { %v6157_v54 = vpack.c.bf16 %v2163_v52, %v2162_v51  ;;  %v6171_v52 = vpack.c.bf16 %v2187_v48, %v2186_v43 }
  0xa5   : > { %1295 = vmatmul.mubr.f32.gmra.mrb[54].mxu0 %v7019_v10  ;;  %1440 = vmatmul.mubr.f32.gmra.mrb[54].mxu1 %v698_v55  ;;  %v725_v10 = vld [vmem:[#allocation2 + $0x420] sm:$0xff] }
  0xa6   : > { %1299 = vmatprep.mubr.f32.mxu0 %v706_v57  ;;  %1444 = vmatprep.mubr.f32.mxu1 %v7080_v31  ;;  %v2136_v57 = vld [vmem:[%s9139_s2 + $0x40] sm:$0xff] }
  0xa9   : > { %1300 = vmatmul.mubr.f32.gmra.mrb[56].mxu0 %v7045_v19  ;;  %1445 = vmatmul.mubr.f32.gmra.mrb[56].mxu1 %v707_v42  ;;  %v734_v19 = vld [vmem:[#allocation2 + $0x468] sm:$0xff] }
  0xaa   : > { %1304 = vmatprep.mubr.f32.mxu0 %v715_v58  ;;  %1449 = vmatprep.mubr.f32.mxu1 %v7124_v59  ;;  %v2137_v42 = vld [vmem:[%s9139_s2 + $0x48] sm:$0xff]  ;;  %v7343_v58 = vld [vmem:[%s9142_s5] ss:$0 sm:$0xff] }
  0xad   : > { %1305 = vmatmul.mubr.f32.gmra.mrb[58].mxu0 %v7080_v31  ;;  %1450 = vmatmul.mubr.f32.gmra.mrb[58].mxu1 %v716_v56  ;;  %v619_v31 = vld [vmem:[#allocation2 + $0xd0] sm:$0xff] }
  0xae   : > { %1309 = vmatprep.mubr.f32.mxu0 %v724_v60  ;;  %1454 = vmatprep.mubr.f32.mxu1 %v6862_v61 }
  0xb1   : > { %1310 = vmatmul.mubr.f32.gmra.mrb[60].mxu0 %v7124_v59  ;;  %1455 = vmatmul.mubr.f32.gmra.mrb[60].mxu1 %v725_v10  ;;  %v655_v59 = vld [vmem:[#allocation2 + $0x1f0] sm:$0xff]  ;;  %v6137_v10 = vpack.c.bf16 %v2137_v42, %v2136_v57 }
  0xb2   : > { %1314 = vmatprep.mubr.f32.mxu0 %v733_v62  ;;  %1459 = vmatprep.mubr.f32.mxu1 %v6876_v2  ;;  %v673_v2 = vld [vmem:[#allocation2 + $0x280] sm:$0xff] }
  0xb3   : > { %v2180_v62 = vld [vmem:[%s9139_s2 + $0x1a0] sm:$0xff]  ;;  %6138 = vmatpush3.bf16.msra.mxu1 %v6137_v10  ;;  %v2157_v10 = vld [vmem:[%s9139_s2 + $0xe8] sm:$0xff] }
  0xb4   : > { %6140 = vmatprep.subr.bf16.mxu1 %v6139_v38 }
  0xb5   : > { %1315 = vmatmul.mubr.f32.gmra.mrb[62].mxu0 %v6862_v61  ;;  %1460 = vmatmul.mubr.f32.gmra.mrb[62].mxu1 %v734_v19  ;;  %v691_v61 = vld [vmem:[#allocation2 + $0x310] sm:$0xff]  ;;  %v2181_v19 = vld [vmem:[%s9139_s2 + $0x1a8] sm:$0xff] }
  0xb6   : > { %5767 = vmatprep.mubr.f32.mxu0 %v601_v63 }
  0xb7   : > { %6142 = vmatpush3.bf16.msra.mxu1 %v6141_v47 }
  0xb9   : > { %5768 = vmatmul.mubr.f32.vlgmr.msra.gmra.mrb[64].mxu0 %v610_v0 }
  0xba   : > { %5770 = vmatprep.mubr.f32.mxu0 %v619_v31  ;;  %6154 = vmatpush3.bf16.msra.mxu0 %v6153_v44  ;;  %v6159_v31 = vpack.c.bf16 %v2181_v19, %v2180_v62  ;;  %v2188_v62 = vld [vmem:[%s9139_s2 + $0x1e0] sm:$0xff] }
  0xbb   : > { %6156 = vmatprep.subr.bf16.mxu0 %v6155_v53  ;;  %v2171_v53 = vld [vmem:[%s9139_s2 + $0x158] sm:$0xff] }
  0xbd   : > { %5771 = vmatmul.mubr.f32.gmra.mrb[66].mxu0 %v628_v1  ;;  %v2164_v1 = vld [vmem:[%s9139_s2 + $0x120] sm:$0xff] }
  0xbe   : > { %5773 = vmatprep.mubr.f32.mxu0 %v637_v3  ;;  %6158 = vmatpush3.bf16.msra.mxu0 %v6157_v54  ;;  %v2165_v3 = vld [vmem:[%s9139_s2 + $0x128] sm:$0xff]  ;;  %v6173_v54 = vpack.c.bf16 %v2171_v53, %v2170_v50 }
  0xbf   : > { %6160 = vmatprep.subr.bf16.mxu0 %v6159_v31 }
  0xc1   : > { %5774 = vmatmul.mubr.f32.gmra.mrb[68].mxu0 %v646_v4 }
  0xc2   : > { %5776 = vmatprep.mubr.f32.mxu0 %v655_v59  ;;  %v6161_v59 = vpack.c.bf16 %v2165_v3, %v2164_v1  ;;  %v2140_v1 = vld [vmem:[%s9139_s2 + $0x60] sm:$0xff]  ;;  %v2141_v3 = vld [vmem:[%s9139_s2 + $0x68] sm:$0xff] }
  0xc4   : > { %6162 = vmatpush3.bf16.msra.mxu0 %v6161_v59 }
  0xc5   : > { %5777 = vmatmul.mubr.f32.gmra.mrb[70].mxu0 %v664_v5 }
  0xc6   : > { %5779 = vmatprep.mubr.f32.mxu0 %v673_v2 }
  0xc9   : > { %5780 = vmatmul.mubr.f32.gmra.mrb[72].mxu0 %v682_v6 }
  0xca   : > { %5782 = vmatprep.mubr.f32.mxu0 %v691_v61 }
  0xcd   : > { %5783 = vmatmul.mubr.f32.gmra.mrb[74].mxu0 %v700_v7  ;;  %v2182_v7 = vld [vmem:[%s9139_s2 + $0x1b0] sm:$0xff] }
  0xce   : > { %5785 = vmatprep.mubr.f32.mxu0 %v709_v8  ;;  %v2183_v8 = vld [vmem:[%s9139_s2 + $0x1b8] sm:$0xff] }
  0xcf   : > { %v6163_v13 = vpack.c.bf16 %v2183_v8, %v2182_v7 }
  0xd1   : > { %5786 = vmatmul.mubr.f32.gmra.mrb[76].mxu0 %v718_v9  ;;  %6164 = vmatprep.subr.bf16.mxu0 %v6163_v13 }
  0xd2   : > { %5788 = vmatprep.mubr.f32.mxu0 %v727_v11  ;;  %6166 = vmatpush3.bf16.msra.mxu0 %v6165_v17 }
  0xd3   : > { %6168 = vmatprep.subr.bf16.mxu0 %v6167_v26 }
  0xd5   : > { %5789 = vmatmul.mubr.f32.gmra.mrb[78].mxu0 %v736_v12 }
  0xd6   : > { %6170 = vmatpush3.bf16.msra.mxu0 %v6169_v40 }
  0xd7   : > { %6172 = vmatprep.subr.bf16.mxu0 %v6171_v52 }
  0xda   : > { %6174 = vmatpush3.bf16.msra.mxu0 %v6173_v54 }
  0xfb   : > { %v4679_v55 = vpop.f32.mrb[0].mxu0 }
  0xfc   : > { %v4680_v56 = vpop.f32.mrb[1].mxu0 }
  0xfd   : > { %v4759_v60 = vpop.f32.mrb[0].mxu1  ;;  %v4681_v63 = vadd.f32 %v4680_v56, %v4679_v55 }
  0xfe   : > { %v4760_v0 = vpop.f32.mrb[1].mxu1 }
  0xff   : > { %v4761_v4 = vadd.f32 %v4760_v0, %v4759_v60  ;;  %v952_v5 = vadd.f32 %v4681_v63, %v7343_v58  ;;  %v2156_v60 = vld [vmem:[%s9139_s2 + $0xe0] sm:$0xff] }
 0x100   : > { %v4682_v2 = vpop.f32.mrb[2].mxu0  ;;  %v6143_v31 = vpack.c.bf16 %v2157_v10, %v2156_v60 }
 0x101   : > { %v4683_v6 = vpop.f32.mrb[3].mxu0  ;;  %v4762_v61 = vpop.f32.mrb[2].mxu1  ;;  %v7364_v9 = vadd.f32 %v4761_v4, %v952_v5  ;;  %v2189_v4 = vld [vmem:[%s9139_s2 + $0x1e8] sm:$0xff]  ;;  %v6145_v5 = vpack.c.bf16 %v2141_v3, %v2140_v1 }
 0x102   : > { %v4684_v11 = vadd.f32 %v4683_v6, %v4682_v2  ;;  %v4763_v12 = vpop.f32.mrb[3].mxu1  ;;  %v6175_v2 = vpack.c.bf16 %v2189_v4, %v2188_v62  ;;  %v2172_v6 = vld [vmem:[%s9139_s2 + $0x160] sm:$0xff]  ;;  %6144 = vmatprep.subr.bf16.mxu1 %v6143_v31 }
 0x103   : > { %v4764_v16 = vadd.f32 %v4763_v12, %v4762_v61  ;;  %v2173_v61 = vld [vmem:[%s9139_s2 + $0x168] sm:$0xff]  ;;  %6146 = vmatpush3.bf16.msra.mxu1 %v6145_v5  ;;  %v2208_v62 = vld [vmem:[%s9139_s2 + $0x280] sm:$0xff] }
 0x104   : > { %v957_v18 = vadd.f32 %v4684_v11, %v7343_v58  ;;  %v4685_v20 = vpop.f32.mrb[4].mxu0  ;;  %v6177_v11 = vpack.c.bf16 %v2173_v61, %v2172_v6  ;;  %6176 = vmatprep.subr.bf16.mxu0 %v6175_v2 }
 0x105   : > { %v4686_v21 = vpop.f32.mrb[5].mxu0 }
 0x106   : > { %v4765_v27 = vpop.f32.mrb[4].mxu1  ;;  %v7379_v24 = vadd.f32 %v4764_v16, %v957_v18  ;;  %v4687_v25 = vadd.f32 %v4686_v21, %v4685_v20  ;;  %v2190_v16 = vld [vmem:[%s9139_s2 + $0x1f0] sm:$0xff]  ;;  %v6147_v21 = vpack.c.bf16 %v2159_v15, %v2158_v14  ;;  %6178 = vmatpush3.bf16.msra.mxu0 %v6177_v11 }
 0x107   : > { %v4766_v33 = vpop.f32.mrb[5].mxu1  ;;  %v6179_v26 = vpack.c.bf16 %v2191_v23, %v2190_v16 }
 0x108   : > { %v4767_v30 = vadd.f32 %v4766_v33, %v4765_v27  ;;  %v962_v32 = vadd.f32 %v4687_v25, %v7343_v58  ;;  %v2142_v27 = vld [vmem:[%s9139_s2 + $0x70] sm:$0xff]  ;;  %6148 = vmatprep.subr.bf16.mxu1 %v6147_v21 }
 0x109   : > { %v6149_v33 = vpack.c.bf16 %v2143_v22, %v2142_v27  ;;  %6180 = vmatprep.subr.bf16.mxu0 %v6179_v26 }
 0x10a   : > { %v7403_v44 = vadd.f32 %v4767_v30, %v962_v32  ;;  %v6181_v32 = vpack.c.bf16 %v2175_v29, %v2174_v28 }
 0x10b   : > { %6150 = vmatpush3.bf16.msra.mxu1 %v6149_v33 }
 0x10c   : > { %v4688_v34 = vpop.f32.mrb[6].mxu0  ;;  %6182 = vmatpush3.bf16.msra.mxu0 %v6181_v32 }
 0x10d   : > { %v4689_v37 = vpop.f32.mrb[7].mxu0  ;;  %v4768_v46 = vpop.f32.mrb[6].mxu1 }
 0x10e   : > { %v4690_v49 = vadd.f32 %v4689_v37, %v4688_v34  ;;  %v4769_v45 = vpop.f32.mrb[7].mxu1 }
 0x10f   : > { %v4770_v51 = vadd.f32 %v4769_v45, %v4768_v46 }
 0x110   : > { %v967_v55 = vadd.f32 %v4690_v49, %v7343_v58  ;;  %v4691_v57 = vpop.f32.mrb[8].mxu0 }
 0x111   : > { %v4692_v42 = vpop.f32.mrb[9].mxu0 }
 0x112   : > { %v4771_v56 = vpop.f32.mrb[8].mxu1  ;;  %v7424_v19 = vadd.f32 %v4770_v51, %v967_v55  ;;  %v4693_v63 = vadd.f32 %v4692_v42, %v4691_v57 }
 0x113   : > { %v4772_v0 = vpop.f32.mrb[9].mxu1 }
 0x114   : > { %v4773_v59 = vadd.f32 %v4772_v0, %v4771_v56  ;;  %v972_v7 = vadd.f32 %v4693_v63, %v7343_v58  ;;  %v2209_v63 = vld [vmem:[%s9139_s2 + $0x288] sm:$0xff] }
 0x115   : > { %v6183_v1 = vpack.c.bf16 %v2209_v63, %v2208_v62 }
 0x116   : > { %v7451_v17 = vadd.f32 %v4773_v59, %v972_v7 }
 0x117   : > { %6184 = vmatprep.subr.bf16.mxu1 %v6183_v1 }
 0x11a   : > { %v4774_v13 = vpop.f32.mrb[10].mxu1 }
 0x11b   : > { %v4694_v8 = vpop.f32.mrb[10].mxu0  ;;  %v4775_v20 = vpop.f32.mrb[11].mxu1 }
 0x11c   : > { %v4695_v12 = vpop.f32.mrb[11].mxu0  ;;  %v4776_v25 = vadd.f32 %v4775_v20, %v4774_v13 }
 0x11d   : > { %v4696_v18 = vadd.f32 %v4695_v12, %v4694_v8 }
 0x11f   : > { %v977_v30 = vadd.f32 %v4696_v18, %v7343_v58  ;;  %v4697_v40 = vpop.f32.mrb[12].mxu0 }
 0x120   : > { %v4698_v34 = vpop.f32.mrb[13].mxu0 }
 0x121   : > { %v7469_v36 = vadd.f32 %v4776_v25, %v977_v30  ;;  %v4699_v37 = vadd.f32 %v4698_v34, %v4697_v40 }
 0x122   : > { %v4777_v35 = vpop.f32.mrb[12].mxu1 }
 0x123   : > { %v4778_v46 = vpop.f32.mrb[13].mxu1  ;;  %v982_v39 = vadd.f32 %v4699_v37, %v7343_v58 }
 0x124   : > { %v4779_v38 = vadd.f32 %v4778_v46, %v4777_v35 }
 0x126   : > { %v4700_v41 = vpop.f32.mrb[14].mxu0  ;;  %v7472_v45 = vadd.f32 %v4779_v38, %v982_v39 }
 0x127   : > { %v4701_v43 = vpop.f32.mrb[15].mxu0 }
 0x128   : > { %v4780_v49 = vpop.f32.mrb[14].mxu1  ;;  %v4702_v47 = vadd.f32 %v4701_v43, %v4700_v41 }
 0x129   : > { %v4781_v48 = vpop.f32.mrb[15].mxu1 }
 0x12a   : > { %v4782_v50 = vadd.f32 %v4781_v48, %v4780_v49  ;;  %v987_v53 = vadd.f32 %v4702_v47, %v7343_v58 }
 0x12b   : > { %v4703_v51 = vpop.f32.mrb[16].mxu0 }
 0x12c   : > { %v4704_v52 = vpop.f32.mrb[17].mxu0  ;;  %v4783_v54 = vpop.f32.mrb[16].mxu1  ;;  %v7475_v55 = vadd.f32 %v4782_v50, %v987_v53  ;;  %v2240_v50 = vld [vmem:[%s9139_s2 + $0x380] sm:$0xff]  ;;  %v2241_v53 = vld [vmem:[%s9139_s2 + $0x388] sm:$0xff] }
 0x12d   : > { %v4705_v57 = vadd.f32 %v4704_v52, %v4703_v51  ;;  %v4784_v42 = vpop.f32.mrb[17].mxu1 }
 0x12e   : > { %v4785_v56 = vadd.f32 %v4784_v42, %v4783_v54 }
 0x12f   : > { %v992_v60 = vadd.f32 %v4705_v57, %v7343_v58  ;;  %v6215_v57 = vpack.c.bf16 %v2241_v53, %v2240_v50 }
 0x130   : > { %v4706_v10 = vpop.f32.mrb[18].mxu0  ;;  %v4786_v31 = vpop.f32.mrb[18].mxu1 }
 0x131   : > { %v4707_v0 = vpop.f32.mrb[19].mxu0  ;;  %v7484_v3 = vadd.f32 %v4785_v56, %v992_v60  ;;  %v4787_v59 = vpop.f32.mrb[19].mxu1  ;;  %6216 = vmatprep.subr.bf16.mxu0 %v6215_v57 }
 0x132   : > { %v4708_v4 = vadd.f32 %v4707_v0, %v4706_v10  ;;  %v4788_v5 = vadd.f32 %v4787_v59, %v4786_v31 }
 0x134   : > { %v997_v2 = vadd.f32 %v4708_v4, %v7343_v58  ;;  %v4709_v6 = vpop.f32.mrb[20].mxu0  ;;  %v4789_v7 = vpop.f32.mrb[20].mxu1 }
 0x135   : > { %v4710_v61 = vpop.f32.mrb[21].mxu0  ;;  %v4790_v12 = vpop.f32.mrb[21].mxu1 }
 0x136   : > { %v7487_v8 = vadd.f32 %v4788_v5, %v997_v2  ;;  %v4711_v11 = vadd.f32 %v4710_v61, %v4709_v6  ;;  %v4791_v13 = vadd.f32 %v4790_v12, %v4789_v7 }
 0x138   : > { %v1002_v14 = vadd.f32 %v4711_v11, %v7343_v58  ;;  %v4712_v15 = vpop.f32.mrb[22].mxu0  ;;  %v4792_v18 = vpop.f32.mrb[22].mxu1 }
 0x139   : > { %v4713_v16 = vpop.f32.mrb[23].mxu0  ;;  %v4793_v27 = vpop.f32.mrb[23].mxu1 }
 0x13a   : > { %v7490_v20 = vadd.f32 %v4791_v13, %v1002_v14  ;;  %v4714_v21 = vadd.f32 %v4713_v16, %v4712_v15  ;;  %v4794_v22 = vadd.f32 %v4793_v27, %v4792_v18 }
 0x13c   : > { %v1007_v23 = vadd.f32 %v4714_v21, %v7343_v58  ;;  %v4715_v25 = vpop.f32.mrb[24].mxu0  ;;  %v4795_v26 = vpop.f32.mrb[24].mxu1 }
 0x13d   : > { %v4716_v33 = vpop.f32.mrb[25].mxu0  ;;  %v4796_v30 = vpop.f32.mrb[25].mxu1 }
 0x13e   : > { %v7493_v28 = vadd.f32 %v4794_v22, %v1007_v23  ;;  %v4717_v29 = vadd.f32 %v4716_v33, %v4715_v25  ;;  %v4797_v40 = vadd.f32 %v4796_v30, %v4795_v26 }
 0x140   : > { %v1012_v32 = vadd.f32 %v4717_v29, %v7343_v58  ;;  %v4718_v34 = vpop.f32.mrb[26].mxu0  ;;  %v4798_v37 = vpop.f32.mrb[26].mxu1 }
 0x141   : > { %v4719_v35 = vpop.f32.mrb[27].mxu0  ;;  %v4799_v39 = vpop.f32.mrb[27].mxu1 }
 0x142   : > { %v7496_v46 = vadd.f32 %v4797_v40, %v1012_v32  ;;  %v4720_v38 = vadd.f32 %v4719_v35, %v4718_v34  ;;  %v4800_v41 = vadd.f32 %v4799_v39, %v4798_v37 }
 0x144   : > { %v1017_v43 = vadd.f32 %v4720_v38, %v7343_v58  ;;  %v4721_v49 = vpop.f32.mrb[28].mxu0  ;;  %v4801_v48 = vpop.f32.mrb[28].mxu1 }
 0x145   : > { %v4722_v47 = vpop.f32.mrb[29].mxu0  ;;  %v4802_v54 = vpop.f32.mrb[29].mxu1 }
 0x146   : > { %v7505_v51 = vadd.f32 %v4800_v41, %v1017_v43  ;;  %v4723_v52 = vadd.f32 %v4722_v47, %v4721_v49  ;;  %v4803_v42 = vadd.f32 %v4802_v54, %v4801_v48 }
 0x148   : > { %v1022_v56 = vadd.f32 %v4723_v52, %v7343_v58  ;;  %v4724_v60 = vpop.f32.mrb[30].mxu0  ;;  %v4804_v62 = vpop.f32.mrb[30].mxu1 }
 0x149   : > { %v4725_v10 = vpop.f32.mrb[31].mxu0  ;;  %v4805_v31 = vpop.f32.mrb[31].mxu1 }
 0x14a   : > { %v7508_v63 = vadd.f32 %v4803_v42, %v1022_v56  ;;  %v4726_v0 = vadd.f32 %v4725_v10, %v4724_v60  ;;  %v4806_v1 = vadd.f32 %v4805_v31, %v4804_v62 }
 0x14c   : > { %v1027_v4 = vadd.f32 %v4726_v0, %v7343_v58  ;;  %v4839_v59 = vpop.f32.mrb[32].mxu0  ;;  %v4919_v2 = vpop.f32.mrb[32].mxu1 }
 0x14d   : > { %v4840_v5 = vpop.f32.mrb[33].mxu0  ;;  %v4920_v7 = vpop.f32.mrb[33].mxu1 }
 0x14e   : > { %v7511_v6 = vadd.f32 %v4806_v1, %v1027_v4  ;;  %v4841_v61 = vadd.f32 %v4840_v5, %v4839_v59  ;;  %v4921_v11 = vadd.f32 %v4920_v7, %v4919_v2 }
 0x150   : > { %v1242_v12 = vadd.f32 %v4841_v61, %v7364_v9  ;;  %v4842_v13 = vpop.f32.mrb[34].mxu0  ;;  %v4922_v15 = vpop.f32.mrb[34].mxu1 }
 0x151   : > { %v4843_v14 = vpop.f32.mrb[35].mxu0  ;;  %v4923_v18 = vpop.f32.mrb[35].mxu1 }
 0x152   : > { %v4844_v16 = vadd.f32 %v4843_v14, %v4842_v13  ;;  %v7514_v21 = vadd.f32 %v4921_v11, %v1242_v12  ;;  %v4924_v27 = vadd.f32 %v4923_v18, %v4922_v15 }
 0x154   : > { %v1247_v58 = vadd.f32 %v4844_v16, %v7379_v24  ;;  %v4845_v22 = vpop.f32.mrb[36].mxu0  ;;  %v4925_v25 = vpop.f32.mrb[36].mxu1 }
 0x155   : > { %v4846_v23 = vpop.f32.mrb[37].mxu0  ;;  %v4926_v26 = vpop.f32.mrb[37].mxu1 }
 0x156   : > { %v4847_v33 = vadd.f32 %v4846_v23, %v4845_v22  ;;  %v7517_v29 = vadd.f32 %v4924_v27, %v1247_v58  ;;  %v4927_v30 = vadd.f32 %v4926_v26, %v4925_v25 }
 0x158   : > { %v1252_v9 = vadd.f32 %v4847_v33, %v7403_v44  ;;  %v4848_v40 = vpop.f32.mrb[38].mxu0  ;;  %v4928_v34 = vpop.f32.mrb[38].mxu1 }
 0x159   : > { %v4849_v32 = vpop.f32.mrb[39].mxu0  ;;  %v4929_v37 = vpop.f32.mrb[39].mxu1 }
 0x15a   : > { %v4850_v35 = vadd.f32 %v4849_v32, %v4848_v40  ;;  %v7520_v38 = vadd.f32 %v4927_v30, %v1252_v9  ;;  %v4930_v39 = vadd.f32 %v4929_v37, %v4928_v34 }
 0x15c   : > { %v1257_v24 = vadd.f32 %v4850_v35, %v7424_v19  ;;  %v4851_v41 = vpop.f32.mrb[40].mxu0  ;;  %v4931_v49 = vpop.f32.mrb[40].mxu1 }
 0x15d   : > { %v4852_v43 = vpop.f32.mrb[41].mxu0  ;;  %v4932_v48 = vpop.f32.mrb[41].mxu1 }
 0x15e   : > { %v4853_v47 = vadd.f32 %v4852_v43, %v4851_v41  ;;  %v7523_v50 = vadd.f32 %v4930_v39, %v1257_v24  ;;  %v4933_v53 = vadd.f32 %v4932_v48, %v4931_v49 }
 0x160   : > { %v1262_v44 = vadd.f32 %v4853_v47, %v7451_v17  ;;  %v4854_v52 = vpop.f32.mrb[42].mxu0  ;;  %v4934_v57 = vpop.f32.mrb[42].mxu1 }
 0x161   : > { %v4855_v54 = vpop.f32.mrb[43].mxu0  ;;  %v4935_v56 = vpop.f32.mrb[43].mxu1 }
 0x162   : > { %v4856_v42 = vadd.f32 %v4855_v54, %v4854_v52  ;;  %v7526_v60 = vadd.f32 %v4933_v53, %v1262_v44  ;;  %v4936_v10 = vadd.f32 %v4935_v56, %v4934_v57 }
 0x164   : > { %v1267_v19 = vadd.f32 %v4856_v42, %v7469_v36  ;;  %v4857_v62 = vpop.f32.mrb[44].mxu0  ;;  %v4937_v31 = vpop.f32.mrb[44].mxu1 }
 0x165   : > { %v4858_v0 = vpop.f32.mrb[45].mxu0  ;;  %v4938_v4 = vpop.f32.mrb[45].mxu1 }
 0x166   : > { %v4859_v1 = vadd.f32 %v4858_v0, %v4857_v62  ;;  %v7529_v59 = vadd.f32 %v4936_v10, %v1267_v19  ;;  %v4939_v5 = vadd.f32 %v4938_v4, %v4937_v31 }
 0x168   : > { %v1272_v17 = vadd.f32 %v4859_v1, %v7472_v45  ;;  %v4860_v2 = vpop.f32.mrb[46].mxu0  ;;  %v4940_v7 = vpop.f32.mrb[46].mxu1 }
 0x169   : > { %v4861_v61 = vpop.f32.mrb[47].mxu0  ;;  %v4941_v12 = vpop.f32.mrb[47].mxu1 }
 0x16a   : > { %v4862_v11 = vadd.f32 %v4861_v61, %v4860_v2  ;;  %v7532_v13 = vadd.f32 %v4939_v5, %v1272_v17  ;;  %v4942_v14 = vadd.f32 %v4941_v12, %v4940_v7 }
 0x16c   : > { %v1277_v36 = vadd.f32 %v4862_v11, %v7475_v55  ;;  %v4863_v15 = vpop.f32.mrb[48].mxu0  ;;  %v4943_v18 = vpop.f32.mrb[48].mxu1 }
 0x16d   : > { %v4864_v16 = vpop.f32.mrb[49].mxu0  ;;  %v4944_v58 = vpop.f32.mrb[49].mxu1 }
 0x16e   : > { %v4865_v27 = vadd.f32 %v4864_v16, %v4863_v15  ;;  %v7535_v22 = vadd.f32 %v4942_v14, %v1277_v36  ;;  %v4945_v23 = vadd.f32 %v4944_v58, %v4943_v18 }
 0x170   : > { %v1282_v45 = vadd.f32 %v4865_v27, %v7484_v3  ;;  %v4866_v25 = vpop.f32.mrb[50].mxu0  ;;  %v4946_v26 = vpop.f32.mrb[50].mxu1 }
 0x171   : > { %v4867_v33 = vpop.f32.mrb[51].mxu0  ;;  %v4947_v9 = vpop.f32.mrb[51].mxu1 }
 0x172   : > { %v4868_v30 = vadd.f32 %v4867_v33, %v4866_v25  ;;  %v7538_v40 = vadd.f32 %v4945_v23, %v1282_v45  ;;  %v4948_v32 = vadd.f32 %v4947_v9, %v4946_v26  ;;  %v7562_v26 = vld [vmem:[%s9142_s5 + $0x1] ss:$0 sm:$0xff] }
 0x174   : > { %v1287_v55 = vadd.f32 %v4868_v30, %v7487_v8  ;;  %v4869_v34 = vpop.f32.mrb[52].mxu0  ;;  %v4949_v37 = vpop.f32.mrb[52].mxu1 }
 0x175   : > { %v4870_v35 = vpop.f32.mrb[53].mxu0  ;;  %v4950_v24 = vpop.f32.mrb[53].mxu1 }
 0x176   : > { %v4871_v39 = vadd.f32 %v4870_v35, %v4869_v34  ;;  %v7541_v41 = vadd.f32 %v4948_v32, %v1287_v55  ;;  %v4951_v43 = vadd.f32 %v4950_v24, %v4949_v37 }
 0x178   : > { %v1292_v3 = vadd.f32 %v4871_v39, %v7490_v20  ;;  %v4872_v49 = vpop.f32.mrb[54].mxu0  ;;  %v4952_v48 = vpop.f32.mrb[54].mxu1 }
 0x179   : > { %v4873_v47 = vpop.f32.mrb[55].mxu0  ;;  %v4953_v44 = vpop.f32.mrb[55].mxu1 }
 0x17a   : > { %v4874_v53 = vadd.f32 %v4873_v47, %v4872_v49  ;;  %v7544_v52 = vadd.f32 %v4951_v43, %v1292_v3  ;;  %v4954_v54 = vadd.f32 %v4953_v44, %v4952_v48 }
 0x17c   : > { %v1297_v8 = vadd.f32 %v4874_v53, %v7493_v28  ;;  %v4875_v57 = vpop.f32.mrb[56].mxu0  ;;  %v4955_v56 = vpop.f32.mrb[56].mxu1 }
 0x17d   : > { %v4876_v42 = vpop.f32.mrb[57].mxu0  ;;  %v4956_v19 = vpop.f32.mrb[57].mxu1 }
 0x17e   : > { %v4877_v10 = vadd.f32 %v4876_v42, %v4875_v57  ;;  %v7547_v62 = vadd.f32 %v4954_v54, %v1297_v8  ;;  %v4957_v0 = vadd.f32 %v4956_v19, %v4955_v56 }
 0x180   : > { %v1302_v20 = vadd.f32 %v4877_v10, %v7496_v46  ;;  %v4878_v31 = vpop.f32.mrb[58].mxu0  ;;  %v4958_v4 = vpop.f32.mrb[58].mxu1 }
 0x181   : > { %v4879_v1 = vpop.f32.mrb[59].mxu0  ;;  %v4959_v17 = vpop.f32.mrb[59].mxu1 }
 0x182   : > { %v4880_v5 = vadd.f32 %v4879_v1, %v4878_v31  ;;  %v7550_v2 = vadd.f32 %v4957_v0, %v1302_v20  ;;  %v4960_v61 = vadd.f32 %v4959_v17, %v4958_v4 }
 0x184   : > { %v1307_v28 = vadd.f32 %v4880_v5, %v7505_v51  ;;  %v4881_v7 = vpop.f32.mrb[60].mxu0  ;;  %v4961_v12 = vpop.f32.mrb[60].mxu1 }
 0x185   : > { %v4882_v11 = vpop.f32.mrb[61].mxu0  ;;  %v4962_v36 = vpop.f32.mrb[61].mxu1 }
 0x186   : > { %v4883_v14 = vadd.f32 %v4882_v11, %v4881_v7  ;;  %v7553_v15 = vadd.f32 %v4960_v61, %v1307_v28  ;;  %v4963_v16 = vadd.f32 %v4962_v36, %v4961_v12 }
 0x188   : > { %v1312_v46 = vadd.f32 %v4883_v14, %v7508_v63  ;;  %v4884_v18 = vpop.f32.mrb[62].mxu0  ;;  %v4964_v58 = vpop.f32.mrb[62].mxu1 }
 0x189   : > { %v4885_v27 = vpop.f32.mrb[63].mxu0  ;;  %v4965_v45 = vpop.f32.mrb[63].mxu1 }
 0x18a   : > { %v4886_v23 = vadd.f32 %v4885_v27, %v4884_v18  ;;  %v7556_v25 = vadd.f32 %v4963_v16, %v1312_v46  ;;  %v4966_v33 = vadd.f32 %v4965_v45, %v4964_v58 }
 0x18c   : > { %v1317_v51 = vadd.f32 %v4886_v23, %v7511_v6  ;;  %v5769_v30 = vpop.f32.mrb[64].mxu0  ;;  %v7649_v23 = vld [vmem:[%s9139_s2 + $0x200] sm:$0xff] }
 0x18d   : > { %v1537_v9 = vadd.f32 %v5769_v30, %v7517_v29  ;;  %v1531_v32 = vpop.f32.mrb[65].mxu0 }
 0x18e   : > { %v1532_v63 = vadd.f32 %v1531_v32, %v7514_v21  ;;  %v7566_v55 = vadd.f32 %v4966_v33, %v1317_v51  ;;  %v7673_v32 = vld [vmem:[%s9139_s2 + $0x298] sm:$0xff] }
 0x18f   : > { %vm1611_vm0 = vcmp.ge.f32.partialorder %v1537_v9, 0.0  ;;  %v1631_v34 = vmul.f32 %v7562_v26, %v1537_v9 }
 0x190   : > { %vm1610_vm1 = vcmp.ge.f32.partialorder %v1532_v63, 0.0  ;;  %v1630_v35 = vmul.f32 %v7562_v26, %v1532_v63  ;;  %v5772_v6 = vpop.f32.mrb[66].mxu0 }
 0x191   : > { %v7570_v37 = vsel %vm1611_vm0, %v1537_v9, %v1631_v34  ;;  %v1547_v39 = vadd.f32 %v5772_v6, %v7523_v50  ;;  %v1541_v24 = vpop.f32.mrb[67].mxu0  ;;  %v7668_v9 = vld [vmem:[%s9139_s2 + $0x290] sm:$0xff] }
 0x192   : > { %v1682_v43 = vrot.slane %v7570_v37, 7  ;;  %1762 = vst [vmem:[#allocation2 + $0xa7] sm:$0x1] %v7570_v37  ;;  %v1778_v21 = vrot.slane %v7570_v37, 1  ;;  %1857 = vst [vmem:[#allocation2 + $0x68] sm:$0xff] %v7570_v37  ;;  %v7580_v29 = vsel %vm1610_vm1, %v1532_v63, %v1630_v35  ;;  %v1542_v3 = vadd.f32 %v1541_v24, %v7520_v38  ;;  %v7689_v24 = vld [vmem:[%s9139_s2 + $0x218] sm:$0xff] }
 0x193   : > { %1873 = vst [vmem:[#allocation2 + $0x77] sm:$0x1] %v7570_v37  ;;  %1936 = vst [vmem:[#allocation2 + $0x38] sm:$0xff] %v7570_v37  ;;  %v1681_v50 = vrot.slane %v7580_v29, 7  ;;  %v1777_v49 = vrot.slane %v7580_v29, 1  ;;  %vm1613_vm2 = vcmp.ge.f32.partialorder %v1547_v39, 0.0  ;;  %v1633_v47 = vmul.f32 %v7562_v26, %v1547_v39 }
 0x194   : > { %1952 = vst [vmem:[#allocation2 + $0x47] sm:$0x1] %v7570_v37  ;;  %1761 = vst [vmem:[#allocation2 + $0x5f] sm:$0x1] %v7580_v29  ;;  %vm1612_vm3 = vcmp.ge.f32.partialorder %v1542_v3, 0.0  ;;  %v1632_v38 = vmul.f32 %v7562_v26, %v1542_v3  ;;  %v5775_v48 = vpop.f32.mrb[68].mxu0 }
 0x195   : > { %1856 = vst [vmem:[#allocation2 + $0x20] sm:$0xff] %v7580_v29  ;;  %1872 = vst [vmem:[#allocation2 + $0x2f] sm:$0x1] %v7580_v29  ;;  %v7593_v53 = vsel %vm1613_vm2, %v1547_v39, %v1633_v47  ;;  %v1557_v44 = vadd.f32 %v5775_v48, %v7529_v59  ;;  %v1551_v54 = vpop.f32.mrb[69].mxu0  ;;  %v7684_v39 = vld [vmem:[%s9139_s2 + $0x210] sm:$0xff] }
 0x196   : > { %1943 = vst [vmem:[#allocation2 + $0x230] sm:$0xff] %v7580_v29  ;;  %1959 = vst [vmem:[#allocation2 + $0x23f] sm:$0x1] %v7580_v29  ;;  %v1684_v8 = vrot.slane %v7593_v53, 7  ;;  %v1780_v57 = vrot.slane %v7593_v53, 1  ;;  %v7604_v42 = vsel %vm1612_vm3, %v1542_v3, %v1632_v38  ;;  %v1552_v59 = vadd.f32 %v1551_v54, %v7526_v60  ;;  %v7715_v47 = vld [vmem:[%s9139_s2 + $0x390] sm:$0xff] }
 0x197   : > { %1810 = vst [vmem:[#allocation2 + $0xa0] sm:$0x7f] %v1778_v21  ;;  %1889 = vst [vmem:[#allocation2 + $0x70] sm:$0x7f] %v1778_v21  ;;  %v1683_v56 = vrot.slane %v7604_v42, 7  ;;  %v1779_v10 = vrot.slane %v7604_v42, 1  ;;  %v1635_v19 = vmul.f32 %v7562_v26, %v1557_v44 }
 0x198   : > { %1968 = vst [vmem:[#allocation2 + $0x40] sm:$0x7f] %v1778_v21  ;;  %1714 = vst [vmem:[#allocation2 + $0x90] sm:$0xff] %v1682_v43   ;;  %vm1615_vm4 = vcmp.ge.f32.partialorder %v1557_v44, 0.0  ;;  %vm1614_vm5 = vcmp.ge.f32.partialorder %v1552_v59, 0.0  ;;  %v1634_v60 = vmul.f32 %v7562_v26, %v1552_v59  ;;  %v5778_v0 = vpop.f32.mrb[70].mxu0 }
 0x199   : > { %1825 = vst [vmem:[#allocation2 + $0x60] sm:$0xff] %v1682_v43   ;;  %1904 = vst [vmem:[#allocation2 + $0x30] sm:$0xff] %v1682_v43   ;;  %v7617_v20 = vsel %vm1615_vm4, %v1557_v44, %v1635_v19  ;;  %v1567_v31 = vadd.f32 %v5778_v0, %v7535_v22  ;;  %v1561_v1 = vpop.f32.mrb[71].mxu0  ;;  %v7694_v43 = vld [vmem:[%s9139_s2 + $0x300] sm:$0xff]  ;;  %v7720_v38 = vld [vmem:[%s9139_s2 + $0x398] sm:$0xff] }
 0x19a   : > { %1809 = vst [vmem:[#allocation2 + $0x58] sm:$0x7f] %v1777_v49  ;;  %1888 = vst [vmem:[#allocation2 + $0x28] sm:$0x7f] %v1777_v49  ;;  %v1686_v4 = vrot.slane %v7617_v20, 7  ;;  %v1782_v5 = vrot.slane %v7617_v20, 1  ;;  %v7628_v17 = vsel %vm1614_vm5, %v1552_v59, %v1634_v60  ;;  %v1562_v22 = vadd.f32 %v1561_v1, %v7532_v13 }
 0x19b   : > { %1975 = vst [vmem:[#allocation2 + $0x238] sm:$0x7f] %v1777_v49  ;;  %1713 = vst [vmem:[#allocation2 + $0x48] sm:$0xff] %v1681_v50   ;;  %v1685_v61 = vrot.slane %v7628_v17, 7  ;;  %v1781_v28 = vrot.slane %v7628_v17, 1  ;;  %vm1617_vm6 = vcmp.ge.f32.partialorder %v1567_v31, 0.0  ;;  %v1637_v7 = vmul.f32 %v7562_v26, %v1567_v31 }
 0x19c   : > { %1824 = vst [vmem:[#allocation2 + $0x18] sm:$0xff] %v1681_v50   ;;  %1911 = vst [vmem:[#allocation2 + $0x228] sm:$0xff] %v1681_v50   ;;  %vm1616_vm7 = vcmp.ge.f32.partialorder %v1562_v22, 0.0  ;;  %v1636_v13 = vmul.f32 %v7562_v26, %v1562_v22  ;;  %v5781_v11 = vpop.f32.mrb[72].mxu0  ;;  %v7710_v49 = vld [vmem:[%s9139_s2 + $0x308] sm:$0xff]  ;;  %v6189_v59 = vpack.c.bf16 %v7689_v24, %v7684_v39  ;;  %v6219_v1 = vpack.c.bf16 %v7720_v38, %v7715_v47  ;;  %v7864_v47 = vld [vmem:[%s9139_s2 + $0x3b8] sm:$0xff] }
 0x19d   : > { %1764 = vst [vmem:[#allocation2 + $0x137] sm:$0x1] %v7593_v53  ;;  %1859 = vst [vmem:[#allocation2 + $0xf8] sm:$0xff] %v7593_v53  ;;  %v1653_v14 = vsel %vm1617_vm6, %v1567_v31, %v1637_v7  ;;  %v1577_v36 = vadd.f32 %v5781_v11, %v7541_v41  ;;  %v1571_v16 = vpop.f32.mrb[73].mxu0  ;;  %v7654_v41 = vld [vmem:[%s9139_s2 + $0x208] sm:$0xff]  ;;  %v6217_v31 = vpack.c.bf16 %v7710_v49, %v7694_v43  ;;  %v7776_v7 = vld [vmem:[%s9139_s2 + $0x3a0] sm:$0xff] }
 0x19e   : > { %1875 = vst [vmem:[#allocation2 + $0x107] sm:$0x1] %v7593_v53  ;;  %1938 = vst [vmem:[#allocation2 + $0xc8] sm:$0xff] %v7593_v53  ;;  %v1680_v46 = vrot.slane %v1653_v14, 7  ;;  %v1776_v18 = vrot.slane %v1653_v14, 1  ;;  %v7643_v27 = vsel %vm1616_vm7, %v1562_v22, %v1636_v13  ;;  %v1572_v58 = vadd.f32 %v1571_v16, %v7538_v40  ;;  %2340 = vmatprep.mubr.f32.mxu1 %v1653_v14  ;;  %v7747_v0 = vld [vmem:[%s9139_s2 + $0x2a8] sm:$0xff] }
 0x19f   : > { %1954 = vst [vmem:[#allocation2 + $0xd7] sm:$0x1] %v7593_v53  ;;  %1763 = vst [vmem:[#allocation2 + $0xef] sm:$0x1] %v7604_v42  ;;  %v1687_v45 = vrot.slane %v7643_v27, 7  ;;  %v1783_v33 = vrot.slane %v7643_v27, 1  ;;  %v1639_v40 = vmul.f32 %v7562_v26, %v1577_v36  ;;  %v6185_v6 = vpack.c.bf16 %v7654_v41, %v7649_v23 }
 0x1a0   : > { %1858 = vst [vmem:[#allocation2 + $0xb0] sm:$0xff] %v7604_v42  ;;  %1874 = vst [vmem:[#allocation2 + $0xbf] sm:$0x1] %v7604_v42  ;;  %vm1619_vm8 = vcmp.ge.f32.partialorder %v1577_v36, 0.0  ;;  %vm1618_vm9 = vcmp.ge.f32.partialorder %v1572_v58, 0.0  ;;  %v1638_v51 = vmul.f32 %v7562_v26, %v1572_v58  ;;  %v5784_v30 = vpop.f32.mrb[74].mxu0 }
 0x1a1   : > { %1937 = vst [vmem:[#allocation2 + $0x80] sm:$0xff] %v7604_v42  ;;  %1953 = vst [vmem:[#allocation2 + $0x8f] sm:$0x1] %v7604_v42  ;;  %v7676_v63 = vsel %vm1619_vm8, %v1577_v36, %v1639_v40  ;;  %v1587_v34 = vadd.f32 %v5784_v30, %v7547_v62  ;;  %v1581_v35 = vpop.f32.mrb[75].mxu0  ;;  %v7781_v13 = vld [vmem:[%s9139_s2 + $0x3a8] sm:$0xff]  ;;  %v7802_v30 = vld [vmem:[%s9139_s2 + $0x220] sm:$0xff] }
 0x1a2   : > { %1812 = vst [vmem:[#allocation2 + $0x130] sm:$0x7f] %v1780_v57  ;;  %1891 = vst [vmem:[#allocation2 + $0x100] sm:$0x7f] %v1780_v57  ;;  %v1690_v62 = vrot.slane %v7676_v63, 7  ;;  %v1786_v21 = vrot.slane %v7676_v63, 1  ;;  %v7704_v3 = vsel %vm1618_vm9, %v1572_v58, %v1638_v51  ;;  %v1582_v50 = vadd.f32 %v1581_v35, %v7544_v52 }
 0x1a3   : > { %1970 = vst [vmem:[#allocation2 + $0xd0] sm:$0x7f] %v1780_v57  ;;  %1716 = vst [vmem:[#allocation2 + $0x120] sm:$0xff] %v1684_v8   ;;  %v1987_v12 = vld [vmem:[#allocation2 + $0x18] sm:$0xff]  ;;  %v1689_v48 = vrot.slane %v7704_v3, 7  ;;  %v1785_v52 = vrot.slane %v7704_v3, 1  ;;  %v1641_v44 = vmul.f32 %v7562_v26, %v1587_v34  ;;  %v6187_v57 = vpack.c.bf16 %v7673_v32, %v7668_v9 }
 0x1a4   : > { %1827 = vst [vmem:[#allocation2 + $0xf0] sm:$0xff] %v1684_v8   ;;  %1906 = vst [vmem:[#allocation2 + $0xc0] sm:$0xff] %v1684_v8   ;;  %2485 = vmatprep.mubr.f32.mxu0 %v1987_v12  ;;  %vm1621_vm10 = vcmp.ge.f32.partialorder %v1587_v34, 0.0  ;;  %vm1620_vm11 = vcmp.ge.f32.partialorder %v1582_v50, 0.0  ;;  %v1640_v54 = vmul.f32 %v7562_v26, %v1582_v50  ;;  %v5787_v8 = vpop.f32.mrb[76].mxu0  ;;  %v6223_v35 = vpack.c.bf16 %v7781_v13, %v7776_v7  ;;  %v7836_v49 = vld [vmem:[%s9139_s2 + $0x320] sm:$0xff] }
 0x1a5   : > { %1811 = vst [vmem:[#allocation2 + $0xe8] sm:$0x7f] %v1779_v10  ;;  %1890 = vst [vmem:[#allocation2 + $0xb8] sm:$0x7f] %v1779_v10  ;;  %v1597_v19 = vadd.f32 %v5787_v8, %v7553_v15  ;;  %v1591_v60 = vpop.f32.mrb[77].mxu0  ;;  %v7761_v15 = vld [vmem:[%s9139_s2 + $0x318] sm:$0xff] }
 0x1a6   : > { %1969 = vst [vmem:[#allocation2 + $0x88] sm:$0x7f] %v1779_v10  ;;  %1715 = vst [vmem:[#allocation2 + $0xd8] sm:$0xff] %v1683_v56   ;;  %v7741_v10 = vsel %vm1621_vm10, %v1587_v34, %v1641_v44  ;;  %v7807_v34 = vld [vmem:[%s9139_s2 + $0x228] sm:$0xff]  ;;  %v7859_v32 = vld [vmem:[%s9139_s2 + $0x3b0] sm:$0xff] }
 0x1a7   : > { %1826 = vst [vmem:[#allocation2 + $0xa8] sm:$0xff] %v1683_v56   ;;  %1905 = vst [vmem:[#allocation2 + $0x78] sm:$0xff] %v1683_v56   ;;  %v7738_v56 = vld [vmem:[%s9139_s2 + $0x2a0] sm:$0xff]  ;;  %v1788_v22 = vrot.slane %v7741_v10, 1  ;;  %vm1623_vm12 = vcmp.ge.f32.partialorder %v1597_v19, 0.0  ;;  %v6193_v38 = vpack.c.bf16 %v7807_v34, %v7802_v30  ;;  %v7880_v8 = vld [vmem:[%s9139_s2 + $0x238] sm:$0xff] }
 0x1a8   : > { %1766 = vst [vmem:[#allocation2 + $0x1c7] sm:$0x1] %v7617_v20  ;;  %1861 = vst [vmem:[#allocation2 + $0x188] sm:$0xff] %v7617_v20  ;;  %v6191_v58 = vpack.c.bf16 %v7747_v0, %v7738_v56  ;;  %v2230_v39 = vld [vmem:[%s9139_s2 + $0x330] sm:$0xff]  ;;  %v2248_v0 = vld [vmem:[%s9139_s2 + $0x3c0] sm:$0xff] }
 0x1a9   : > { %1877 = vst [vmem:[#allocation2 + $0x197] sm:$0x1] %v7617_v20  ;;  %1940 = vst [vmem:[#allocation2 + $0x158] sm:$0xff] %v7617_v20  ;;  %v2249_v7 = vld [vmem:[%s9139_s2 + $0x3c8] sm:$0xff]  ;;  %v2200_v13 = vld [vmem:[%s9139_s2 + $0x240] sm:$0xff] }
 0x1aa   : > { %1956 = vst [vmem:[#allocation2 + $0x167] sm:$0x1] %v7617_v20  ;;  %1765 = vst [vmem:[#allocation2 + $0x17f] sm:$0x1] %v7628_v17  ;;  %v2251_v30 = vld [vmem:[%s9139_s2 + $0x3d8] sm:$0xff]  ;;  %v2202_v34 = vld [vmem:[%s9139_s2 + $0x250] sm:$0xff] }
 0x1ab   : > { %1860 = vst [vmem:[#allocation2 + $0x140] sm:$0xff] %v7628_v17  ;;  %1876 = vst [vmem:[#allocation2 + $0x14f] sm:$0x1] %v7628_v17  ;;  %v2014_v56 = vld [vmem:[#allocation2 + $0xf0] sm:$0xff] }
 0x1ac   : > { %1939 = vst [vmem:[#allocation2 + $0x110] sm:$0xff] %v7628_v17  ;;  %1955 = vst [vmem:[#allocation2 + $0x11f] sm:$0x1] %v7628_v17 }
 0x1ad   : > { %1814 = vst [vmem:[#allocation2 + $0x1c0] sm:$0x7f] %v1782_v5  ;;  %1893 = vst [vmem:[#allocation2 + $0x190] sm:$0x7f] %v1782_v5 }
 0x1ae   : > { %1972 = vst [vmem:[#allocation2 + $0x160] sm:$0x7f] %v1782_v5  ;;  %1718 = vst [vmem:[#allocation2 + $0x1b0] sm:$0xff] %v1686_v4   ;;  %v1692_v5 = vrot.slane %v7741_v10, 7  ;;  %v2005_v9 = vld [vmem:[#allocation2 + $0xa8] sm:$0xff] }
 0x1af   : > { %1829 = vst [vmem:[#allocation2 + $0x180] sm:$0xff] %v1686_v4   ;;  %1908 = vst [vmem:[#allocation2 + $0x150] sm:$0xff] %v1686_v4   ;;  %v7756_v4 = vld [vmem:[%s9139_s2 + $0x310] sm:$0xff] }
 0x1b0   : > { %1813 = vst [vmem:[#allocation2 + $0x178] sm:$0x7f] %v1781_v28  ;;  %1892 = vst [vmem:[#allocation2 + $0x148] sm:$0x7f] %v1781_v28 }
 0x1b1   : > { %1971 = vst [vmem:[#allocation2 + $0x118] sm:$0x7f] %v1781_v28  ;;  %1717 = vst [vmem:[#allocation2 + $0x168] sm:$0xff] %v1685_v61   ;;  %v1592_v28 = vadd.f32 %v1591_v60, %v7550_v2  ;;  %v1643_v2 = vmul.f32 %v7562_v26, %v1597_v19  ;;  %v7896_v60 = vld [vmem:[%s9139_s2 + $0x2c0] sm:$0xff] }
 0x1b2   : > { %1828 = vst [vmem:[#allocation2 + $0x138] sm:$0xff] %v1685_v61   ;;  %1907 = vst [vmem:[#allocation2 + $0x108] sm:$0xff] %v1685_v61   ;;  %v7770_v61 = vsel %vm1620_vm11, %v1582_v50, %v1640_v54  ;;  %v7831_v50 = vld [vmem:[%s9139_s2 + $0x2b8] sm:$0xff]  ;;  %v7875_v54 = vld [vmem:[%s9139_s2 + $0x230] sm:$0xff] }
 0x1b3   : > { %1760 = vst [vmem:[#allocation2 + $0x17] sm:$0x1] %v1653_v14  ;;  %1863 = vst [vmem:[#allocation2 + $0x218] sm:$0xff] %v1653_v14  ;;  %v1691_v11 = vrot.slane %v7770_v61, 7  ;;  %v1787_v12 = vrot.slane %v7770_v61, 1  ;;  %vm1622_vm13 = vcmp.ge.f32.partialorder %v1592_v28, 0.0  ;;  %v1642_v16 = vmul.f32 %v7562_v26, %v1592_v28 }
 0x1b4   : > { %1879 = vst [vmem:[#allocation2 + $0x227] sm:$0x1] %v1653_v14  ;;  %1942 = vst [vmem:[#allocation2 + $0x1e8] sm:$0xff] %v1653_v14 }
 0x1b5   : > { %1958 = vst [vmem:[#allocation2 + $0x1f7] sm:$0x1] %v1653_v14  ;;  %1767 = vst [vmem:[#allocation2 + $0x20f] sm:$0x1] %v7643_v27 }
 0x1b6   : > { %1862 = vst [vmem:[#allocation2 + $0x1d0] sm:$0xff] %v7643_v27  ;;  %1878 = vst [vmem:[#allocation2 + $0x1df] sm:$0x1] %v7643_v27 }
 0x1b7   : > { %1941 = vst [vmem:[#allocation2 + $0x1a0] sm:$0xff] %v7643_v27  ;;  %1957 = vst [vmem:[#allocation2 + $0x1af] sm:$0x1] %v7643_v27 }
 0x1b8   : > { %1808 = vst [vmem:[#allocation2 + $0x10] sm:$0x7f] %v1776_v18  ;;  %1895 = vst [vmem:[#allocation2 + $0x220] sm:$0x7f] %v1776_v18 }
 0x1b9   : > { %1974 = vst [vmem:[#allocation2 + $0x1f0] sm:$0x7f] %v1776_v18  ;;  %1712 = vst [vmem:[#allocation2] sm:$0xff] %v1680_v46   ;;  %v1996_v18 = vld [vmem:[#allocation2 + $0x60] sm:$0xff] }
 0x1ba   : > { %1831 = vst [vmem:[#allocation2 + $0x210] sm:$0xff] %v1680_v46   ;;  %1910 = vst [vmem:[#allocation2 + $0x1e0] sm:$0xff] %v1680_v46   ;;  %v5790_v46 = vpop.f32.mrb[78].mxu0 }
 0x1bb   : > { %1815 = vst [vmem:[#allocation2 + $0x208] sm:$0x7f] %v1783_v33  ;;  %1894 = vst [vmem:[#allocation2 + $0x1d8] sm:$0x7f] %v1783_v33  ;;  %v1607_v40 = vadd.f32 %v5790_v46, %v7566_v55  ;;  %v1601_v51 = vpop.f32.mrb[79].mxu0  ;;  %v2013_v46 = vld [vmem:[#allocation2 + $0xe8] sm:$0xff] }
 0x1bc   : > { %1973 = vst [vmem:[#allocation2 + $0x1a8] sm:$0x7f] %v1783_v33  ;;  %1719 = vst [vmem:[#allocation2 + $0x1f8] sm:$0xff] %v1687_v45   ;;  %v7795_v33 = vsel %vm1623_vm12, %v1597_v19, %v1643_v2  ;;  %v2218_v2 = vld [vmem:[%s9139_s2 + $0x2d0] sm:$0xff] }
 0x1bd   : > { %1830 = vst [vmem:[#allocation2 + $0x1c8] sm:$0xff] %v1687_v45   ;;  %1909 = vst [vmem:[#allocation2 + $0x198] sm:$0xff] %v1687_v45   ;;  %v6221_v45 = vpack.c.bf16 %v7761_v15, %v7756_v4  ;;  %v1694_v43 = vrot.slane %v7795_v33, 7  ;;  %v1790_v55 = vrot.slane %v7795_v33, 1  ;;  %vm1625_vm14 = vcmp.ge.f32.partialorder %v1607_v40, 0.0  ;;  %v2004_v4 = vld [vmem:[#allocation2 + $0xa0] sm:$0xff] }
 0x1be   : > { %1770 = vst [vmem:[#allocation2 + $0x2e7] sm:$0x1] %v7676_v63  ;;  %1865 = vst [vmem:[#allocation2 + $0x2a8] sm:$0xff] %v7676_v63  ;;  %v1645_v41 = vmul.f32 %v7562_v26, %v1607_v40 }
 0x1bf   : > { %1881 = vst [vmem:[#allocation2 + $0x2b7] sm:$0x1] %v7676_v63  ;;  %1944 = vst [vmem:[#allocation2 + $0x278] sm:$0xff] %v7676_v63  ;;  %v1986_v36 = vld [vmem:[#allocation2 + $0x10] sm:$0xff] }
 0x1c0   : > { %1960 = vst [vmem:[#allocation2 + $0x287] sm:$0x1] %v7676_v63  ;;  %1769 = vst [vmem:[#allocation2 + $0x29f] sm:$0x1] %v7704_v3  ;;  %v1984_v14 = vld [vmem:[#allocation2] sm:$0xff]  ;;  %2486 = vmatmul.mubr.f32.vlgmr.msra.gmra.mrb[80].mxu0 %v1986_v36 }
 0x1c1   : > { %1864 = vst [vmem:[#allocation2 + $0x260] sm:$0xff] %v7704_v3  ;;  %1880 = vst [vmem:[#allocation2 + $0x26f] sm:$0x1] %v7704_v3  ;;  %2341 = vmatmul.mubr.f32.vlgmr.msra.gmra.mrb[64].mxu1 %v1984_v14  ;;  %2490 = vmatprep.mubr.f32.mxu0 %v1996_v18  ;;  %v2232_v36 = vld [vmem:[%s9139_s2 + $0x340] sm:$0xff] }
 0x1c2   : > { %1951 = vst [vmem:[#allocation2 + $0x470] sm:$0xff] %v7704_v3  ;;  %1967 = vst [vmem:[#allocation2 + $0x47f] sm:$0x1] %v7704_v3  ;;  %2345 = vmatprep.mubr.f32.mxu1 %v7580_v29  ;;  %v7817_v29 = vsel %vm1622_vm13, %v1592_v28, %v1642_v16  ;;  %6186 = vmatpush3.bf16.msra.mxu1 %v6185_v6  ;;  %v1993_v6 = vld [vmem:[#allocation2 + $0x48] sm:$0xff]  ;;  %v2231_v28 = vld [vmem:[%s9139_s2 + $0x338] sm:$0xff] }
 0x1c3   : > { %1818 = vst [vmem:[#allocation2 + $0x2e0] sm:$0x7f] %v1786_v21  ;;  %1897 = vst [vmem:[#allocation2 + $0x2b0] sm:$0x7f] %v1786_v21  ;;  %6218 = vmatpush3.bf16.msra.mxu0 %v6217_v31  ;;  %v1789_v23 = vrot.slane %v7817_v29, 1  ;;  %6188 = vmatprep.subr.bf16.mxu1 %v6187_v57  ;;  %v7901_v31 = vld [vmem:[%s9139_s2 + $0x2c8] sm:$0xff]  ;;  %v6229_v14 = vpack.c.bf16 %v2231_v28, %v2230_v39 }
 0x1c4   : > { %1976 = vst [vmem:[#allocation2 + $0x280] sm:$0x7f] %v1786_v21  ;;  %1722 = vst [vmem:[#allocation2 + $0x2d0] sm:$0xff] %v1690_v62   ;;  %v7826_v21 = vld [vmem:[%s9139_s2 + $0x2b0] sm:$0xff]  ;;  %6220 = vmatprep.subr.bf16.mxu0 %v6219_v1  ;;  %v2011_v16 = vld [vmem:[#allocation2 + $0xd8] sm:$0xff]  ;;  %v6199_v18 = vpack.c.bf16 %v7901_v31, %v7896_v60 }
 0x1c5   : > { %1833 = vst [vmem:[#allocation2 + $0x2a0] sm:$0xff] %v1690_v62   ;;  %1912 = vst [vmem:[#allocation2 + $0x270] sm:$0xff] %v1690_v62   ;;  %v1602_v62 = vadd.f32 %v1601_v51, %v7556_v25  ;;  %v1693_v25 = vrot.slane %v7817_v29, 7  ;;  %2346 = vmatmul.mubr.f32.gmra.mrb[66].mxu1 %v1993_v6  ;;  %v6195_v15 = vpack.c.bf16 %v7831_v50, %v7826_v21  ;;  %v2250_v51 = vld [vmem:[%s9139_s2 + $0x3d0] sm:$0xff]  ;;  %v2020_v50 = vld [vmem:[#allocation2 + $0x120] sm:$0xff] }
 0x1c6   : > { %1817 = vst [vmem:[#allocation2 + $0x298] sm:$0x7f] %v1785_v52  ;;  %1896 = vst [vmem:[#allocation2 + $0x268] sm:$0x7f] %v1785_v52  ;;  %2350 = vmatprep.mubr.f32.mxu1 %v7570_v37  ;;  %6190 = vmatpush3.bf16.msra.mxu1 %v6189_v59  ;;  %v2234_v21 = vld [vmem:[%s9139_s2 + $0x350] sm:$0xff]  ;;  %v2032_v6 = vld [vmem:[#allocation2 + $0x180] sm:$0xff] }
 0x1c7   : > { %1983 = vst [vmem:[#allocation2 + $0x478] sm:$0x7f] %v1785_v52  ;;  %1721 = vst [vmem:[#allocation2 + $0x288] sm:$0xff] %v1689_v48   ;;  %v7853_v52 = vld [vmem:[%s9139_s2 + $0x328] sm:$0xff]  ;;  %vm1624_vm15 = vcmp.ge.f32.partialorder %v1602_v62, 0.0  ;;  %v1644_v44 = vmul.f32 %v7562_v26, %v1602_v62  ;;  %v7867_v26 = vsel %vm1625_vm14, %v1607_v40, %v1645_v41  ;;  %6222 = vmatpush3.bf16.msra.mxu0 %v6221_v45  ;;  %6192 = vmatprep.subr.bf16.mxu1 %v6191_v58  ;;  %v2023_v40 = vld [vmem:[#allocation2 + $0x138] sm:$0xff] }
 0x1c8   : > { %1832 = vst [vmem:[#allocation2 + $0x258] sm:$0xff] %v1689_v48   ;;  %1919 = vst [vmem:[#allocation2 + $0x468] sm:$0xff] %v1689_v48   ;;  %v1995_v48 = vld [vmem:[#allocation2 + $0x58] sm:$0xff]  ;;  %v1688_v57 = vrot.slane %v7867_v26, 7  ;;  %v1784_v37 = vrot.slane %v7867_v26, 1  ;;  %v6225_v1 = vpack.c.bf16 %v7853_v52, %v7836_v49  ;;  %6224 = vmatprep.subr.bf16.mxu0 %v6223_v35  ;;  %v6231_v58 = vpack.c.bf16 %v2249_v7, %v2248_v0  ;;  %v2233_v45 = vld [vmem:[%s9139_s2 + $0x348] sm:$0xff] }
 0x1c9   : > { %1772 = vst [vmem:[#allocation2 + $0x377] sm:$0x1] %v7741_v10  ;;  %1867 = vst [vmem:[#allocation2 + $0x338] sm:$0xff] %v7741_v10  ;;  %2491 = vmatmul.mubr.f32.gmra.mrb[82].mxu0 %v1995_v48  ;;  %v7888_v19 = vsel %vm1624_vm15, %v1602_v62, %v1644_v44  ;;  %v2203_v35 = vld [vmem:[%s9139_s2 + $0x258] sm:$0xff]  ;;  %v6233_v62 = vpack.c.bf16 %v2233_v45, %v2232_v36  ;;  %v2022_v49 = vld [vmem:[#allocation2 + $0x130] sm:$0xff] }
 0x1ca   : > { %1883 = vst [vmem:[#allocation2 + $0x347] sm:$0x1] %v7741_v10  ;;  %1962 = vst [vmem:[#allocation2 + $0x317] sm:$0x1] %v7741_v10  ;;  %2495 = vmatprep.mubr.f32.mxu0 %v2005_v9  ;;  %v1695_v24 = vrot.slane %v7888_v19, 7  ;;  %v1791_v59 = vrot.slane %v7888_v19, 1  ;;  %6194 = vmatpush3.bf16.msra.mxu1 %v6193_v38 }
 0x1cb   : > { %1771 = vst [vmem:[#allocation2 + $0x32f] sm:$0x1] %v7770_v61  ;;  %1882 = vst [vmem:[#allocation2 + $0x2ff] sm:$0x1] %v7770_v61  ;;  %6226 = vmatpush3.bf16.msra.mxu0 %v6225_v1  ;;  %6196 = vmatprep.subr.bf16.mxu1 %v6195_v15  ;;  %v2235_v41 = vld [vmem:[%s9139_s2 + $0x358] sm:$0xff]  ;;  %v2252_v48 = vld [vmem:[%s9139_s2 + $0x3e0] sm:$0xff] }
 0x1cc   : > { %1961 = vst [vmem:[#allocation2 + $0x2cf] sm:$0x1] %v7770_v61  ;;  %1820 = vst [vmem:[#allocation2 + $0x370] sm:$0x7f] %v1788_v22  ;;  %v2253_v52 = vld [vmem:[%s9139_s2 + $0x3e8] sm:$0xff]  ;;  %v2204_v44 = vld [vmem:[%s9139_s2 + $0x260] sm:$0xff] }
 0x1cd   : > { %1899 = vst [vmem:[#allocation2 + $0x340] sm:$0x7f] %v1788_v22  ;;  %1978 = vst [vmem:[#allocation2 + $0x310] sm:$0x7f] %v1788_v22  ;;  %v6227_v22 = vpack.c.bf16 %v7864_v47, %v7859_v32  ;;  %2496 = vmatmul.mubr.f32.gmra.mrb[84].mxu0 %v2004_v4  ;;  %v2205_v9 = vld [vmem:[%s9139_s2 + $0x268] sm:$0xff]  ;;  %v6205_v32 = vpack.c.bf16 %v2203_v35, %v2202_v34  ;;  %v6237_v47 = vpack.c.bf16 %v2235_v41, %v2234_v21  ;;  %v2222_v38 = vld [vmem:[%s9139_s2 + $0x2f0] sm:$0xff] }
 0x1ce   : > { %1724 = vst [vmem:[#allocation2 + $0x360] sm:$0xff] %v1692_v5   ;;  %1835 = vst [vmem:[#allocation2 + $0x330] sm:$0xff] %v1692_v5   ;;  %2500 = vmatprep.mubr.f32.mxu0 %v2014_v56  ;;  %v2223_v60 = vld [vmem:[%s9139_s2 + $0x2f8] sm:$0xff]  ;;  %v6239_v31 = vpack.c.bf16 %v2253_v52, %v2252_v48  ;;  %v2041_v1 = vld [vmem:[#allocation2 + $0x1c8] sm:$0xff] }
 0x1cf   : > { %1914 = vst [vmem:[#allocation2 + $0x300] sm:$0xff] %v1692_v5   ;;  %1819 = vst [vmem:[#allocation2 + $0x328] sm:$0x7f] %v1787_v12  ;;  %v2002_v5 = vld [vmem:[#allocation2 + $0x90] sm:$0xff]  ;;  %6228 = vmatprep.subr.bf16.mxu0 %v6227_v22  ;;  %v2207_v4 = vld [vmem:[%s9139_s2 + $0x278] sm:$0xff] }
 0x1d0   : > { %1898 = vst [vmem:[#allocation2 + $0x2f8] sm:$0x7f] %v1787_v12  ;;  %1977 = vst [vmem:[#allocation2 + $0x2c8] sm:$0x7f] %v1787_v12  ;;  %2351 = vmatmul.mubr.f32.gmra.mrb[68].mxu1 %v2002_v5  ;;  %v6197_v12 = vpack.c.bf16 %v7880_v8, %v7875_v54  ;;  %6230 = vmatpush3.bf16.msra.mxu0 %v6229_v14  ;;  %v2237_v54 = vld [vmem:[%s9139_s2 + $0x368] sm:$0xff]  ;;  %v2254_v39 = vld [vmem:[%s9139_s2 + $0x3f0] sm:$0xff] }
 0x1d1   : > { %1723 = vst [vmem:[#allocation2 + $0x318] sm:$0xff] %v1691_v11   ;;  %1834 = vst [vmem:[#allocation2 + $0x2e8] sm:$0xff] %v1691_v11   ;;  %2355 = vmatprep.mubr.f32.mxu1 %v7604_v42  ;;  %v2219_v42 = vld [vmem:[%s9139_s2 + $0x2d8] sm:$0xff]  ;;  %2501 = vmatmul.mubr.f32.gmra.mrb[86].mxu0 %v2013_v46  ;;  %v2029_v8 = vld [vmem:[#allocation2 + $0x168] sm:$0xff] }
 0x1d2   : > { %1913 = vst [vmem:[#allocation2 + $0x2b8] sm:$0xff] %v1691_v11   ;;  %1774 = vst [vmem:[#allocation2 + $0x407] sm:$0x1] %v7795_v33  ;;  %v2201_v11 = vld [vmem:[%s9139_s2 + $0x248] sm:$0xff]  ;;  %2505 = vmatprep.mubr.f32.mxu0 %v2023_v40  ;;  %6198 = vmatpush3.bf16.msra.mxu1 %v6197_v12  ;;  %v2206_v5 = vld [vmem:[%s9139_s2 + $0x270] sm:$0xff] }
 0x1d3   : > { %1885 = vst [vmem:[#allocation2 + $0x3d7] sm:$0x1] %v7795_v33  ;;  %1964 = vst [vmem:[#allocation2 + $0x3a7] sm:$0x1] %v7795_v33  ;;  %6200 = vmatprep.subr.bf16.mxu1 %v6199_v18  ;;  %6232 = vmatprep.subr.bf16.mxu0 %v6231_v58  ;;  %v2238_v22 = vld [vmem:[%s9139_s2 + $0x370] sm:$0xff]  ;;  %v2040_v56 = vld [vmem:[#allocation2 + $0x1c0] sm:$0xff] }
 0x1d4   : > { %1773 = vst [vmem:[#allocation2 + $0x3bf] sm:$0x1] %v7817_v29  ;;  %1884 = vst [vmem:[#allocation2 + $0x38f] sm:$0x1] %v7817_v29  ;;  %2356 = vmatmul.mubr.f32.gmra.mrb[70].mxu1 %v2011_v16  ;;  %6234 = vmatpush3.bf16.msra.mxu0 %v6233_v62  ;;  %v2038_v28 = vld [vmem:[#allocation2 + $0x1b0] sm:$0xff]  ;;  %v2239_v7 = vld [vmem:[%s9139_s2 + $0x378] sm:$0xff] }
 0x1d5   : > { %1963 = vst [vmem:[#allocation2 + $0x35f] sm:$0x1] %v7817_v29  ;;  %1822 = vst [vmem:[#allocation2 + $0x400] sm:$0x7f] %v1790_v55  ;;  %2360 = vmatprep.mubr.f32.mxu1 %v7593_v53  ;;  %v2221_v53 = vld [vmem:[%s9139_s2 + $0x2e8] sm:$0xff]  ;;  %2506 = vmatmul.mubr.f32.gmra.mrb[88].mxu0 %v2022_v49  ;;  %v2047_v14 = vld [vmem:[#allocation2 + $0x1f8] sm:$0xff] }
 0x1d6   : > { %1901 = vst [vmem:[#allocation2 + $0x3d0] sm:$0x7f] %v1790_v55  ;;  %1980 = vst [vmem:[#allocation2 + $0x3a0] sm:$0x7f] %v1790_v55  ;;  %v2220_v55 = vld [vmem:[%s9139_s2 + $0x2e0] sm:$0xff]  ;;  %2510 = vmatprep.mubr.f32.mxu0 %v2032_v6  ;;  %v2257_v12 = vld [vmem:[%s9139_s2 + $0x408] sm:$0xff] }
 0x1d7   : > { %1726 = vst [vmem:[#allocation2 + $0x3f0] sm:$0xff] %v1694_v43   ;;  %1837 = vst [vmem:[#allocation2 + $0x3c0] sm:$0xff] %v1694_v43   ;;  %v2049_v36 = vld [vmem:[#allocation2 + $0x208] sm:$0xff]  ;;  %v2059_v46 = vld [vmem:[#allocation2 + $0x258] sm:$0xff] }
 0x1d8   : > { %1916 = vst [vmem:[#allocation2 + $0x390] sm:$0xff] %v1694_v43   ;;  %1821 = vst [vmem:[#allocation2 + $0x3b8] sm:$0x7f] %v1789_v23  ;;  %v6201_v43 = vpack.c.bf16 %v2201_v11, %v2200_v13  ;;  %2361 = vmatmul.mubr.f32.gmra.mrb[72].mxu1 %v2020_v50  ;;  %v2050_v13 = vld [vmem:[#allocation2 + $0x210] sm:$0xff]  ;;  %v2256_v11 = vld [vmem:[%s9139_s2 + $0x400] sm:$0xff] }
 0x1d9   : > { %1900 = vst [vmem:[#allocation2 + $0x388] sm:$0x7f] %v1789_v23  ;;  %1979 = vst [vmem:[#allocation2 + $0x358] sm:$0x7f] %v1789_v23  ;;  %v6235_v23 = vpack.c.bf16 %v2251_v30, %v2250_v51  ;;  %2365 = vmatprep.mubr.f32.mxu1 %v7628_v17  ;;  %v2236_v17 = vld [vmem:[%s9139_s2 + $0x360] sm:$0xff]  ;;  %v8034_v16 = vpack.c.bf16 %v2257_v12, %v2256_v11  ;;  %v2065_v45 = vld [vmem:[#allocation2 + $0x288] sm:$0xff] }
 0x1da   : > { %1725 = vst [vmem:[#allocation2 + $0x3a8] sm:$0xff] %v1693_v25   ;;  %1836 = vst [vmem:[#allocation2 + $0x378] sm:$0xff] %v1693_v25   ;;  %6202 = vmatpush3.bf16.msra.mxu1 %v6201_v43  ;;  %v6241_v15 = vpack.c.bf16 %v2237_v54, %v2236_v17  ;;  %v2068_v58 = vld [vmem:[#allocation2 + $0x2a0] sm:$0xff]  ;;  %v2067_v40 = vld [vmem:[#allocation2 + $0x298] sm:$0xff] }
 0x1db   : > { %1915 = vst [vmem:[#allocation2 + $0x348] sm:$0xff] %v1693_v25   ;;  %1768 = vst [vmem:[#allocation2 + $0x257] sm:$0x1] %v7867_v26  ;;  %v6203_v25 = vpack.c.bf16 %v2219_v42, %v2218_v2  ;;  %6236 = vmatprep.subr.bf16.mxu0 %v6235_v23  ;;  %v6213_v2 = vpack.c.bf16 %v2207_v4, %v2206_v5  ;;  %v6245_v42 = vpack.c.bf16 %v2239_v7, %v2238_v22  ;;  %v2077_v51 = vld [vmem:[#allocation2 + $0x2e8] sm:$0xff]  ;;  %v2074_v30 = vld [vmem:[#allocation2 + $0x2d0] sm:$0xff] }
 0x1dc   : > { %1887 = vst [vmem:[#allocation2 + $0x467] sm:$0x1] %v7867_v26  ;;  %1966 = vst [vmem:[#allocation2 + $0x437] sm:$0x1] %v7867_v26  ;;  %2366 = vmatmul.mubr.f32.gmra.mrb[74].mxu1 %v2029_v8  ;;  %6238 = vmatpush3.bf16.msra.mxu0 %v6237_v47  ;;  %v2076_v34 = vld [vmem:[#allocation2 + $0x2e0] sm:$0xff]  ;;  %v2086_v35 = vld [vmem:[#allocation2 + $0x330] sm:$0xff] }
 0x1dd   : > { %1775 = vst [vmem:[#allocation2 + $0x44f] sm:$0x1] %v7888_v19  ;;  %1886 = vst [vmem:[#allocation2 + $0x41f] sm:$0x1] %v7888_v19  ;;  %6204 = vmatprep.subr.bf16.mxu1 %v6203_v25  ;;  %2370 = vmatprep.mubr.f32.mxu1 %v7617_v20  ;;  %v6211_v20 = vpack.c.bf16 %v2223_v60, %v2222_v38  ;;  %v2083_v43 = vld [vmem:[#allocation2 + $0x318] sm:$0xff]  ;;  %v2094_v62 = vld [vmem:[#allocation2 + $0x370] sm:$0xff] }
 0x1de   : > { %1965 = vst [vmem:[#allocation2 + $0x3ef] sm:$0x1] %v7888_v19  ;;  %1816 = vst [vmem:[#allocation2 + $0x250] sm:$0x7f] %v1784_v37  ;;  %6206 = vmatpush3.bf16.msra.mxu1 %v6205_v32  ;;  %6240 = vmatprep.subr.bf16.mxu0 %v6239_v31  ;;  %v2110_v25 = vld [vmem:[#allocation2 + $0x3f0] sm:$0xff]  ;;  %v2112_v23 = vld [vmem:[#allocation2 + $0x400] sm:$0xff] }
 0x1df   : > { %1903 = vst [vmem:[#allocation2 + $0x460] sm:$0x7f] %v1784_v37  ;;  %1982 = vst [vmem:[#allocation2 + $0x430] sm:$0x7f] %v1784_v37  ;;  %v6207_v37 = vpack.c.bf16 %v2221_v53, %v2220_v55  ;;  %v2085_v55 = vld [vmem:[#allocation2 + $0x328] sm:$0xff]  ;;  %v2092_v53 = vld [vmem:[#allocation2 + $0x360] sm:$0xff] }
 0x1e0   : > { %1720 = vst [vmem:[#allocation2 + $0x240] sm:$0xff] %v1688_v57   ;;  %1839 = vst [vmem:[#allocation2 + $0x450] sm:$0xff] %v1688_v57   ;;  %2371 = vmatmul.mubr.f32.gmra.mrb[76].mxu1 %v2038_v28  ;;  %6242 = vmatpush3.bf16.msra.mxu0 %v6241_v15  ;;  %v2103_v50 = vld [vmem:[#allocation2 + $0x3b8] sm:$0xff]  ;;  %v2258_v52 = vld [vmem:[%s9139_s2 + $0x410] sm:$0xff] }
 0x1e1   : > { %1918 = vst [vmem:[#allocation2 + $0x420] sm:$0xff] %v1688_v57   ;;  %1823 = vst [vmem:[#allocation2 + $0x448] sm:$0x7f] %v1791_v59  ;;  %v2031_v57 = vld [vmem:[#allocation2 + $0x178] sm:$0xff]  ;;  %6208 = vmatprep.subr.bf16.mxu1 %v6207_v37  ;;  %2375 = vmatprep.mubr.f32.mxu1 %v7643_v27  ;;  %v2101_v21 = vld [vmem:[#allocation2 + $0x3a8] sm:$0xff] }
 0x1e2   : > { %1902 = vst [vmem:[#allocation2 + $0x418] sm:$0x7f] %v1791_v59  ;;  %1981 = vst [vmem:[#allocation2 + $0x3e8] sm:$0x7f] %v1791_v59  ;;  %2511 = vmatmul.mubr.f32.gmra.mrb[90].mxu0 %v2031_v57  ;;  %v6209_v59 = vpack.c.bf16 %v2205_v9, %v2204_v44  ;;  %v1989_v44 = vld [vmem:[#allocation2 + $0x28] sm:$0xff]  ;;  %v1991_v9 = vld [vmem:[#allocation2 + $0x38] sm:$0xff] }
 0x1e3   : > { %1727 = vst [vmem:[#allocation2 + $0x438] sm:$0xff] %v1695_v24   ;;  %1838 = vst [vmem:[#allocation2 + $0x408] sm:$0xff] %v1695_v24   ;;  %2515 = vmatprep.mubr.f32.mxu0 %v2041_v1  ;;  %v2259_v32 = vld [vmem:[%s9139_s2 + $0x418] sm:$0xff]  ;;  %v1988_v47 = vld [vmem:[#allocation2 + $0x20] sm:$0xff] }
 0x1e4   : > { %1917 = vst [vmem:[#allocation2 + $0x3d8] sm:$0xff] %v1695_v24   ;;  %v2255_v24 = vld [vmem:[%s9139_s2 + $0x3f8] sm:$0xff]  ;;  %6210 = vmatpush3.bf16.msra.mxu1 %v6209_v59  ;;  %v1990_v38 = vld [vmem:[#allocation2 + $0x30] sm:$0xff]  ;;  %v6251_v17 = vpack.c.bf16 %v2259_v32, %v2258_v52  ;;  %v2260_v54 = vld [vmem:[%s9139_s2 + $0x420] sm:$0xff] }
 0x1e5   : > { %v6243_v0 = vpack.c.bf16 %v2255_v24, %v2254_v39  ;;  %6212 = vmatprep.subr.bf16.mxu1 %v6211_v20  ;;  %2376 = vmatmul.mubr.f32.gmra.mrb[78].mxu1 %v2047_v14  ;;  %v2058_v18 = vld [vmem:[#allocation2 + $0x250] sm:$0xff]  ;;  %v2000_v57 = vld [vmem:[#allocation2 + $0x80] sm:$0xff]  ;;  %v2261_v37 = vld [vmem:[%s9139_s2 + $0x428] sm:$0xff] }
 0x1e6   : > { %2516 = vmatmul.mubr.f32.gmra.mrb[92].mxu0 %v2040_v56  ;;  %2380 = vmatprep.mubr.f32.mxu1 %v7867_v26  ;;  %v1998_v8 = vld [vmem:[#allocation2 + $0x70] sm:$0xff]  ;;  %v1997_v60 = vld [vmem:[#allocation2 + $0x68] sm:$0xff]  ;;  %v1999_v31 = vld [vmem:[#allocation2 + $0x78] sm:$0xff]  ;;  %v6255_v1 = vpack.c.bf16 %v2261_v37, %v2260_v54 }
 0x1e7   : > { %2520 = vmatprep.mubr.f32.mxu0 %v2050_v13  ;;  %6244 = vmatprep.subr.bf16.mxu0 %v6243_v0  ;;  %v2056_v27 = vld [vmem:[#allocation2 + $0x240] sm:$0xff]  ;;  %v2122_v41 = vld [vmem:[#allocation2 + $0x450] sm:$0xff]  ;;  %v2007_v24 = vld [vmem:[#allocation2 + $0xb8] sm:$0xff] }
 0x1e8   : > { %6214 = vmatpush3.bf16.msra.mxu1 %v6213_v2  ;;  %6246 = vmatpush3.bf16.msra.mxu0 %v6245_v42  ;;  %v2121_v48 = vld [vmem:[#allocation2 + $0x448] sm:$0xff]  ;;  %v2262_v39 = vld [vmem:[%s9139_s2 + $0x430] sm:$0xff]  ;;  %v2263_v5 = vld [vmem:[%s9139_s2 + $0x438] sm:$0xff] }
 0x1e9   : > { %6248 = vmatprep.subr.bf16.mxu1 %v8034_v16  ;;  %2381 = vmatmul.mubr.f32.gmra.mrb[80].mxu1 %v2056_v27  ;;  %v2009_v59 = vld [vmem:[#allocation2 + $0xc8] sm:$0xff]  ;;  %v2006_v4 = vld [vmem:[#allocation2 + $0xb0] sm:$0xff]  ;;  %v2008_v15 = vld [vmem:[#allocation2 + $0xc0] sm:$0xff]  ;;  %v6259_v22 = vpack.c.bf16 %v2263_v5, %v2262_v39 }
 0x1ea   : > { %2521 = vmatmul.mubr.f32.gmra.mrb[94].mxu0 %v2049_v36  ;;  %2385 = vmatprep.mubr.f32.mxu1 %v7704_v3  ;;  %v2095_v3 = vld [vmem:[#allocation2 + $0x378] sm:$0xff]  ;;  %v2113_v49 = vld [vmem:[#allocation2 + $0x408] sm:$0xff]  ;;  %v2264_v28 = vld [vmem:[%s9139_s2 + $0x440] sm:$0xff] }
 0x1eb   : > { %2525 = vmatprep.mubr.f32.mxu0 %v2059_v46  ;;  %v2119_v6 = vld [vmem:[#allocation2 + $0x438] sm:$0xff]  ;;  %v2016_v56 = vld [vmem:[#allocation2 + $0x100] sm:$0xff]  ;;  %v2018_v20 = vld [vmem:[#allocation2 + $0x110] sm:$0xff] }
 0x1ec   : > { %v2265_v0 = vld [vmem:[%s9139_s2 + $0x448] sm:$0xff]  ;;  %v2015_v7 = vld [vmem:[#allocation2 + $0xf8] sm:$0xff]  ;;  %v2266_v12 = vld [vmem:[%s9139_s2 + $0x450] sm:$0xff] }
 0x1ed   : > { %2386 = vmatmul.mubr.f32.gmra.mrb[82].mxu1 %v2065_v45  ;;  %v2017_v13 = vld [vmem:[#allocation2 + $0x108] sm:$0xff]  ;;  %v6263_v11 = vpack.c.bf16 %v2265_v0, %v2264_v28  ;;  %v2027_v42 = vld [vmem:[#allocation2 + $0x158] sm:$0xff]  ;;  %v2024_v36 = vld [vmem:[#allocation2 + $0x140] sm:$0xff] }
 0x1ee   : > { %2526 = vmatmul.mubr.f32.gmra.mrb[96].mxu0 %v2058_v18  ;;  %2390 = vmatprep.mubr.f32.mxu1 %v7676_v63  ;;  %v2104_v63 = vld [vmem:[#allocation2 + $0x3c0] sm:$0xff]  ;;  %v2025_v2 = vld [vmem:[#allocation2 + $0x148] sm:$0xff]  ;;  %v2267_v14 = vld [vmem:[%s9139_s2 + $0x458] sm:$0xff] }
 0x1ef   : > { %2530 = vmatprep.mubr.f32.mxu0 %v2068_v58  ;;  %v6267_v46 = vpack.c.bf16 %v2267_v14, %v2266_v12  ;;  %v2268_v27 = vld [vmem:[%s9139_s2 + $0x460] sm:$0xff]  ;;  %v2034_v18 = vld [vmem:[#allocation2 + $0x190] sm:$0xff]  ;;  %v2269_v45 = vld [vmem:[%s9139_s2 + $0x468] sm:$0xff] }
 0x1f0   : > { %v2036_v58 = vld [vmem:[#allocation2 + $0x1a0] sm:$0xff]  ;;  %v2069_v52 = vld [vmem:[#allocation2 + $0x2a8] sm:$0xff]  ;;  %v2010_v39 = vld [vmem:[#allocation2 + $0xd0] sm:$0xff] }
 0x1f1   : > { %2391 = vmatmul.mubr.f32.gmra.mrb[84].mxu1 %v2074_v30  ;;  %v2043_v30 = vld [vmem:[#allocation2 + $0x1d8] sm:$0xff]  ;;  %v2080_v32 = vld [vmem:[#allocation2 + $0x300] sm:$0xff]  ;;  %v2097_v54 = vld [vmem:[#allocation2 + $0x388] sm:$0xff] }
 0x1f2   : > { %2531 = vmatmul.mubr.f32.gmra.mrb[98].mxu0 %v2067_v40  ;;  %2395 = vmatprep.mubr.f32.mxu1 %v7770_v61  ;;  %v2033_v40 = vld [vmem:[#allocation2 + $0x188] sm:$0xff]  ;;  %v2116_v37 = vld [vmem:[#allocation2 + $0x420] sm:$0xff]  ;;  %v2046_v5 = vld [vmem:[#allocation2 + $0x1f0] sm:$0xff] }
 0x1f3   : > { %2535 = vmatprep.mubr.f32.mxu0 %v2077_v51  ;;  %v2035_v51 = vld [vmem:[#allocation2 + $0x198] sm:$0xff]  ;;  %v2118_v0 = vld [vmem:[#allocation2 + $0x430] sm:$0xff] }
 0x1f4   : > { %v2091_v28 = vld [vmem:[#allocation2 + $0x358] sm:$0xff] }
 0x1f5   : > { %2396 = vmatmul.mubr.f32.gmra.mrb[86].mxu1 %v2083_v43  ;;  %v2270_v43 = vld [vmem:[%s9139_s2 + $0x470] sm:$0xff] }
 0x1f6   : > { %2536 = vmatmul.mubr.f32.gmra.mrb[100].mxu0 %v2076_v34  ;;  %2400 = vmatprep.mubr.f32.mxu1 %v7741_v10  ;;  %v6271_v34 = vpack.c.bf16 %v2269_v45, %v2268_v27  ;;  %v3520_v27 = vld [vmem:[%s9140_s3 + $0x10] sm:$0xff]  ;;  %v3538_v45 = vld [vmem:[%s9140_s3 + $0xa0] sm:$0xff] }
 0x1f7   : > { %2540 = vmatprep.mubr.f32.mxu0 %v2086_v35  ;;  %v2045_v35 = vld [vmem:[#allocation2 + $0x1e8] sm:$0xff] }
 0x1f9   : > { %2401 = vmatmul.mubr.f32.gmra.mrb[88].mxu1 %v2092_v53  ;;  %v2044_v53 = vld [vmem:[#allocation2 + $0x1e0] sm:$0xff] }
 0x1fa   : > { %2541 = vmatmul.mubr.f32.gmra.mrb[102].mxu0 %v2085_v55  ;;  %2405 = vmatprep.mubr.f32.mxu1 %v7817_v29  ;;  %v2271_v55 = vld [vmem:[%s9139_s2 + $0x478] sm:$0xff] }
 0x1fb   : > { %2545 = vmatprep.mubr.f32.mxu0 %v2095_v3  ;;  %v2042_v3 = vld [vmem:[#allocation2 + $0x1d0] sm:$0xff] }
 0x1fd   : > { %2406 = vmatmul.mubr.f32.gmra.mrb[90].mxu1 %v2101_v21  ;;  %v2054_v21 = vld [vmem:[#allocation2 + $0x230] sm:$0xff] }
 0x1fe   : > { %2546 = vmatmul.mubr.f32.gmra.mrb[104].mxu0 %v2094_v62  ;;  %2410 = vmatprep.mubr.f32.mxu1 %v7795_v33  ;;  %v6275_v62 = vpack.c.bf16 %v2271_v55, %v2270_v43  ;;  %v3540_v43 = vld [vmem:[%s9140_s3 + $0xb0] sm:$0xff]  ;;  %v3541_v55 = vld [vmem:[%s9140_s3 + $0xb8] sm:$0xff] }
 0x1ff   : > { %2550 = vmatprep.mubr.f32.mxu0 %v2104_v63  ;;  %v2052_v63 = vld [vmem:[#allocation2 + $0x220] sm:$0xff] }
 0x201   : > { %2411 = vmatmul.mubr.f32.gmra.mrb[92].mxu1 %v2110_v25  ;;  %v2061_v25 = vld [vmem:[#allocation2 + $0x268] sm:$0xff] }
 0x202   : > { %2551 = vmatmul.mubr.f32.gmra.mrb[106].mxu0 %v2103_v50  ;;  %2415 = vmatprep.mubr.f32.mxu1 %v7888_v19  ;;  %v2051_v50 = vld [vmem:[#allocation2 + $0x218] sm:$0xff] }
 0x203   : > { %2555 = vmatprep.mubr.f32.mxu0 %v2113_v49  ;;  %v2053_v49 = vld [vmem:[#allocation2 + $0x228] sm:$0xff] }
 0x205   : > { %2416 = vmatmul.mubr.f32.gmra.mrb[94].mxu1 %v2119_v6  ;;  %v2062_v6 = vld [vmem:[#allocation2 + $0x270] sm:$0xff] }
 0x206   : > { %2556 = vmatmul.mubr.f32.gmra.mrb[108].mxu0 %v2112_v23  ;;  %2630 = vmatprep.mubr.f32.mxu1 %v1989_v44  ;;  %v2063_v23 = vld [vmem:[#allocation2 + $0x278] sm:$0xff] }
 0x207   : > { %2560 = vmatprep.mubr.f32.mxu0 %v2122_v41  ;;  %v2060_v41 = vld [vmem:[#allocation2 + $0x260] sm:$0xff]  ;;  %v2071_v44 = vld [vmem:[#allocation2 + $0x2b8] sm:$0xff] }
 0x209   : > { %2631 = vmatmul.mubr.f32.vlgmr.msra.gmra.mrb[96].mxu1 %v1988_v47  ;;  %v2088_v47 = vld [vmem:[#allocation2 + $0x340] sm:$0xff] }
 0x20a   : > { %2561 = vmatmul.mubr.f32.gmra.mrb[110].mxu0 %v2121_v48  ;;  %2635 = vmatprep.mubr.f32.mxu1 %v1998_v8  ;;  %v2070_v48 = vld [vmem:[#allocation2 + $0x2b0] sm:$0xff] }
 0x20b   : > { %2775 = vmatprep.mubr.f32.mxu0 %v1991_v9  ;;  %6250 = vmatpush3.bf16.msra.mxu1 %v8034_v16  ;;  %v2026_v16 = vld [vmem:[#allocation2 + $0x150] sm:$0xff]  ;;  %v2079_v9 = vld [vmem:[#allocation2 + $0x2f8] sm:$0xff] }
 0x20c   : > { %6252 = vmatprep.subr.bf16.mxu1 %v6251_v17  ;;  %v2098_v8 = vld [vmem:[#allocation2 + $0x390] sm:$0xff] }
 0x20d   : > { %2636 = vmatmul.mubr.f32.gmra.mrb[98].mxu1 %v1997_v60  ;;  %v2124_v60 = vld [vmem:[#allocation2 + $0x460] sm:$0xff] }
 0x20e   : > { %2776 = vmatmul.mubr.f32.vlgmr.msra.gmra.mrb[112].mxu0 %v1990_v38  ;;  %2640 = vmatprep.mubr.f32.mxu1 %v2007_v24  ;;  %v2087_v38 = vld [vmem:[#allocation2 + $0x338] sm:$0xff] }
 0x20f   : > { %2780 = vmatprep.mubr.f32.mxu0 %v2000_v57  ;;  %6254 = vmatpush3.bf16.msra.mxu1 %v6251_v17  ;;  %v2089_v17 = vld [vmem:[#allocation2 + $0x348] sm:$0xff]  ;;  %v2115_v57 = vld [vmem:[#allocation2 + $0x418] sm:$0xff] }
 0x210   : > { %6256 = vmatprep.subr.bf16.mxu1 %v6255_v1  ;;  %v2019_v24 = vld [vmem:[#allocation2 + $0x118] sm:$0xff] }
 0x211   : > { %2641 = vmatmul.mubr.f32.gmra.mrb[100].mxu1 %v2006_v4  ;;  %v2055_v4 = vld [vmem:[#allocation2 + $0x238] sm:$0xff] }
 0x212   : > { %2781 = vmatmul.mubr.f32.gmra.mrb[114].mxu0 %v1999_v31  ;;  %2645 = vmatprep.mubr.f32.mxu1 %v2016_v56  ;;  %v2126_v31 = vld [vmem:[#allocation2 + $0x470] sm:$0xff]  ;;  %v2100_v56 = vld [vmem:[#allocation2 + $0x3a0] sm:$0xff] }
 0x213   : > { %2785 = vmatprep.mubr.f32.mxu0 %v2009_v59  ;;  %6258 = vmatpush3.bf16.msra.mxu1 %v6255_v1  ;;  %v1992_v1 = vld [vmem:[#allocation2 + $0x40] sm:$0xff] }
 0x214   : > { %6260 = vmatprep.subr.bf16.mxu1 %v6259_v22  ;;  %v2028_v59 = vld [vmem:[#allocation2 + $0x160] sm:$0xff] }
 0x215   : > { %2646 = vmatmul.mubr.f32.gmra.mrb[102].mxu1 %v2015_v7  ;;  %v2127_v7 = vld [vmem:[#allocation2 + $0x478] sm:$0xff] }
 0x216   : > { %2786 = vmatmul.mubr.f32.gmra.mrb[116].mxu0 %v2008_v15  ;;  %2650 = vmatprep.mubr.f32.mxu1 %v2025_v2  ;;  %v2064_v15 = vld [vmem:[#allocation2 + $0x280] sm:$0xff] }
 0x217   : > { %2790 = vmatprep.mubr.f32.mxu0 %v2018_v20  ;;  %6262 = vmatpush3.bf16.msra.mxu1 %v6259_v22  ;;  %v2082_v22 = vld [vmem:[#allocation2 + $0x310] sm:$0xff]  ;;  %v2109_v20 = vld [vmem:[#allocation2 + $0x3e8] sm:$0xff]  ;;  %v3518_v2 = vld [vmem:[%s9140_s3] sm:$0xff] }
 0x218   : > { %6264 = vmatprep.subr.bf16.mxu1 %v6263_v11 }
 0x219   : > { %2651 = vmatmul.mubr.f32.gmra.mrb[104].mxu1 %v2024_v36  ;;  %v3536_v36 = vld [vmem:[%s9140_s3 + $0x90] sm:$0xff] }
 0x21a   : > { %2791 = vmatmul.mubr.f32.gmra.mrb[118].mxu0 %v2017_v13  ;;  %2655 = vmatprep.mubr.f32.mxu1 %v2034_v18  ;;  %v3534_v13 = vld [vmem:[%s9140_s3 + $0x80] sm:$0xff]  ;;  %v3521_v18 = vld [vmem:[%s9140_s3 + $0x18] sm:$0xff] }
 0x21b   : > { %2795 = vmatprep.mubr.f32.mxu0 %v2027_v42  ;;  %6266 = vmatpush3.bf16.msra.mxu1 %v6263_v11  ;;  %v3535_v11 = vld [vmem:[%s9140_s3 + $0x88] sm:$0xff] }
 0x21c   : > { %6268 = vmatprep.subr.bf16.mxu1 %v6267_v46  ;;  %v6279_v12 = vpack.c.bf16 %v3535_v11, %v3534_v13  ;;  %v3519_v42 = vld [vmem:[%s9140_s3 + $0x8] sm:$0xff] }
 0x21d   : > { %2656 = vmatmul.mubr.f32.gmra.mrb[106].mxu1 %v2033_v40  ;;  %v6281_v14 = vpack.c.bf16 %v3519_v42, %v3518_v2  ;;  %v3539_v40 = vld [vmem:[%s9140_s3 + $0xa8] sm:$0xff]  ;;  %v3544_v42 = vld [vmem:[%s9140_s3 + $0xd0] sm:$0xff] }
 0x21e   : > { %2796 = vmatmul.mubr.f32.gmra.mrb[120].mxu0 %v2026_v16  ;;  %2660 = vmatprep.mubr.f32.mxu1 %v2043_v30  ;;  %v3537_v16 = vld [vmem:[%s9140_s3 + $0x98] sm:$0xff]  ;;  %v3522_v30 = vld [vmem:[%s9140_s3 + $0x20] sm:$0xff] }
 0x21f   : > { %2800 = vmatprep.mubr.f32.mxu0 %v2036_v58  ;;  %6270 = vmatpush3.bf16.msra.mxu1 %v6267_v46  ;;  %v6283_v46 = vpack.c.bf16 %v3537_v16, %v3536_v36  ;;  %v6285_v58 = vpack.c.bf16 %v3521_v18, %v3520_v27  ;;  %v3570_v36 = vld [vmem:[%s9140_s3 + $0x1a0] sm:$0xff]  ;;  %v3571_v18 = vld [vmem:[%s9140_s3 + $0x1a8] sm:$0xff] }
 0x220   : > { %6272 = vmatprep.subr.bf16.mxu1 %v6271_v34  ;;  %6280 = vmatprep.subr.bf16.mxu0 %v6279_v12 }
 0x221   : > { %2661 = vmatmul.mubr.f32.gmra.mrb[108].mxu1 %v2042_v3  ;;  %6282 = vmatpush3.bf16.msra.mxu0 %v6281_v14  ;;  %v6291_v3 = vpack.c.bf16 %v3541_v55, %v3540_v43  ;;  %v3545_v14 = vld [vmem:[%s9140_s3 + $0xd8] sm:$0xff]  ;;  %v3555_v43 = vld [vmem:[%s9140_s3 + $0x128] sm:$0xff] }
 0x222   : > { %2801 = vmatmul.mubr.f32.gmra.mrb[122].mxu0 %v2035_v51  ;;  %2665 = vmatprep.mubr.f32.mxu1 %v2052_v63  ;;  %v6287_v51 = vpack.c.bf16 %v3539_v40, %v3538_v45  ;;  %v6299_v27 = vpack.c.bf16 %v3545_v14, %v3544_v42  ;;  %v3529_v45 = vld [vmem:[%s9140_s3 + $0x58] sm:$0xff] }
 0x223   : > { %2805 = vmatprep.mubr.f32.mxu0 %v2045_v35  ;;  %6274 = vmatpush3.bf16.msra.mxu1 %v6271_v34  ;;  %v3523_v34 = vld [vmem:[%s9140_s3 + $0x28] sm:$0xff] }
 0x224   : > { %6276 = vmatprep.subr.bf16.mxu1 %v6275_v62  ;;  %6284 = vmatprep.subr.bf16.mxu0 %v6283_v46  ;;  %v6289_v35 = vpack.c.bf16 %v3523_v34, %v3522_v30  ;;  %v6319_v34 = vpack.c.bf16 %v3571_v18, %v3570_v36 }
 0x225   : > { %2666 = vmatmul.mubr.f32.gmra.mrb[110].mxu1 %v2051_v50  ;;  %6286 = vmatpush3.bf16.msra.mxu0 %v6285_v58  ;;  %v3543_v50 = vld [vmem:[%s9140_s3 + $0xc8] sm:$0xff]  ;;  %v3528_v58 = vld [vmem:[%s9140_s3 + $0x50] sm:$0xff] }
 0x226   : > { %2806 = vmatmul.mubr.f32.gmra.mrb[124].mxu0 %v2044_v53  ;;  %2670 = vmatprep.mubr.f32.mxu1 %v2061_v25  ;;  %v3524_v53 = vld [vmem:[%s9140_s3 + $0x30] sm:$0xff]  ;;  %v6301_v55 = vpack.c.bf16 %v3529_v45, %v3528_v58  ;;  %v3549_v45 = vld [vmem:[%s9140_s3 + $0xf8] sm:$0xff] }
 0x227   : > { %2810 = vmatprep.mubr.f32.mxu0 %v2054_v21  ;;  %6278 = vmatpush3.bf16.msra.mxu1 %v6275_v62  ;;  %v3525_v62 = vld [vmem:[%s9140_s3 + $0x38] sm:$0xff]  ;;  %v3542_v21 = vld [vmem:[%s9140_s3 + $0xc0] sm:$0xff]  ;;  %v3548_v58 = vld [vmem:[%s9140_s3 + $0xf0] sm:$0xff] }
 0x228   : > { %6288 = vmatprep.subr.bf16.mxu0 %v6287_v51  ;;  %v6293_v63 = vpack.c.bf16 %v3525_v62, %v3524_v53  ;;  %v6295_v25 = vpack.c.bf16 %v3543_v50, %v3542_v21  ;;  %v3572_v21 = vld [vmem:[%s9140_s3 + $0x1b0] sm:$0xff]  ;;  %v3573_v50 = vld [vmem:[%s9140_s3 + $0x1b8] sm:$0xff] }
 0x229   : > { %2671 = vmatmul.mubr.f32.gmra.mrb[112].mxu1 %v2060_v41  ;;  %6290 = vmatpush3.bf16.msra.mxu0 %v6289_v35  ;;  %v3554_v35 = vld [vmem:[%s9140_s3 + $0x120] sm:$0xff] }
 0x22a   : > { %2811 = vmatmul.mubr.f32.gmra.mrb[126].mxu0 %v2053_v49  ;;  %2675 = vmatprep.mubr.f32.mxu1 %v2070_v48  ;;  %v3566_v49 = vld [vmem:[%s9140_s3 + $0x180] sm:$0xff] }
 0x22b   : > { %2815 = vmatprep.mubr.f32.mxu0 %v2063_v23  ;;  %6292 = vmatprep.subr.bf16.mxu0 %v6291_v3  ;;  %v3567_v23 = vld [vmem:[%s9140_s3 + $0x188] sm:$0xff]  ;;  %v6321_v3 = vpack.c.bf16 %v3555_v43, %v3554_v35  ;;  %v6307_v35 = vpack.c.bf16 %v3549_v45, %v3548_v58 }
 0x22c   : > { %v6311_v41 = vpack.c.bf16 %v3567_v23, %v3566_v49  ;;  %v6323_v23 = vpack.c.bf16 %v3573_v50, %v3572_v21  ;;  %v3579_v43 = vld [vmem:[%s9140_s3 + $0x1e8] sm:$0xff]  ;;  %v3562_v50 = vld [vmem:[%s9140_s3 + $0x160] sm:$0xff] }
 0x22d   : > { %2676 = vmatmul.mubr.f32.gmra.mrb[114].mxu1 %v2069_v52  ;;  %6294 = vmatpush3.bf16.msra.mxu0 %v6293_v63  ;;  %v3526_v52 = vld [vmem:[%s9140_s3 + $0x40] sm:$0xff] }
 0x22e   : > { %2816 = vmatmul.mubr.f32.gmra.mrb[128].mxu0 %v2062_v6  ;;  %2680 = vmatprep.mubr.f32.mxu1 %v2079_v9  ;;  %v3550_v9 = vld [vmem:[%s9140_s3 + $0x100] sm:$0xff] }
 0x22f   : > { %2820 = vmatprep.mubr.f32.mxu0 %v7770_v61  ;;  %6296 = vmatprep.subr.bf16.mxu0 %v6295_v25 }
 0x230   : > { %6312 = vmatprep.subr.bf16.mxu1 %v6311_v41  ;;  %v3556_v41 = vld [vmem:[%s9140_s3 + $0x130] sm:$0xff] }
 0x231   : > { %2681 = vmatmul.mubr.f32.gmra.mrb[116].mxu1 %v7770_v61  ;;  %v2107_v61 = vld [vmem:[#allocation2 + $0x3d8] sm:$0xff] }
 0x232   : > { %2821 = vmatmul.mubr.f32.gmra.mrb[130].mxu0 %v2071_v44  ;;  %2685 = vmatprep.mubr.f32.mxu1 %v2088_v47  ;;  %v3527_v44 = vld [vmem:[%s9140_s3 + $0x48] sm:$0xff] }
 0x233   : > { %2825 = vmatprep.mubr.f32.mxu0 %v7741_v10  ;;  %v2106_v10 = vld [vmem:[#allocation2 + $0x3d0] sm:$0xff] }
 0x235   : > { %2686 = vmatmul.mubr.f32.gmra.mrb[118].mxu1 %v2087_v38 }
 0x236   : > { %2826 = vmatmul.mubr.f32.gmra.mrb[132].mxu0 %v2080_v32  ;;  %2690 = vmatprep.mubr.f32.mxu1 %v2097_v54  ;;  %v8171_v32 = vld [vmem:[%s9142_s5 + $0x2] ss:$0 sm:$0xff]  ;;  %v3551_v54 = vld [vmem:[%s9140_s3 + $0x108] sm:$0xff] }
 0x237   : > { %2830 = vmatprep.mubr.f32.mxu0 %v7817_v29 }
 0x239   : > { %2691 = vmatmul.mubr.f32.gmra.mrb[120].mxu1 %v7817_v29  ;;  %v2125_v29 = vld [vmem:[#allocation2 + $0x468] sm:$0xff] }
 0x23a   : > { %2831 = vmatmul.mubr.f32.gmra.mrb[134].mxu0 %v2089_v17  ;;  %2695 = vmatprep.mubr.f32.mxu1 %v2106_v10  ;;  %v6297_v17 = vpack.c.bf16 %v3527_v44, %v3526_v52 }
 0x23b   : > { %2835 = vmatprep.mubr.f32.mxu0 %v7795_v33 }
 0x23c   : > { %6298 = vmatpush3.bf16.msra.mxu0 %v6297_v17 }
 0x23d   : > { %2696 = vmatmul.mubr.f32.gmra.mrb[122].mxu1 %v7795_v33  ;;  %v2001_v33 = vld [vmem:[#allocation2 + $0x88] sm:$0xff]  ;;  %6300 = vmatprep.subr.bf16.mxu0 %v6299_v27 }
 0x23e   : > { %2836 = vmatmul.mubr.f32.gmra.mrb[136].mxu0 %v2098_v8  ;;  %2700 = vmatprep.mubr.f32.mxu1 %v2115_v57 }
 0x23f   : > { %2840 = vmatprep.mubr.f32.mxu0 %v7888_v19 }
 0x240   : > { %6302 = vmatpush3.bf16.msra.mxu0 %v6301_v55  ;;  %v3532_v55 = vld [vmem:[%s9140_s3 + $0x70] sm:$0xff] }
 0x241   : > { %2701 = vmatmul.mubr.f32.gmra.mrb[124].mxu1 %v7888_v19  ;;  %v2037_v19 = vld [vmem:[#allocation2 + $0x1a8] sm:$0xff] }
 0x242   : > { %2841 = vmatmul.mubr.f32.gmra.mrb[138].mxu0 %v2107_v61  ;;  %2705 = vmatprep.mubr.f32.mxu1 %v2124_v60  ;;  %v6313_v61 = vpack.c.bf16 %v3551_v54, %v3550_v9  ;;  %v3546_v54 = vld [vmem:[%s9140_s3 + $0xe0] sm:$0xff] }
 0x243   : > { %2845 = vmatprep.mubr.f32.mxu0 %v7867_v26 }
 0x245   : > { %2706 = vmatmul.mubr.f32.gmra.mrb[126].mxu1 %v7867_v26  ;;  %v2073_v26 = vld [vmem:[#allocation2 + $0x2c8] sm:$0xff] }
 0x246   : > { %2846 = vmatmul.mubr.f32.gmra.mrb[140].mxu0 %v2116_v37  ;;  %5823 = vmatprep.mubr.f32.mxu1 %v1992_v1 }
 0x247   : > { %2850 = vmatprep.mubr.f32.mxu0 %v2126_v31 }
 0x249   : > { %5824 = vmatmul.mubr.f32.vlgmr.msra.gmra.mrb[128].mxu1 %v2001_v33 }
 0x24a   : > { %2851 = vmatmul.mubr.f32.gmra.mrb[142].mxu0 %v2125_v29  ;;  %5826 = vmatprep.mubr.f32.mxu1 %v2010_v39 }
 0x24b   : > { %6314 = vmatpush3.bf16.msra.mxu1 %v6313_v61 }
 0x24d   : > { %5827 = vmatmul.mubr.f32.gmra.mrb[130].mxu1 %v2019_v24 }
 0x24e   : > { %5829 = vmatprep.mubr.f32.mxu1 %v2028_v59 }
 0x251   : > { %5830 = vmatmul.mubr.f32.gmra.mrb[132].mxu1 %v2037_v19 }
 0x252   : > { %5832 = vmatprep.mubr.f32.mxu1 %v2046_v5  ;;  %v3568_v5 = vld [vmem:[%s9140_s3 + $0x190] sm:$0xff] }
 0x255   : > { %5833 = vmatmul.mubr.f32.gmra.mrb[134].mxu1 %v2055_v4  ;;  %v3569_v4 = vld [vmem:[%s9140_s3 + $0x198] sm:$0xff] }
 0x256   : > { %5835 = vmatprep.mubr.f32.mxu1 %v2064_v15 }
 0x259   : > { %5836 = vmatmul.mubr.f32.gmra.mrb[136].mxu1 %v2073_v26 }
 0x25a   : > { %5838 = vmatprep.mubr.f32.mxu1 %v2082_v22  ;;  %v6315_v22 = vpack.c.bf16 %v3569_v4, %v3568_v5  ;;  %v3559_v5 = vld [vmem:[%s9140_s3 + $0x148] sm:$0xff] }
 0x25c   : > { %6316 = vmatprep.subr.bf16.mxu1 %v6315_v22 }
 0x25d   : > { %5839 = vmatmul.mubr.f32.gmra.mrb[138].mxu1 %v2091_v28  ;;  %v3552_v28 = vld [vmem:[%s9140_s3 + $0x110] sm:$0xff] }
 0x25e   : > { %5841 = vmatprep.mubr.f32.mxu1 %v2100_v56  ;;  %v3553_v56 = vld [vmem:[%s9140_s3 + $0x118] sm:$0xff] }
 0x25f   : > { %v6317_v13 = vpack.c.bf16 %v3553_v56, %v3552_v28  ;;  %v3576_v56 = vld [vmem:[%s9140_s3 + $0x1d0] sm:$0xff] }
 0x261   : > { %5842 = vmatmul.mubr.f32.gmra.mrb[140].mxu1 %v2109_v20 }
 0x262   : > { %5844 = vmatprep.mubr.f32.mxu1 %v2118_v0  ;;  %6318 = vmatpush3.bf16.msra.mxu1 %v6317_v13 }
 0x263   : > { %6320 = vmatprep.subr.bf16.mxu1 %v6319_v34 }
 0x265   : > { %5845 = vmatmul.mubr.f32.gmra.mrb[142].mxu1 %v2127_v7 }
 0x266   : > { %6322 = vmatpush3.bf16.msra.mxu1 %v6321_v3  ;;  %v3533_v3 = vld [vmem:[%s9140_s3 + $0x78] sm:$0xff] }
 0x267   : > { %6324 = vmatprep.subr.bf16.mxu1 %v6323_v23 }
 0x293   : > { %v5111_v48 = vpop.f32.mrb[80].mxu0 }
 0x294   : > { %v5031_v6 = vpop.f32.mrb[64].mxu1  ;;  %v5112_v38 = vpop.f32.mrb[81].mxu0 }
 0x295   : > { %v5032_v47 = vpop.f32.mrb[65].mxu1  ;;  %v5113_v10 = vadd.f32 %v5112_v38, %v5111_v48 }
 0x296   : > { %v5033_v8 = vadd.f32 %v5032_v47, %v5031_v6  ;;  %v3557_v6 = vld [vmem:[%s9140_s3 + $0x138] sm:$0xff] }
 0x297   : > { %v6325_v9 = vpack.c.bf16 %v3557_v6, %v3556_v41 }
 0x298   : > { %v2343_v57 = vadd.f32 %v5033_v8, %v8171_v32  ;;  %v5034_v37 = vpop.f32.mrb[66].mxu1  ;;  %v3547_v8 = vld [vmem:[%s9140_s3 + $0xe8] sm:$0xff] }
 0x299   : > { %v5035_v31 = vpop.f32.mrb[67].mxu1  ;;  %6326 = vmatpush3.bf16.msra.mxu1 %v6325_v9  ;;  %v3581_v9 = vld [vmem:[%s9140_s3 + $0x1f8] sm:$0xff] }
 0x29a   : > { %v8177_v1 = vadd.f32 %v5113_v10, %v2343_v57  ;;  %v5036_v33 = vadd.f32 %v5035_v31, %v5034_v37  ;;  %v3574_v10 = vld [vmem:[%s9140_s3 + $0x1c0] sm:$0xff]  ;;  %v6303_v37 = vpack.c.bf16 %v3547_v8, %v3546_v54  ;;  %v3564_v54 = vld [vmem:[%s9140_s3 + $0x170] sm:$0xff]  ;;  %v3565_v8 = vld [vmem:[%s9140_s3 + $0x178] sm:$0xff] }
 0x29b   : > { %v3530_v31 = vld [vmem:[%s9140_s3 + $0x60] sm:$0xff] }
 0x29c   : > { %v5114_v60 = vpop.f32.mrb[82].mxu0  ;;  %v2348_v24 = vadd.f32 %v5036_v33, %v8171_v32  ;;  %6304 = vmatprep.subr.bf16.mxu0 %v6303_v37  ;;  %v6341_v37 = vpack.c.bf16 %v3565_v8, %v3564_v54 }
 0x29d   : > { %v5115_v29 = vpop.f32.mrb[83].mxu0 }
 0x29e   : > { %v5116_v39 = vadd.f32 %v5115_v29, %v5114_v60  ;;  %v3575_v60 = vld [vmem:[%s9140_s3 + $0x1c8] sm:$0xff] }
 0x29f   : > { %v3531_v29 = vld [vmem:[%s9140_s3 + $0x68] sm:$0xff] }
 0x2a0   : > { %v5117_v19 = vpop.f32.mrb[84].mxu0  ;;  %v8192_v20 = vadd.f32 %v5116_v39, %v2348_v24  ;;  %v6305_v4 = vpack.c.bf16 %v3531_v29, %v3530_v31 }
 0x2a1   : > { %v5118_v26 = vpop.f32.mrb[85].mxu0 }
 0x2a2   : > { %v5119_v7 = vadd.f32 %v5118_v26, %v5117_v19  ;;  %v3558_v19 = vld [vmem:[%s9140_s3 + $0x140] sm:$0xff]  ;;  %6306 = vmatpush3.bf16.msra.mxu0 %v6305_v4 }
 0x2a3   : > { %v5037_v59 = vpop.f32.mrb[68].mxu1  ;;  %6308 = vmatprep.subr.bf16.mxu0 %v6307_v35 }
 0x2a4   : > { %v5038_v15 = vpop.f32.mrb[69].mxu1  ;;  %v5120_v2 = vpop.f32.mrb[86].mxu0 }
 0x2a5   : > { %v5039_v0 = vadd.f32 %v5038_v15, %v5037_v59  ;;  %v5121_v46 = vpop.f32.mrb[87].mxu0  ;;  %v6327_v59 = vpack.c.bf16 %v3575_v60, %v3574_v10  ;;  %v6329_v15 = vpack.c.bf16 %v3559_v5, %v3558_v19 }
 0x2a6   : > { %v5122_v30 = vadd.f32 %v5121_v46, %v5120_v2  ;;  %v3561_v2 = vld [vmem:[%s9140_s3 + $0x158] sm:$0xff] }
 0x2a7   : > { %v2353_v11 = vadd.f32 %v5039_v0, %v8171_v32  ;;  %v5040_v12 = vpop.f32.mrb[70].mxu1  ;;  %6328 = vmatprep.subr.bf16.mxu1 %v6327_v59  ;;  %v3577_v0 = vld [vmem:[%s9140_s3 + $0x1d8] sm:$0xff] }
 0x2a8   : > { %v5041_v16 = vpop.f32.mrb[71].mxu1  ;;  %v5123_v63 = vpop.f32.mrb[88].mxu0  ;;  %6330 = vmatpush3.bf16.msra.mxu1 %v6329_v15 }
 0x2a9   : > { %v8213_v40 = vadd.f32 %v5119_v7, %v2353_v11  ;;  %v5042_v51 = vadd.f32 %v5041_v16, %v5040_v12  ;;  %v5124_v25 = vpop.f32.mrb[89].mxu0  ;;  %v6331_v11 = vpack.c.bf16 %v3577_v0, %v3576_v56  ;;  %v3560_v12 = vld [vmem:[%s9140_s3 + $0x150] sm:$0xff] }
 0x2aa   : > { %v5125_v44 = vadd.f32 %v5124_v25, %v5123_v63  ;;  %v6333_v16 = vpack.c.bf16 %v3561_v2, %v3560_v12  ;;  %v6309_v25 = vpack.c.bf16 %v3533_v3, %v3532_v55 }
 0x2ab   : > { %v2358_v53 = vadd.f32 %v5042_v51, %v8171_v32  ;;  %v5043_v62 = vpop.f32.mrb[72].mxu1  ;;  %6332 = vmatprep.subr.bf16.mxu1 %v6331_v11  ;;  %v3578_v51 = vld [vmem:[%s9140_s3 + $0x1e0] sm:$0xff] }
 0x2ac   : > { %v5044_v49 = vpop.f32.mrb[73].mxu1  ;;  %6334 = vmatpush3.bf16.msra.mxu1 %v6333_v16  ;;  %v6335_v21 = vpack.c.bf16 %v3579_v43, %v3578_v51  ;;  %6310 = vmatpush3.bf16.msra.mxu0 %v6309_v25 }
 0x2ad   : > { %v8234_v48 = vadd.f32 %v5122_v30, %v2358_v53  ;;  %v5045_v52 = vadd.f32 %v5044_v49, %v5043_v62  ;;  %v3563_v49 = vld [vmem:[%s9140_s3 + $0x168] sm:$0xff] }
 0x2ae   : > { %v6337_v23 = vpack.c.bf16 %v3563_v49, %v3562_v50  ;;  %6336 = vmatprep.subr.bf16.mxu1 %v6335_v21 }
 0x2af   : > { %v2363_v47 = vadd.f32 %v5045_v52, %v8171_v32  ;;  %v5046_v38 = vpop.f32.mrb[74].mxu1 }
 0x2b0   : > { %v5047_v61 = vpop.f32.mrb[75].mxu1  ;;  %6338 = vmatpush3.bf16.msra.mxu1 %v6337_v23 }
 0x2b1   : > { %v8255_v33 = vadd.f32 %v5125_v44, %v2363_v47  ;;  %v5048_v39 = vadd.f32 %v5047_v61, %v5046_v38  ;;  %v3580_v44 = vld [vmem:[%s9140_s3 + $0x1f0] sm:$0xff] }
 0x2b3   : > { %v2368_v26 = vadd.f32 %v5048_v39, %v8171_v32  ;;  %v5049_v22 = vpop.f32.mrb[76].mxu1  ;;  %v3598_v39 = vld [vmem:[%s9140_s3 + $0x280] sm:$0xff] }
 0x2b4   : > { %v5050_v7 = vpop.f32.mrb[77].mxu1 }
 0x2b5   : > { %v5126_v17 = vpop.f32.mrb[90].mxu0  ;;  %v5051_v14 = vadd.f32 %v5050_v7, %v5049_v22 }
 0x2b6   : > { %v5127_v57 = vpop.f32.mrb[91].mxu0 }
 0x2b7   : > { %v5128_v24 = vadd.f32 %v5127_v57, %v5126_v17  ;;  %v2373_v46 = vadd.f32 %v5051_v14, %v8171_v32  ;;  %v6339_v17 = vpack.c.bf16 %v3581_v9, %v3580_v44 }
 0x2b8   : > { %v5052_v27 = vpop.f32.mrb[78].mxu1 }
 0x2b9   : > { %v5129_v28 = vpop.f32.mrb[92].mxu0  ;;  %v8276_v42 = vadd.f32 %v5128_v24, %v2368_v26  ;;  %v5053_v30 = vpop.f32.mrb[79].mxu1  ;;  %6340 = vmatprep.subr.bf16.mxu1 %v6339_v17  ;;  %v3599_v24 = vld [vmem:[%s9140_s3 + $0x288] sm:$0xff] }
 0x2ba   : > { %v5130_v13 = vpop.f32.mrb[93].mxu0  ;;  %v5054_v62 = vadd.f32 %v5053_v30, %v5052_v27  ;;  %6342 = vmatpush3.bf16.msra.mxu1 %v6341_v37  ;;  %v6343_v5 = vpack.c.bf16 %v3599_v24, %v3598_v39  ;;  %v3631_v17 = vld [vmem:[%s9140_s3 + $0x388] sm:$0xff] }
 0x2bb   : > { %v5131_v36 = vadd.f32 %v5130_v13, %v5129_v28 }
 0x2bc   : > { %v2378_v41 = vadd.f32 %v5054_v62, %v8171_v32  ;;  %v5055_v6 = vpop.f32.mrb[80].mxu1  ;;  %6344 = vmatprep.subr.bf16.mxu0 %v6343_v5 }
 0x2bd   : > { %v5132_v18 = vpop.f32.mrb[94].mxu0  ;;  %v8297_v53 = vadd.f32 %v5131_v36, %v2373_v46  ;;  %v5056_v47 = vpop.f32.mrb[81].mxu1 }
 0x2be   : > { %v5133_v34 = vpop.f32.mrb[95].mxu0  ;;  %v5057_v61 = vadd.f32 %v5056_v47, %v5055_v6 }
 0x2bf   : > { %v5134_v63 = vadd.f32 %v5133_v34, %v5132_v18 }
 0x2c0   : > { %v2383_v60 = vadd.f32 %v5057_v61, %v8171_v32  ;;  %v5058_v31 = vpop.f32.mrb[82].mxu1 }
 0x2c1   : > { %v5135_v52 = vpop.f32.mrb[96].mxu0  ;;  %v8318_v10 = vadd.f32 %v5134_v63, %v2378_v41  ;;  %v5059_v59 = vpop.f32.mrb[83].mxu1 }
 0x2c2   : > { %v5136_v38 = vpop.f32.mrb[97].mxu0  ;;  %v5060_v15 = vadd.f32 %v5059_v59, %v5058_v31 }
 0x2c3   : > { %v5137_v57 = vadd.f32 %v5136_v38, %v5135_v52  ;;  %v3630_v38 = vld [vmem:[%s9140_s3 + $0x380] sm:$0xff] }
 0x2c4   : > { %v2388_v22 = vadd.f32 %v5060_v15, %v8171_v32  ;;  %v5061_v28 = vpop.f32.mrb[84].mxu1 }
 0x2c5   : > { %v5138_v29 = vpop.f32.mrb[98].mxu0  ;;  %v8327_v4 = vadd.f32 %v5137_v57, %v2383_v60  ;;  %v5062_v0 = vpop.f32.mrb[85].mxu1  ;;  %v6375_v57 = vpack.c.bf16 %v3631_v17, %v3630_v38 }
 0x2c6   : > { %v5139_v19 = vpop.f32.mrb[99].mxu0  ;;  %v5063_v11 = vadd.f32 %v5062_v0, %v5061_v28 }
 0x2c7   : > { %v5140_v26 = vadd.f32 %v5139_v19, %v5138_v29  ;;  %6376 = vmatprep.subr.bf16.mxu1 %v6375_v57 }
 0x2c8   : > { %v2393_v2 = vadd.f32 %v5063_v11, %v8171_v32  ;;  %v5064_v14 = vpop.f32.mrb[86].mxu1 }
 0x2c9   : > { %v5141_v56 = vpop.f32.mrb[100].mxu0  ;;  %v8330_v13 = vadd.f32 %v5140_v26, %v2388_v22  ;;  %v5065_v16 = vpop.f32.mrb[87].mxu1 }
 0x2ca   : > { %v5142_v7 = vpop.f32.mrb[101].mxu0  ;;  %v5066_v18 = vadd.f32 %v5065_v16, %v5064_v14 }
 0x2cb   : > { %v5143_v12 = vadd.f32 %v5142_v7, %v5141_v56 }
 0x2cc   : > { %v2398_v45 = vadd.f32 %v5066_v18, %v8171_v32  ;;  %v5067_v51 = vpop.f32.mrb[88].mxu1 }
 0x2cd   : > { %v5144_v36 = vpop.f32.mrb[102].mxu0  ;;  %v8333_v27 = vadd.f32 %v5143_v12, %v2393_v2  ;;  %v5068_v34 = vpop.f32.mrb[89].mxu1 }
 0x2ce   : > { %v5145_v46 = vpop.f32.mrb[103].mxu0  ;;  %v5069_v55 = vadd.f32 %v5068_v34, %v5067_v51 }
 0x2cf   : > { %v5146_v58 = vadd.f32 %v5145_v46, %v5144_v36 }
 0x2d0   : > { %v2403_v62 = vadd.f32 %v5069_v55, %v8171_v32  ;;  %v5070_v63 = vpop.f32.mrb[90].mxu1 }
 0x2d1   : > { %v5147_v30 = vpop.f32.mrb[104].mxu0  ;;  %v8336_v43 = vadd.f32 %v5146_v58, %v2398_v45  ;;  %v5071_v50 = vpop.f32.mrb[91].mxu1 }
 0x2d2   : > { %v5148_v35 = vpop.f32.mrb[105].mxu0  ;;  %v5072_v23 = vadd.f32 %v5071_v50, %v5070_v63 }
 0x2d3   : > { %v5149_v3 = vadd.f32 %v5148_v35, %v5147_v30 }
 0x2d4   : > { %v2408_v6 = vadd.f32 %v5072_v23, %v8171_v32  ;;  %v5073_v52 = vpop.f32.mrb[92].mxu1 }
 0x2d5   : > { %v5150_v21 = vpop.f32.mrb[106].mxu0  ;;  %v8339_v25 = vadd.f32 %v5149_v3, %v2403_v62  ;;  %v5074_v9 = vpop.f32.mrb[93].mxu1 }
 0x2d6   : > { %v5151_v49 = vpop.f32.mrb[107].mxu0  ;;  %v5075_v8 = vadd.f32 %v5074_v9, %v5073_v52 }
 0x2d7   : > { %v5152_v41 = vadd.f32 %v5151_v49, %v5150_v21 }
 0x2d8   : > { %v2413_v37 = vadd.f32 %v5075_v8, %v8171_v32  ;;  %v5076_v60 = vpop.f32.mrb[94].mxu1 }
 0x2d9   : > { %v5153_v44 = vpop.f32.mrb[108].mxu0  ;;  %v8348_v54 = vadd.f32 %v5152_v41, %v2408_v6  ;;  %v5077_v29 = vpop.f32.mrb[95].mxu1 }
 0x2da   : > { %v5154_v47 = vpop.f32.mrb[109].mxu0  ;;  %v5078_v59 = vadd.f32 %v5077_v29, %v5076_v60 }
 0x2db   : > { %v5155_v61 = vadd.f32 %v5154_v47, %v5153_v44 }
 0x2dc   : > { %v2418_v5 = vadd.f32 %v5078_v59, %v8171_v32  ;;  %v5191_v15 = vpop.f32.mrb[96].mxu1 }
 0x2dd   : > { %v5156_v31 = vpop.f32.mrb[110].mxu0  ;;  %v8351_v24 = vadd.f32 %v5155_v61, %v2413_v37  ;;  %v5192_v22 = vpop.f32.mrb[97].mxu1 }
 0x2de   : > { %v5157_v39 = vpop.f32.mrb[111].mxu0  ;;  %v5193_v0 = vadd.f32 %v5192_v22, %v5191_v15 }
 0x2df   : > { %v5158_v19 = vadd.f32 %v5157_v39, %v5156_v31 }
 0x2e0   : > { %v2633_v11 = vadd.f32 %v5193_v0, %v8177_v1  ;;  %v5194_v12 = vpop.f32.mrb[98].mxu1 }
 0x2e1   : > { %v5271_v26 = vpop.f32.mrb[112].mxu0  ;;  %v8354_v56 = vadd.f32 %v5158_v19, %v2418_v5  ;;  %v5195_v14 = vpop.f32.mrb[99].mxu1 }
 0x2e2   : > { %v5272_v28 = vpop.f32.mrb[113].mxu0  ;;  %v5196_v16 = vadd.f32 %v5195_v14, %v5194_v12 }
 0x2e3   : > { %v5273_v7 = vadd.f32 %v5272_v28, %v5271_v26 }
 0x2e4   : > { %v2638_v32 = vadd.f32 %v5196_v16, %v8192_v20  ;;  %v5197_v58 = vpop.f32.mrb[100].mxu1 }
 0x2e5   : > { %v5274_v2 = vpop.f32.mrb[114].mxu0  ;;  %v8357_v18 = vadd.f32 %v5273_v7, %v2633_v11  ;;  %v5198_v51 = vpop.f32.mrb[101].mxu1 }
 0x2e6   : > { %v5275_v36 = vpop.f32.mrb[115].mxu0  ;;  %v5199_v34 = vadd.f32 %v5198_v51, %v5197_v58 }
 0x2e7   : > { %v5276_v46 = vadd.f32 %v5275_v36, %v5274_v2 }
 0x2e8   : > { %v2643_v1 = vadd.f32 %v5199_v34, %v8213_v40  ;;  %v5200_v3 = vpop.f32.mrb[102].mxu1 }
 0x2e9   : > { %v5277_v45 = vpop.f32.mrb[116].mxu0  ;;  %v8360_v55 = vadd.f32 %v5276_v46, %v2638_v32  ;;  %v5201_v63 = vpop.f32.mrb[103].mxu1 }
 0x2ea   : > { %v5278_v30 = vpop.f32.mrb[117].mxu0  ;;  %v5202_v50 = vadd.f32 %v5201_v63, %v5200_v3 }
 0x2eb   : > { %v5279_v35 = vadd.f32 %v5278_v30, %v5277_v45 }
 0x2ec   : > { %v2648_v20 = vadd.f32 %v5202_v50, %v8234_v48  ;;  %v5203_v41 = vpop.f32.mrb[104].mxu1 }
 0x2ed   : > { %v5280_v62 = vpop.f32.mrb[118].mxu0  ;;  %v8363_v23 = vadd.f32 %v5279_v35, %v2643_v1  ;;  %v5204_v52 = vpop.f32.mrb[105].mxu1 }
 0x2ee   : > { %v5281_v21 = vpop.f32.mrb[119].mxu0  ;;  %v5205_v9 = vadd.f32 %v5204_v52, %v5203_v41 }
 0x2ef   : > { %v5282_v49 = vadd.f32 %v5281_v21, %v5280_v62 }
 0x2f0   : > { %v2653_v40 = vadd.f32 %v5205_v9, %v8255_v33  ;;  %v5206_v17 = vpop.f32.mrb[106].mxu1 }
 0x2f1   : > { %v5283_v6 = vpop.f32.mrb[120].mxu0  ;;  %v8366_v38 = vadd.f32 %v5282_v49, %v2648_v20  ;;  %v5207_v61 = vpop.f32.mrb[107].mxu1 }
 0x2f2   : > { %v5284_v44 = vpop.f32.mrb[121].mxu0  ;;  %v5208_v37 = vadd.f32 %v5207_v61, %v5206_v17 }
 0x2f3   : > { %v5285_v47 = vadd.f32 %v5284_v44, %v5283_v6 }
 0x2f4   : > { %v2658_v48 = vadd.f32 %v5208_v37, %v8276_v42  ;;  %v5209_v29 = vpop.f32.mrb[108].mxu1 }
 0x2f5   : > { %v5286_v8 = vpop.f32.mrb[122].mxu0  ;;  %v8369_v31 = vadd.f32 %v5285_v47, %v2653_v40  ;;  %v5210_v59 = vpop.f32.mrb[109].mxu1 }
 0x2f6   : > { %v5287_v57 = vpop.f32.mrb[123].mxu0  ;;  %v5211_v5 = vadd.f32 %v5210_v59, %v5209_v29 }
 0x2f7   : > { %v5288_v60 = vadd.f32 %v5287_v57, %v5286_v8 }
 0x2f8   : > { %v2663_v33 = vadd.f32 %v5211_v5, %v8297_v53  ;;  %v5212_v22 = vpop.f32.mrb[110].mxu1 }
 0x2f9   : > { %v5289_v39 = vpop.f32.mrb[124].mxu0  ;;  %v8372_v26 = vadd.f32 %v5288_v60, %v2658_v48  ;;  %v5213_v0 = vpop.f32.mrb[111].mxu1 }
 0x2fa   : > { %v5290_v19 = vpop.f32.mrb[125].mxu0  ;;  %v5214_v11 = vadd.f32 %v5213_v0, %v5212_v22 }
 0x2fb   : > { %v5291_v15 = vadd.f32 %v5290_v19, %v5289_v39 }
 0x2fc   : > { %v2668_v42 = vadd.f32 %v5214_v11, %v8318_v10  ;;  %v5215_v14 = vpop.f32.mrb[112].mxu1 }
 0x2fd   : > { %v5292_v28 = vpop.f32.mrb[126].mxu0  ;;  %v8375_v2 = vadd.f32 %v5291_v15, %v2663_v33  ;;  %v5216_v16 = vpop.f32.mrb[113].mxu1 }
 0x2fe   : > { %v5293_v7 = vpop.f32.mrb[127].mxu0  ;;  %v5217_v32 = vadd.f32 %v5216_v16, %v5215_v14 }
 0x2ff   : > { %v5294_v12 = vadd.f32 %v5293_v7, %v5292_v28 }
 0x300   : > { %v2673_v53 = vadd.f32 %v5217_v32, %v8327_v4  ;;  %v5218_v51 = vpop.f32.mrb[114].mxu1 }
 0x301   : > { %v5295_v36 = vpop.f32.mrb[128].mxu0  ;;  %v8378_v45 = vadd.f32 %v5294_v12, %v2668_v42  ;;  %v5219_v34 = vpop.f32.mrb[115].mxu1 }
 0x302   : > { %v5296_v46 = vpop.f32.mrb[129].mxu0  ;;  %v5220_v1 = vadd.f32 %v5219_v34, %v5218_v51  ;;  %v8405_v34 = vld [vmem:[%s9142_s5 + $0x3] ss:$0 sm:$0xff] }
 0x303   : > { %v5297_v58 = vadd.f32 %v5296_v46, %v5295_v36 }
 0x304   : > { %v2678_v10 = vadd.f32 %v5220_v1, %v8330_v13  ;;  %v5221_v63 = vpop.f32.mrb[116].mxu1 }
 0x305   : > { %v5298_v30 = vpop.f32.mrb[130].mxu0  ;;  %v8381_v62 = vadd.f32 %v5297_v58, %v2673_v53  ;;  %v5222_v50 = vpop.f32.mrb[117].mxu1 }
 0x306   : > { %v5299_v35 = vpop.f32.mrb[131].mxu0  ;;  %v5223_v20 = vadd.f32 %v5222_v50, %v5221_v63 }
 0x307   : > { %v5300_v3 = vadd.f32 %v5299_v35, %v5298_v30 }
 0x308   : > { %v2683_v4 = vadd.f32 %v5223_v20, %v8333_v27  ;;  %v5224_v52 = vpop.f32.mrb[118].mxu1 }
 0x309   : > { %v5301_v21 = vpop.f32.mrb[132].mxu0  ;;  %v8384_v6 = vadd.f32 %v5300_v3, %v2678_v10  ;;  %v5225_v9 = vpop.f32.mrb[119].mxu1 }
 0x30a   : > { %v5302_v49 = vpop.f32.mrb[133].mxu0  ;;  %v5226_v40 = vadd.f32 %v5225_v9, %v5224_v52 }
 0x30b   : > { %v5303_v41 = vadd.f32 %v5302_v49, %v5301_v21 }
 0x30c   : > { %v2688_v13 = vadd.f32 %v5226_v40, %v8336_v43  ;;  %v5227_v61 = vpop.f32.mrb[120].mxu1 }
 0x30d   : > { %v5304_v44 = vpop.f32.mrb[134].mxu0  ;;  %v8387_v8 = vadd.f32 %v5303_v41, %v2683_v4  ;;  %v5228_v37 = vpop.f32.mrb[121].mxu1 }
 0x30e   : > { %v5305_v47 = vpop.f32.mrb[135].mxu0  ;;  %v5229_v48 = vadd.f32 %v5228_v37, %v5227_v61 }
 0x30f   : > { %v5306_v17 = vadd.f32 %v5305_v47, %v5304_v44 }
 0x310   : > { %v2693_v27 = vadd.f32 %v5229_v48, %v8339_v25  ;;  %v5230_v59 = vpop.f32.mrb[122].mxu1 }
 0x311   : > { %v5307_v57 = vpop.f32.mrb[136].mxu0  ;;  %v8390_v39 = vadd.f32 %v5306_v17, %v2688_v13  ;;  %v5231_v5 = vpop.f32.mrb[123].mxu1 }
 0x312   : > { %v5308_v60 = vpop.f32.mrb[137].mxu0  ;;  %v5232_v33 = vadd.f32 %v5231_v5, %v5230_v59 }
 0x313   : > { %v5309_v29 = vadd.f32 %v5308_v60, %v5307_v57 }
 0x314   : > { %v2698_v43 = vadd.f32 %v5232_v33, %v8348_v54  ;;  %v5233_v0 = vpop.f32.mrb[124].mxu1 }
 0x315   : > { %v5310_v19 = vpop.f32.mrb[138].mxu0  ;;  %v8393_v28 = vadd.f32 %v5309_v29, %v2693_v27  ;;  %v5234_v11 = vpop.f32.mrb[125].mxu1 }
 0x316   : > { %v5311_v15 = vpop.f32.mrb[139].mxu0  ;;  %v5235_v42 = vadd.f32 %v5234_v11, %v5233_v0 }
 0x317   : > { %v5312_v22 = vadd.f32 %v5311_v15, %v5310_v19 }
 0x318   : > { %v2703_v25 = vadd.f32 %v5235_v42, %v8351_v24  ;;  %v5236_v16 = vpop.f32.mrb[126].mxu1 }
 0x319   : > { %v5313_v7 = vpop.f32.mrb[140].mxu0  ;;  %v8396_v36 = vadd.f32 %v5312_v22, %v2698_v43  ;;  %v5237_v32 = vpop.f32.mrb[127].mxu1 }
 0x31a   : > { %v5314_v12 = vpop.f32.mrb[141].mxu0  ;;  %v5238_v53 = vadd.f32 %v5237_v32, %v5236_v16 }
 0x31b   : > { %v5315_v14 = vadd.f32 %v5314_v12, %v5313_v7 }
 0x31c   : > { %v2708_v54 = vadd.f32 %v5238_v53, %v8354_v56  ;;  %v5825_v35 = vpop.f32.mrb[128].mxu1 }
 0x31d   : > { %v5316_v46 = vpop.f32.mrb[142].mxu0  ;;  %v8399_v30 = vadd.f32 %v5315_v14, %v2703_v25  ;;  %v2928_v1 = vadd.f32 %v5825_v35, %v8360_v55  ;;  %v2922_v3 = vpop.f32.mrb[129].mxu1 }
 0x31e   : > { %v5317_v58 = vpop.f32.mrb[143].mxu0  ;;  %v2923_v24 = vadd.f32 %v2922_v3, %v8357_v18  ;;  %v8516_v3 = vld [vmem:[%s9140_s3 + $0x298] sm:$0xff] }
 0x31f   : > { %v5318_v51 = vadd.f32 %v5317_v58, %v5316_v46  ;;  %vm3002_vm0 = vcmp.ge.f32.partialorder %v2928_v1, 0.0  ;;  %v3022_v63 = vmul.f32 %v8405_v34, %v2928_v1  ;;  %v8492_v58 = vld [vmem:[%s9140_s3 + $0x200] sm:$0xff] }
 0x320   : > { %vm3001_vm1 = vcmp.ge.f32.partialorder %v2923_v24, 0.0  ;;  %v3021_v21 = vmul.f32 %v8405_v34, %v2923_v24  ;;  %v5828_v56 = vpop.f32.mrb[130].mxu1 }
 0x321   : > { %v8409_v10 = vadd.f32 %v5318_v51, %v2708_v54  ;;  %v8413_v50 = vsel %vm3002_vm0, %v2928_v1, %v3022_v63  ;;  %v2938_v49 = vadd.f32 %v5828_v56, %v8366_v38  ;;  %v2932_v20 = vpop.f32.mrb[131].mxu1  ;;  %v8511_v1 = vld [vmem:[%s9140_s3 + $0x290] sm:$0xff]  ;;  %vm4557_vm0 = vcmask 261120  }
 0x322   : > { %v3072_v41 = vrot.slane %v8413_v50, 7  ;;  %3152 = vst [vmem:[#allocation2 + $0xa7] sm:$0x1] %v8413_v50  ;;  %v3168_v18 = vrot.slane %v8413_v50, 1  ;;  %3247 = vst [vmem:[#allocation2 + $0x68] sm:$0xff] %v8413_v50  ;;  %v8423_v55 = vsel %vm3001_vm1, %v2923_v24, %v3021_v21  ;;  %v2933_v4 = vadd.f32 %v2932_v20, %v8363_v23  ;;  %v8532_v20 = vld [vmem:[%s9140_s3 + $0x218] sm:$0xff] }
 0x323   : > { %3263 = vst [vmem:[#allocation2 + $0x77] sm:$0x1] %v8413_v50  ;;  %3326 = vst [vmem:[#allocation2 + $0x38] sm:$0xff] %v8413_v50  ;;  %v3071_v38 = vrot.slane %v8423_v55, 7  ;;  %v3167_v52 = vrot.slane %v8423_v55, 1  ;;  %vm3004_vm2 = vcmp.ge.f32.partialorder %v2938_v49, 0.0  ;;  %v3024_v44 = vmul.f32 %v8405_v34, %v2938_v49 }
 0x324   : > { %3342 = vst [vmem:[#allocation2 + $0x47] sm:$0x1] %v8413_v50  ;;  %3151 = vst [vmem:[#allocation2 + $0x5f] sm:$0x1] %v8423_v55  ;;  %vm3003_vm3 = vcmp.ge.f32.partialorder %v2933_v4, 0.0  ;;  %v3023_v23 = vmul.f32 %v8405_v34, %v2933_v4  ;;  %v5831_v9 = vpop.f32.mrb[132].mxu1 }
 0x325   : > { %3246 = vst [vmem:[#allocation2 + $0x20] sm:$0xff] %v8423_v55  ;;  %3262 = vst [vmem:[#allocation2 + $0x2f] sm:$0x1] %v8423_v55  ;;  %v8436_v47 = vsel %vm3004_vm2, %v2938_v49, %v3024_v44  ;;  %v2948_v40 = vadd.f32 %v5831_v9, %v8372_v26  ;;  %v2942_v17 = vpop.f32.mrb[133].mxu1  ;;  %v8527_v49 = vld [vmem:[%s9140_s3 + $0x210] sm:$0xff] }
 0x326   : > { %3333 = vst [vmem:[#allocation2 + $0x230] sm:$0xff] %v8423_v55  ;;  %3349 = vst [vmem:[#allocation2 + $0x23f] sm:$0x1] %v8423_v55  ;;  %v3074_v13 = vrot.slane %v8436_v47, 7  ;;  %v3170_v61 = vrot.slane %v8436_v47, 1  ;;  %v8447_v57 = vsel %vm3003_vm3, %v2933_v4, %v3023_v23  ;;  %v2943_v26 = vadd.f32 %v2942_v17, %v8369_v31  ;;  %v8558_v44 = vld [vmem:[%s9140_s3 + $0x390] sm:$0xff] }
 0x327   : > { %3200 = vst [vmem:[#allocation2 + $0xa0] sm:$0x7f] %v3168_v18  ;;  %3279 = vst [vmem:[#allocation2 + $0x70] sm:$0x7f] %v3168_v18  ;;  %v3073_v37 = vrot.slane %v8447_v57, 7  ;;  %v3169_v60 = vrot.slane %v8447_v57, 1  ;;  %v3026_v48 = vmul.f32 %v8405_v34, %v2948_v40 }
 0x328   : > { %3358 = vst [vmem:[#allocation2 + $0x40] sm:$0x7f] %v3168_v18  ;;  %3104 = vst [vmem:[#allocation2 + $0x90] sm:$0xff] %v3072_v41   ;;  %vm3006_vm4 = vcmp.ge.f32.partialorder %v2948_v40, 0.0  ;;  %vm3005_vm5 = vcmp.ge.f32.partialorder %v2943_v26, 0.0  ;;  %v3025_v31 = vmul.f32 %v8405_v34, %v2943_v26  ;;  %v5834_v29 = vpop.f32.mrb[134].mxu1 }
 0x329   : > { %3215 = vst [vmem:[#allocation2 + $0x60] sm:$0xff] %v3072_v41   ;;  %3294 = vst [vmem:[#allocation2 + $0x30] sm:$0xff] %v3072_v41   ;;  %v8460_v27 = vsel %vm3006_vm4, %v2948_v40, %v3026_v48  ;;  %v2958_v59 = vadd.f32 %v5834_v29, %v8378_v45  ;;  %v2952_v19 = vpop.f32.mrb[135].mxu1  ;;  %v8537_v41 = vld [vmem:[%s9140_s3 + $0x300] sm:$0xff]  ;;  %v8563_v23 = vld [vmem:[%s9140_s3 + $0x398] sm:$0xff] }
 0x32a   : > { %3199 = vst [vmem:[#allocation2 + $0x58] sm:$0x7f] %v3167_v52  ;;  %3278 = vst [vmem:[#allocation2 + $0x28] sm:$0x7f] %v3167_v52  ;;  %v3076_v5 = vrot.slane %v8460_v27, 7  ;;  %v3172_v15 = vrot.slane %v8460_v27, 1  ;;  %v8471_v33 = vsel %vm3005_vm5, %v2943_v26, %v3025_v31  ;;  %v2953_v45 = vadd.f32 %v2952_v19, %v8375_v2 }
 0x32b   : > { %3365 = vst [vmem:[#allocation2 + $0x238] sm:$0x7f] %v3167_v52  ;;  %3103 = vst [vmem:[#allocation2 + $0x48] sm:$0xff] %v3071_v38   ;;  %v3075_v22 = vrot.slane %v8471_v33, 7  ;;  %v3171_v43 = vrot.slane %v8471_v33, 1  ;;  %vm3008_vm6 = vcmp.ge.f32.partialorder %v2958_v59, 0.0  ;;  %v3028_v0 = vmul.f32 %v8405_v34, %v2958_v59 }
 0x32c   : > { %3214 = vst [vmem:[#allocation2 + $0x18] sm:$0xff] %v3071_v38   ;;  %3301 = vst [vmem:[#allocation2 + $0x228] sm:$0xff] %v3071_v38   ;;  %vm3007_vm7 = vcmp.ge.f32.partialorder %v2953_v45, 0.0  ;;  %v3027_v2 = vmul.f32 %v8405_v34, %v2953_v45  ;;  %v5837_v7 = vpop.f32.mrb[136].mxu1  ;;  %v8553_v52 = vld [vmem:[%s9140_s3 + $0x308] sm:$0xff]  ;;  %v6349_v26 = vpack.c.bf16 %v8532_v20, %v8527_v49  ;;  %v6379_v19 = vpack.c.bf16 %v8563_v23, %v8558_v44  ;;  %v8707_v44 = vld [vmem:[%s9140_s3 + $0x3b8] sm:$0xff] }
 0x32d   : > { %3154 = vst [vmem:[#allocation2 + $0x137] sm:$0x1] %v8436_v47  ;;  %3249 = vst [vmem:[#allocation2 + $0xf8] sm:$0xff] %v8436_v47  ;;  %v3044_v12 = vsel %vm3008_vm6, %v2958_v59, %v3028_v0  ;;  %v2968_v42 = vadd.f32 %v5837_v7, %v8384_v6  ;;  %v2962_v14 = vpop.f32.mrb[137].mxu1  ;;  %v8497_v6 = vld [vmem:[%s9140_s3 + $0x208] sm:$0xff]  ;;  %v6377_v59 = vpack.c.bf16 %v8553_v52, %v8537_v41  ;;  %v8619_v0 = vld [vmem:[%s9140_s3 + $0x3a0] sm:$0xff] }
 0x32e   : > { %3265 = vst [vmem:[#allocation2 + $0x107] sm:$0x1] %v8436_v47  ;;  %3328 = vst [vmem:[#allocation2 + $0xc8] sm:$0xff] %v8436_v47  ;;  %v3070_v25 = vrot.slane %v3044_v12, 7  ;;  %v3166_v16 = vrot.slane %v3044_v12, 1  ;;  %v8486_v46 = vsel %vm3007_vm7, %v2953_v45, %v3027_v2  ;;  %v2963_v32 = vadd.f32 %v2962_v14, %v8381_v62  ;;  %3730 = vmatprep.mubr.f32.mxu0 %v3044_v12  ;;  %v8590_v29 = vld [vmem:[%s9140_s3 + $0x2a8] sm:$0xff] }
 0x32f   : > { %3344 = vst [vmem:[#allocation2 + $0xd7] sm:$0x1] %v8436_v47  ;;  %3153 = vst [vmem:[#allocation2 + $0xef] sm:$0x1] %v8447_v57  ;;  %v3077_v53 = vrot.slane %v8486_v46, 7  ;;  %v3173_v51 = vrot.slane %v8486_v46, 1  ;;  %v3030_v62 = vmul.f32 %v8405_v34, %v2968_v42  ;;  %v6345_v56 = vpack.c.bf16 %v8497_v6, %v8492_v58 }
 0x330   : > { %3248 = vst [vmem:[#allocation2 + $0xb0] sm:$0xff] %v8447_v57  ;;  %3264 = vst [vmem:[#allocation2 + $0xbf] sm:$0x1] %v8447_v57  ;;  %vm3010_vm8 = vcmp.ge.f32.partialorder %v2968_v42, 0.0  ;;  %vm3009_vm9 = vcmp.ge.f32.partialorder %v2963_v32, 0.0  ;;  %v3029_v54 = vmul.f32 %v8405_v34, %v2963_v32  ;;  %v5840_v35 = vpop.f32.mrb[138].mxu1 }
 0x331   : > { %3327 = vst [vmem:[#allocation2 + $0x80] sm:$0xff] %v8447_v57  ;;  %3343 = vst [vmem:[#allocation2 + $0x8f] sm:$0x1] %v8447_v57  ;;  %v8519_v24 = vsel %vm3010_vm8, %v2968_v42, %v3030_v62  ;;  %v2978_v63 = vadd.f32 %v5840_v35, %v8390_v39  ;;  %v2972_v21 = vpop.f32.mrb[139].mxu1  ;;  %v8624_v2 = vld [vmem:[%s9140_s3 + $0x3a8] sm:$0xff]  ;;  %v8645_v35 = vld [vmem:[%s9140_s3 + $0x220] sm:$0xff] }
 0x332   : > { %3202 = vst [vmem:[#allocation2 + $0x130] sm:$0x7f] %v3170_v61  ;;  %3281 = vst [vmem:[#allocation2 + $0x100] sm:$0x7f] %v3170_v61  ;;  %v3080_v39 = vrot.slane %v8519_v24, 7  ;;  %v3176_v18 = vrot.slane %v8519_v24, 1  ;;  %v8547_v4 = vsel %vm3009_vm9, %v2963_v32, %v3029_v54  ;;  %v2973_v38 = vadd.f32 %v2972_v21, %v8387_v8 }
 0x333   : > { %3360 = vst [vmem:[#allocation2 + $0xd0] sm:$0x7f] %v3170_v61  ;;  %3106 = vst [vmem:[#allocation2 + $0x120] sm:$0xff] %v3074_v13   ;;  %v3377_v11 = vld [vmem:[#allocation2 + $0x18] sm:$0xff]  ;;  %v3079_v9 = vrot.slane %v8547_v4, 7  ;;  %v3175_v8 = vrot.slane %v8547_v4, 1  ;;  %v3032_v40 = vmul.f32 %v8405_v34, %v2978_v63  ;;  %v6347_v61 = vpack.c.bf16 %v8516_v3, %v8511_v1 }
 0x334   : > { %3217 = vst [vmem:[#allocation2 + $0xf0] sm:$0xff] %v3074_v13   ;;  %3296 = vst [vmem:[#allocation2 + $0xc0] sm:$0xff] %v3074_v13   ;;  %3875 = vmatprep.mubr.f32.mxu1 %v3377_v11  ;;  %vm3012_vm10 = vcmp.ge.f32.partialorder %v2978_v63, 0.0  ;;  %vm3011_vm11 = vcmp.ge.f32.partialorder %v2973_v38, 0.0  ;;  %v3031_v17 = vmul.f32 %v8405_v34, %v2973_v38  ;;  %v5843_v13 = vpop.f32.mrb[140].mxu1  ;;  %v6383_v21 = vpack.c.bf16 %v8624_v2, %v8619_v0  ;;  %v8679_v52 = vld [vmem:[%s9140_s3 + $0x320] sm:$0xff] }
 0x335   : > { %3201 = vst [vmem:[#allocation2 + $0xe8] sm:$0x7f] %v3169_v60  ;;  %3280 = vst [vmem:[#allocation2 + $0xb8] sm:$0x7f] %v3169_v60  ;;  %v2988_v48 = vadd.f32 %v5843_v13, %v8396_v36  ;;  %v2982_v31 = vpop.f32.mrb[141].mxu1  ;;  %v8604_v36 = vld [vmem:[%s9140_s3 + $0x318] sm:$0xff] }
 0x336   : > { %3359 = vst [vmem:[#allocation2 + $0x88] sm:$0x7f] %v3169_v60  ;;  %3105 = vst [vmem:[#allocation2 + $0xd8] sm:$0xff] %v3073_v37   ;;  %v8584_v60 = vsel %vm3012_vm10, %v2978_v63, %v3032_v40  ;;  %v8650_v63 = vld [vmem:[%s9140_s3 + $0x228] sm:$0xff]  ;;  %v8702_v3 = vld [vmem:[%s9140_s3 + $0x3b0] sm:$0xff] }
 0x337   : > { %3216 = vst [vmem:[#allocation2 + $0xa8] sm:$0xff] %v3073_v37   ;;  %3295 = vst [vmem:[#allocation2 + $0x78] sm:$0xff] %v3073_v37   ;;  %v8581_v37 = vld [vmem:[%s9140_s3 + $0x2a0] sm:$0xff]  ;;  %v3178_v45 = vrot.slane %v8584_v60, 1  ;;  %vm3014_vm12 = vcmp.ge.f32.partialorder %v2988_v48, 0.0  ;;  %v6353_v23 = vpack.c.bf16 %v8650_v63, %v8645_v35  ;;  %v8723_v13 = vld [vmem:[%s9140_s3 + $0x238] sm:$0xff] }
 0x338   : > { %3156 = vst [vmem:[#allocation2 + $0x1c7] sm:$0x1] %v8460_v27  ;;  %3251 = vst [vmem:[#allocation2 + $0x188] sm:$0xff] %v8460_v27  ;;  %v6351_v32 = vpack.c.bf16 %v8590_v29, %v8581_v37  ;;  %v3620_v49 = vld [vmem:[%s9140_s3 + $0x330] sm:$0xff]  ;;  %v3638_v29 = vld [vmem:[%s9140_s3 + $0x3c0] sm:$0xff] }
 0x339   : > { %3267 = vst [vmem:[#allocation2 + $0x197] sm:$0x1] %v8460_v27  ;;  %3330 = vst [vmem:[#allocation2 + $0x158] sm:$0xff] %v8460_v27  ;;  %v3639_v0 = vld [vmem:[%s9140_s3 + $0x3c8] sm:$0xff]  ;;  %v3590_v2 = vld [vmem:[%s9140_s3 + $0x240] sm:$0xff] }
 0x33a   : > { %3346 = vst [vmem:[#allocation2 + $0x167] sm:$0x1] %v8460_v27  ;;  %3155 = vst [vmem:[#allocation2 + $0x17f] sm:$0x1] %v8471_v33  ;;  %v3641_v35 = vld [vmem:[%s9140_s3 + $0x3d8] sm:$0xff]  ;;  %v3592_v63 = vld [vmem:[%s9140_s3 + $0x250] sm:$0xff] }
 0x33b   : > { %3250 = vst [vmem:[#allocation2 + $0x140] sm:$0xff] %v8471_v33  ;;  %3266 = vst [vmem:[#allocation2 + $0x14f] sm:$0x1] %v8471_v33  ;;  %v3404_v37 = vld [vmem:[#allocation2 + $0xf0] sm:$0xff] }
 0x33c   : > { %3329 = vst [vmem:[#allocation2 + $0x110] sm:$0xff] %v8471_v33  ;;  %3345 = vst [vmem:[#allocation2 + $0x11f] sm:$0x1] %v8471_v33 }
 0x33d   : > { %3204 = vst [vmem:[#allocation2 + $0x1c0] sm:$0x7f] %v3172_v15  ;;  %3283 = vst [vmem:[#allocation2 + $0x190] sm:$0x7f] %v3172_v15 }
 0x33e   : > { %3362 = vst [vmem:[#allocation2 + $0x160] sm:$0x7f] %v3172_v15  ;;  %3108 = vst [vmem:[#allocation2 + $0x1b0] sm:$0xff] %v3076_v5   ;;  %v3082_v15 = vrot.slane %v8584_v60, 7  ;;  %v3395_v1 = vld [vmem:[#allocation2 + $0xa8] sm:$0xff] }
 0x33f   : > { %3219 = vst [vmem:[#allocation2 + $0x180] sm:$0xff] %v3076_v5   ;;  %3298 = vst [vmem:[#allocation2 + $0x150] sm:$0xff] %v3076_v5   ;;  %v8599_v5 = vld [vmem:[%s9140_s3 + $0x310] sm:$0xff] }
 0x340   : > { %3203 = vst [vmem:[#allocation2 + $0x178] sm:$0x7f] %v3171_v43  ;;  %3282 = vst [vmem:[#allocation2 + $0x148] sm:$0x7f] %v3171_v43 }
 0x341   : > { %3361 = vst [vmem:[#allocation2 + $0x118] sm:$0x7f] %v3171_v43  ;;  %3107 = vst [vmem:[#allocation2 + $0x168] sm:$0xff] %v3075_v22   ;;  %v2983_v43 = vadd.f32 %v2982_v31, %v8393_v28  ;;  %v3034_v28 = vmul.f32 %v8405_v34, %v2988_v48  ;;  %v8739_v31 = vld [vmem:[%s9140_s3 + $0x2c0] sm:$0xff] }
 0x342   : > { %3218 = vst [vmem:[#allocation2 + $0x138] sm:$0xff] %v3075_v22   ;;  %3297 = vst [vmem:[#allocation2 + $0x108] sm:$0xff] %v3075_v22   ;;  %v8613_v22 = vsel %vm3011_vm11, %v2973_v38, %v3031_v17  ;;  %v8674_v38 = vld [vmem:[%s9140_s3 + $0x2b8] sm:$0xff]  ;;  %v8718_v17 = vld [vmem:[%s9140_s3 + $0x230] sm:$0xff] }
 0x343   : > { %3150 = vst [vmem:[#allocation2 + $0x17] sm:$0x1] %v3044_v12  ;;  %3253 = vst [vmem:[#allocation2 + $0x218] sm:$0xff] %v3044_v12  ;;  %v3081_v7 = vrot.slane %v8613_v22, 7  ;;  %v3177_v11 = vrot.slane %v8613_v22, 1  ;;  %vm3013_vm13 = vcmp.ge.f32.partialorder %v2983_v43, 0.0  ;;  %v3033_v14 = vmul.f32 %v8405_v34, %v2983_v43 }
 0x344   : > { %3269 = vst [vmem:[#allocation2 + $0x227] sm:$0x1] %v3044_v12  ;;  %3332 = vst [vmem:[#allocation2 + $0x1e8] sm:$0xff] %v3044_v12 }
 0x345   : > { %3348 = vst [vmem:[#allocation2 + $0x1f7] sm:$0x1] %v3044_v12  ;;  %3157 = vst [vmem:[#allocation2 + $0x20f] sm:$0x1] %v8486_v46 }
 0x346   : > { %3252 = vst [vmem:[#allocation2 + $0x1d0] sm:$0xff] %v8486_v46  ;;  %3268 = vst [vmem:[#allocation2 + $0x1df] sm:$0x1] %v8486_v46 }
 0x347   : > { %3331 = vst [vmem:[#allocation2 + $0x1a0] sm:$0xff] %v8486_v46  ;;  %3347 = vst [vmem:[#allocation2 + $0x1af] sm:$0x1] %v8486_v46 }
 0x348   : > { %3198 = vst [vmem:[#allocation2 + $0x10] sm:$0x7f] %v3166_v16  ;;  %3285 = vst [vmem:[#allocation2 + $0x220] sm:$0x7f] %v3166_v16 }
 0x349   : > { %3364 = vst [vmem:[#allocation2 + $0x1f0] sm:$0x7f] %v3166_v16  ;;  %3102 = vst [vmem:[#allocation2] sm:$0xff] %v3070_v25   ;;  %v3386_v16 = vld [vmem:[#allocation2 + $0x60] sm:$0xff] }
 0x34a   : > { %3221 = vst [vmem:[#allocation2 + $0x210] sm:$0xff] %v3070_v25   ;;  %3300 = vst [vmem:[#allocation2 + $0x1e0] sm:$0xff] %v3070_v25   ;;  %v5846_v25 = vpop.f32.mrb[142].mxu1 }
 0x34b   : > { %3205 = vst [vmem:[#allocation2 + $0x208] sm:$0x7f] %v3173_v51  ;;  %3284 = vst [vmem:[#allocation2 + $0x1d8] sm:$0x7f] %v3173_v51  ;;  %v2998_v62 = vadd.f32 %v5846_v25, %v8409_v10  ;;  %v2992_v54 = vpop.f32.mrb[143].mxu1  ;;  %v3403_v25 = vld [vmem:[#allocation2 + $0xe8] sm:$0xff] }
 0x34c   : > { %3363 = vst [vmem:[#allocation2 + $0x1a8] sm:$0x7f] %v3173_v51  ;;  %3109 = vst [vmem:[#allocation2 + $0x1f8] sm:$0xff] %v3077_v53   ;;  %v8638_v51 = vsel %vm3014_vm12, %v2988_v48, %v3034_v28  ;;  %v3608_v28 = vld [vmem:[%s9140_s3 + $0x2d0] sm:$0xff] }
 0x34d   : > { %3220 = vst [vmem:[#allocation2 + $0x1c8] sm:$0xff] %v3077_v53   ;;  %3299 = vst [vmem:[#allocation2 + $0x198] sm:$0xff] %v3077_v53   ;;  %v6381_v53 = vpack.c.bf16 %v8604_v36, %v8599_v5  ;;  %v3084_v41 = vrot.slane %v8638_v51, 7  ;;  %v3180_v10 = vrot.slane %v8638_v51, 1  ;;  %vm3016_vm14 = vcmp.ge.f32.partialorder %v2998_v62, 0.0  ;;  %v3394_v5 = vld [vmem:[#allocation2 + $0xa0] sm:$0xff] }
 0x34e   : > { %3160 = vst [vmem:[#allocation2 + $0x2e7] sm:$0x1] %v8519_v24  ;;  %3255 = vst [vmem:[#allocation2 + $0x2a8] sm:$0xff] %v8519_v24  ;;  %v3036_v6 = vmul.f32 %v8405_v34, %v2998_v62 }
 0x34f   : > { %3271 = vst [vmem:[#allocation2 + $0x2b7] sm:$0x1] %v8519_v24  ;;  %3334 = vst [vmem:[#allocation2 + $0x278] sm:$0xff] %v8519_v24  ;;  %v3376_v42 = vld [vmem:[#allocation2 + $0x10] sm:$0xff] }
 0x350   : > { %3350 = vst [vmem:[#allocation2 + $0x287] sm:$0x1] %v8519_v24  ;;  %3159 = vst [vmem:[#allocation2 + $0x29f] sm:$0x1] %v8547_v4  ;;  %v3374_v12 = vld [vmem:[#allocation2] sm:$0xff]  ;;  %3876 = vmatmul.mubr.f32.vlgmr.msra.gmra.mrb[144].mxu1 %v3376_v42 }
 0x351   : > { %3254 = vst [vmem:[#allocation2 + $0x260] sm:$0xff] %v8547_v4  ;;  %3270 = vst [vmem:[#allocation2 + $0x26f] sm:$0x1] %v8547_v4  ;;  %3731 = vmatmul.mubr.f32.vlgmr.msra.gmra.mrb[144].mxu0 %v3374_v12  ;;  %3880 = vmatprep.mubr.f32.mxu1 %v3386_v16  ;;  %v3622_v42 = vld [vmem:[%s9140_s3 + $0x340] sm:$0xff] }
 0x352   : > { %3341 = vst [vmem:[#allocation2 + $0x470] sm:$0xff] %v8547_v4  ;;  %3357 = vst [vmem:[#allocation2 + $0x47f] sm:$0x1] %v8547_v4  ;;  %3735 = vmatprep.mubr.f32.mxu0 %v8423_v55  ;;  %v8660_v55 = vsel %vm3013_vm13, %v2983_v43, %v3033_v14  ;;  %6346 = vmatpush3.bf16.msra.mxu0 %v6345_v56  ;;  %v3383_v56 = vld [vmem:[#allocation2 + $0x48] sm:$0xff]  ;;  %v3621_v43 = vld [vmem:[%s9140_s3 + $0x338] sm:$0xff] }
 0x353   : > { %3208 = vst [vmem:[#allocation2 + $0x2e0] sm:$0x7f] %v3176_v18  ;;  %3287 = vst [vmem:[#allocation2 + $0x2b0] sm:$0x7f] %v3176_v18  ;;  %6378 = vmatpush3.bf16.msra.mxu1 %v6377_v59  ;;  %v3179_v58 = vrot.slane %v8660_v55, 1  ;;  %6348 = vmatprep.subr.bf16.mxu0 %v6347_v61  ;;  %v8744_v59 = vld [vmem:[%s9140_s3 + $0x2c8] sm:$0xff]  ;;  %v6389_v12 = vpack.c.bf16 %v3621_v43, %v3620_v49 }
 0x354   : > { %3366 = vst [vmem:[#allocation2 + $0x280] sm:$0x7f] %v3176_v18  ;;  %3112 = vst [vmem:[#allocation2 + $0x2d0] sm:$0xff] %v3080_v39   ;;  %v8669_v18 = vld [vmem:[%s9140_s3 + $0x2b0] sm:$0xff]  ;;  %6380 = vmatprep.subr.bf16.mxu1 %v6379_v19  ;;  %v3401_v14 = vld [vmem:[#allocation2 + $0xd8] sm:$0xff]  ;;  %v6359_v16 = vpack.c.bf16 %v8744_v59, %v8739_v31 }
 0x355   : > { %3223 = vst [vmem:[#allocation2 + $0x2a0] sm:$0xff] %v3080_v39   ;;  %3302 = vst [vmem:[#allocation2 + $0x270] sm:$0xff] %v3080_v39   ;;  %v2993_v39 = vadd.f32 %v2992_v54, %v8399_v30  ;;  %v3083_v30 = vrot.slane %v8660_v55, 7  ;;  %3736 = vmatmul.mubr.f32.gmra.mrb[146].mxu0 %v3383_v56  ;;  %v6355_v36 = vpack.c.bf16 %v8674_v38, %v8669_v18  ;;  %v3640_v54 = vld [vmem:[%s9140_s3 + $0x3d0] sm:$0xff]  ;;  %v3410_v38 = vld [vmem:[#allocation2 + $0x120] sm:$0xff] }
 0x356   : > { %3207 = vst [vmem:[#allocation2 + $0x298] sm:$0x7f] %v3175_v8  ;;  %3286 = vst [vmem:[#allocation2 + $0x268] sm:$0x7f] %v3175_v8  ;;  %3740 = vmatprep.mubr.f32.mxu0 %v8413_v50  ;;  %6350 = vmatpush3.bf16.msra.mxu0 %v6349_v26  ;;  %v3624_v18 = vld [vmem:[%s9140_s3 + $0x350] sm:$0xff]  ;;  %v3422_v56 = vld [vmem:[#allocation2 + $0x180] sm:$0xff] }
 0x357   : > { %3373 = vst [vmem:[#allocation2 + $0x478] sm:$0x7f] %v3175_v8  ;;  %3111 = vst [vmem:[#allocation2 + $0x288] sm:$0xff] %v3079_v9   ;;  %v8696_v8 = vld [vmem:[%s9140_s3 + $0x328] sm:$0xff]  ;;  %vm3015_vm15 = vcmp.ge.f32.partialorder %v2993_v39, 0.0  ;;  %v3035_v40 = vmul.f32 %v8405_v34, %v2993_v39  ;;  %v8710_v34 = vsel %vm3016_vm14, %v2998_v62, %v3036_v6  ;;  %6382 = vmatpush3.bf16.msra.mxu1 %v6381_v53  ;;  %6352 = vmatprep.subr.bf16.mxu0 %v6351_v32  ;;  %v3413_v62 = vld [vmem:[#allocation2 + $0x138] sm:$0xff] }
 0x358   : > { %3222 = vst [vmem:[#allocation2 + $0x258] sm:$0xff] %v3079_v9   ;;  %3309 = vst [vmem:[#allocation2 + $0x468] sm:$0xff] %v3079_v9   ;;  %v3385_v9 = vld [vmem:[#allocation2 + $0x58] sm:$0xff]  ;;  %v3078_v61 = vrot.slane %v8710_v34, 7  ;;  %v3174_v50 = vrot.slane %v8710_v34, 1  ;;  %v6385_v19 = vpack.c.bf16 %v8696_v8, %v8679_v52  ;;  %6384 = vmatprep.subr.bf16.mxu1 %v6383_v21  ;;  %v6391_v32 = vpack.c.bf16 %v3639_v0, %v3638_v29  ;;  %v3623_v53 = vld [vmem:[%s9140_s3 + $0x348] sm:$0xff] }
 0x359   : > { %3162 = vst [vmem:[#allocation2 + $0x377] sm:$0x1] %v8584_v60  ;;  %3257 = vst [vmem:[#allocation2 + $0x338] sm:$0xff] %v8584_v60  ;;  %3881 = vmatmul.mubr.f32.gmra.mrb[146].mxu1 %v3385_v9  ;;  %v8731_v48 = vsel %vm3015_vm15, %v2993_v39, %v3035_v40  ;;  %v3593_v21 = vld [vmem:[%s9140_s3 + $0x258] sm:$0xff]  ;;  %v6393_v39 = vpack.c.bf16 %v3623_v53, %v3622_v42  ;;  %v3412_v52 = vld [vmem:[#allocation2 + $0x130] sm:$0xff] }
 0x35a   : > { %3273 = vst [vmem:[#allocation2 + $0x347] sm:$0x1] %v8584_v60  ;;  %3352 = vst [vmem:[#allocation2 + $0x317] sm:$0x1] %v8584_v60  ;;  %3885 = vmatprep.mubr.f32.mxu1 %v3395_v1  ;;  %v3085_v20 = vrot.slane %v8731_v48, 7  ;;  %v3181_v26 = vrot.slane %v8731_v48, 1  ;;  %6354 = vmatpush3.bf16.msra.mxu0 %v6353_v23 }
 0x35b   : > { %3161 = vst [vmem:[#allocation2 + $0x32f] sm:$0x1] %v8613_v22  ;;  %3272 = vst [vmem:[#allocation2 + $0x2ff] sm:$0x1] %v8613_v22  ;;  %6386 = vmatpush3.bf16.msra.mxu1 %v6385_v19  ;;  %6356 = vmatprep.subr.bf16.mxu0 %v6355_v36  ;;  %v3625_v6 = vld [vmem:[%s9140_s3 + $0x358] sm:$0xff]  ;;  %v3642_v9 = vld [vmem:[%s9140_s3 + $0x3e0] sm:$0xff] }
 0x35c   : > { %3351 = vst [vmem:[#allocation2 + $0x2cf] sm:$0x1] %v8613_v22  ;;  %3210 = vst [vmem:[#allocation2 + $0x370] sm:$0x7f] %v3178_v45  ;;  %v3643_v8 = vld [vmem:[%s9140_s3 + $0x3e8] sm:$0xff]  ;;  %v3594_v40 = vld [vmem:[%s9140_s3 + $0x260] sm:$0xff] }
 0x35d   : > { %3289 = vst [vmem:[#allocation2 + $0x340] sm:$0x7f] %v3178_v45  ;;  %3368 = vst [vmem:[#allocation2 + $0x310] sm:$0x7f] %v3178_v45  ;;  %v6387_v45 = vpack.c.bf16 %v8707_v44, %v8702_v3  ;;  %3886 = vmatmul.mubr.f32.gmra.mrb[148].mxu1 %v3394_v5  ;;  %v3595_v1 = vld [vmem:[%s9140_s3 + $0x268] sm:$0xff]  ;;  %v6365_v3 = vpack.c.bf16 %v3593_v21, %v3592_v63  ;;  %v6397_v44 = vpack.c.bf16 %v3625_v6, %v3624_v18  ;;  %v3612_v23 = vld [vmem:[%s9140_s3 + $0x2f0] sm:$0xff] }
 0x35e   : > { %3114 = vst [vmem:[#allocation2 + $0x360] sm:$0xff] %v3082_v15   ;;  %3225 = vst [vmem:[#allocation2 + $0x330] sm:$0xff] %v3082_v15   ;;  %3890 = vmatprep.mubr.f32.mxu1 %v3404_v37  ;;  %v6399_v31 = vpack.c.bf16 %v3643_v8, %v3642_v9  ;;  %v3627_v59 = vld [vmem:[%s9140_s3 + $0x368] sm:$0xff]  ;;  %v3644_v49 = vld [vmem:[%s9140_s3 + $0x3f0] sm:$0xff] }
 0x35f   : > { %3304 = vst [vmem:[#allocation2 + $0x300] sm:$0xff] %v3082_v15   ;;  %3209 = vst [vmem:[#allocation2 + $0x328] sm:$0x7f] %v3177_v11  ;;  %v3392_v15 = vld [vmem:[#allocation2 + $0x90] sm:$0xff]  ;;  %6388 = vmatprep.subr.bf16.mxu1 %v6387_v45  ;;  %v3431_v19 = vld [vmem:[#allocation2 + $0x1c8] sm:$0xff] }
 0x360   : > { %3288 = vst [vmem:[#allocation2 + $0x2f8] sm:$0x7f] %v3177_v11  ;;  %3367 = vst [vmem:[#allocation2 + $0x2c8] sm:$0x7f] %v3177_v11  ;;  %3741 = vmatmul.mubr.f32.gmra.mrb[148].mxu0 %v3392_v15  ;;  %v6357_v11 = vpack.c.bf16 %v8723_v13, %v8718_v17  ;;  %6390 = vmatpush3.bf16.msra.mxu1 %v6389_v12  ;;  %v3626_v17 = vld [vmem:[%s9140_s3 + $0x360] sm:$0xff]  ;;  %v3419_v13 = vld [vmem:[#allocation2 + $0x168] sm:$0xff] }
 0x361   : > { %3113 = vst [vmem:[#allocation2 + $0x318] sm:$0xff] %v3081_v7   ;;  %3224 = vst [vmem:[#allocation2 + $0x2e8] sm:$0xff] %v3081_v7   ;;  %3745 = vmatprep.mubr.f32.mxu0 %v8447_v57  ;;  %v3609_v57 = vld [vmem:[%s9140_s3 + $0x2d8] sm:$0xff]  ;;  %3891 = vmatmul.mubr.f32.gmra.mrb[150].mxu1 %v3403_v25  ;;  %v3596_v15 = vld [vmem:[%s9140_s3 + $0x270] sm:$0xff]  ;;  %v6401_v36 = vpack.c.bf16 %v3627_v59, %v3626_v17 }
 0x362   : > { %3303 = vst [vmem:[#allocation2 + $0x2b8] sm:$0xff] %v3081_v7   ;;  %3164 = vst [vmem:[#allocation2 + $0x407] sm:$0x1] %v8638_v51  ;;  %v3591_v7 = vld [vmem:[%s9140_s3 + $0x248] sm:$0xff]  ;;  %3895 = vmatprep.mubr.f32.mxu1 %v3413_v62  ;;  %6358 = vmatpush3.bf16.msra.mxu0 %v6357_v11  ;;  %v3597_v5 = vld [vmem:[%s9140_s3 + $0x278] sm:$0xff] }
 0x363   : > { %3275 = vst [vmem:[#allocation2 + $0x3d7] sm:$0x1] %v8638_v51  ;;  %3354 = vst [vmem:[#allocation2 + $0x3a7] sm:$0x1] %v8638_v51  ;;  %6360 = vmatprep.subr.bf16.mxu0 %v6359_v16  ;;  %6392 = vmatprep.subr.bf16.mxu1 %v6391_v32  ;;  %v3628_v45 = vld [vmem:[%s9140_s3 + $0x370] sm:$0xff]  ;;  %v3430_v37 = vld [vmem:[#allocation2 + $0x1c0] sm:$0xff] }
 0x364   : > { %3163 = vst [vmem:[#allocation2 + $0x3bf] sm:$0x1] %v8660_v55  ;;  %3274 = vst [vmem:[#allocation2 + $0x38f] sm:$0x1] %v8660_v55  ;;  %3746 = vmatmul.mubr.f32.gmra.mrb[150].mxu0 %v3401_v14  ;;  %6394 = vmatpush3.bf16.msra.mxu1 %v6393_v39  ;;  %v3428_v43 = vld [vmem:[#allocation2 + $0x1b0] sm:$0xff]  ;;  %v3629_v0 = vld [vmem:[%s9140_s3 + $0x378] sm:$0xff] }
 0x365   : > { %3353 = vst [vmem:[#allocation2 + $0x35f] sm:$0x1] %v8660_v55  ;;  %3212 = vst [vmem:[#allocation2 + $0x400] sm:$0x7f] %v3180_v10  ;;  %3750 = vmatprep.mubr.f32.mxu0 %v8436_v47  ;;  %v3611_v47 = vld [vmem:[%s9140_s3 + $0x2e8] sm:$0xff]  ;;  %3896 = vmatmul.mubr.f32.gmra.mrb[152].mxu1 %v3412_v52  ;;  %v3437_v12 = vld [vmem:[#allocation2 + $0x1f8] sm:$0xff] }
 0x366   : > { %3291 = vst [vmem:[#allocation2 + $0x3d0] sm:$0x7f] %v3180_v10  ;;  %3370 = vst [vmem:[#allocation2 + $0x3a0] sm:$0x7f] %v3180_v10  ;;  %v3610_v10 = vld [vmem:[%s9140_s3 + $0x2e0] sm:$0xff]  ;;  %3900 = vmatprep.mubr.f32.mxu1 %v3422_v56  ;;  %v3647_v11 = vld [vmem:[%s9140_s3 + $0x408] sm:$0xff] }
 0x367   : > { %3116 = vst [vmem:[#allocation2 + $0x3f0] sm:$0xff] %v3084_v41   ;;  %3227 = vst [vmem:[#allocation2 + $0x3c0] sm:$0xff] %v3084_v41   ;;  %v3439_v42 = vld [vmem:[#allocation2 + $0x208] sm:$0xff]  ;;  %v3449_v25 = vld [vmem:[#allocation2 + $0x258] sm:$0xff] }
 0x368   : > { %3306 = vst [vmem:[#allocation2 + $0x390] sm:$0xff] %v3084_v41   ;;  %3211 = vst [vmem:[#allocation2 + $0x3b8] sm:$0x7f] %v3179_v58  ;;  %v6361_v41 = vpack.c.bf16 %v3591_v7, %v3590_v2  ;;  %3751 = vmatmul.mubr.f32.gmra.mrb[152].mxu0 %v3410_v38  ;;  %v3440_v2 = vld [vmem:[#allocation2 + $0x210] sm:$0xff]  ;;  %v3646_v7 = vld [vmem:[%s9140_s3 + $0x400] sm:$0xff] }
 0x369   : > { %3290 = vst [vmem:[#allocation2 + $0x388] sm:$0x7f] %v3179_v58  ;;  %3369 = vst [vmem:[#allocation2 + $0x358] sm:$0x7f] %v3179_v58  ;;  %v6395_v58 = vpack.c.bf16 %v3641_v35, %v3640_v54  ;;  %3755 = vmatprep.mubr.f32.mxu0 %v8471_v33  ;;  %v3613_v33 = vld [vmem:[%s9140_s3 + $0x2f8] sm:$0xff]  ;;  %v8877_v14 = vpack.c.bf16 %v3647_v11, %v3646_v7  ;;  %v3458_v32 = vld [vmem:[#allocation2 + $0x2a0] sm:$0xff] }
 0x36a   : > { %3115 = vst [vmem:[#allocation2 + $0x3a8] sm:$0xff] %v3083_v30   ;;  %3226 = vst [vmem:[#allocation2 + $0x378] sm:$0xff] %v3083_v30   ;;  %6362 = vmatpush3.bf16.msra.mxu0 %v6361_v41  ;;  %v3455_v53 = vld [vmem:[#allocation2 + $0x288] sm:$0xff]  ;;  %v3457_v62 = vld [vmem:[#allocation2 + $0x298] sm:$0xff] }
 0x36b   : > { %3305 = vst [vmem:[#allocation2 + $0x348] sm:$0xff] %v3083_v30   ;;  %3158 = vst [vmem:[#allocation2 + $0x257] sm:$0x1] %v8710_v34  ;;  %v6363_v30 = vpack.c.bf16 %v3609_v57, %v3608_v28  ;;  %6396 = vmatprep.subr.bf16.mxu1 %v6395_v58  ;;  %v6373_v28 = vpack.c.bf16 %v3597_v5, %v3596_v15  ;;  %v6405_v57 = vpack.c.bf16 %v3629_v0, %v3628_v45  ;;  %v3467_v54 = vld [vmem:[#allocation2 + $0x2e8] sm:$0xff]  ;;  %v3464_v35 = vld [vmem:[#allocation2 + $0x2d0] sm:$0xff] }
 0x36c   : > { %3277 = vst [vmem:[#allocation2 + $0x467] sm:$0x1] %v8710_v34  ;;  %3356 = vst [vmem:[#allocation2 + $0x437] sm:$0x1] %v8710_v34  ;;  %3756 = vmatmul.mubr.f32.gmra.mrb[154].mxu0 %v3419_v13  ;;  %6398 = vmatpush3.bf16.msra.mxu1 %v6397_v44  ;;  %v3466_v63 = vld [vmem:[#allocation2 + $0x2e0] sm:$0xff]  ;;  %v3476_v21 = vld [vmem:[#allocation2 + $0x330] sm:$0xff] }
 0x36d   : > { %3165 = vst [vmem:[#allocation2 + $0x44f] sm:$0x1] %v8731_v48  ;;  %3276 = vst [vmem:[#allocation2 + $0x41f] sm:$0x1] %v8731_v48  ;;  %6364 = vmatprep.subr.bf16.mxu0 %v6363_v30  ;;  %3760 = vmatprep.mubr.f32.mxu0 %v8460_v27  ;;  %v6371_v27 = vpack.c.bf16 %v3613_v33, %v3612_v23  ;;  %v3473_v41 = vld [vmem:[#allocation2 + $0x318] sm:$0xff]  ;;  %v3484_v39 = vld [vmem:[#allocation2 + $0x370] sm:$0xff] }
 0x36e   : > { %3355 = vst [vmem:[#allocation2 + $0x3ef] sm:$0x1] %v8731_v48  ;;  %3206 = vst [vmem:[#allocation2 + $0x250] sm:$0x7f] %v3174_v50  ;;  %6366 = vmatpush3.bf16.msra.mxu0 %v6365_v3  ;;  %6400 = vmatprep.subr.bf16.mxu1 %v6399_v31  ;;  %v3500_v30 = vld [vmem:[#allocation2 + $0x3f0] sm:$0xff]  ;;  %v3502_v58 = vld [vmem:[#allocation2 + $0x400] sm:$0xff] }
 0x36f   : > { %3293 = vst [vmem:[#allocation2 + $0x460] sm:$0x7f] %v3174_v50  ;;  %3372 = vst [vmem:[#allocation2 + $0x430] sm:$0x7f] %v3174_v50  ;;  %v6367_v50 = vpack.c.bf16 %v3611_v47, %v3610_v10  ;;  %v3475_v10 = vld [vmem:[#allocation2 + $0x328] sm:$0xff]  ;;  %v3482_v47 = vld [vmem:[#allocation2 + $0x360] sm:$0xff] }
 0x370   : > { %3110 = vst [vmem:[#allocation2 + $0x240] sm:$0xff] %v3078_v61   ;;  %3229 = vst [vmem:[#allocation2 + $0x450] sm:$0xff] %v3078_v61   ;;  %3761 = vmatmul.mubr.f32.gmra.mrb[156].mxu0 %v3428_v43  ;;  %6402 = vmatpush3.bf16.msra.mxu1 %v6401_v36  ;;  %v3493_v38 = vld [vmem:[#allocation2 + $0x3b8] sm:$0xff]  ;;  %v3648_v8 = vld [vmem:[%s9140_s3 + $0x410] sm:$0xff] }
 0x371   : > { %3308 = vst [vmem:[#allocation2 + $0x420] sm:$0xff] %v3078_v61   ;;  %3213 = vst [vmem:[#allocation2 + $0x448] sm:$0x7f] %v3181_v26  ;;  %v3421_v61 = vld [vmem:[#allocation2 + $0x178] sm:$0xff]  ;;  %6368 = vmatprep.subr.bf16.mxu0 %v6367_v50  ;;  %3765 = vmatprep.mubr.f32.mxu0 %v8486_v46  ;;  %v3491_v18 = vld [vmem:[#allocation2 + $0x3a8] sm:$0xff] }
 0x372   : > { %3292 = vst [vmem:[#allocation2 + $0x418] sm:$0x7f] %v3181_v26  ;;  %3371 = vst [vmem:[#allocation2 + $0x3e8] sm:$0x7f] %v3181_v26  ;;  %3901 = vmatmul.mubr.f32.gmra.mrb[154].mxu1 %v3421_v61  ;;  %v6369_v26 = vpack.c.bf16 %v3595_v1, %v3594_v40  ;;  %v3379_v40 = vld [vmem:[#allocation2 + $0x28] sm:$0xff]  ;;  %v3381_v1 = vld [vmem:[#allocation2 + $0x38] sm:$0xff] }
 0x373   : > { %3117 = vst [vmem:[#allocation2 + $0x438] sm:$0xff] %v3085_v20   ;;  %3228 = vst [vmem:[#allocation2 + $0x408] sm:$0xff] %v3085_v20   ;;  %3905 = vmatprep.mubr.f32.mxu1 %v3431_v19  ;;  %v3649_v3 = vld [vmem:[%s9140_s3 + $0x418] sm:$0xff]  ;;  %v3378_v44 = vld [vmem:[#allocation2 + $0x20] sm:$0xff] }
 0x374   : > { %3307 = vst [vmem:[#allocation2 + $0x3d8] sm:$0xff] %v3085_v20   ;;  %v3645_v20 = vld [vmem:[%s9140_s3 + $0x3f8] sm:$0xff]  ;;  %6370 = vmatpush3.bf16.msra.mxu0 %v6369_v26  ;;  %v3380_v23 = vld [vmem:[#allocation2 + $0x30] sm:$0xff]  ;;  %v6411_v33 = vpack.c.bf16 %v3649_v3, %v3648_v8  ;;  %v3650_v17 = vld [vmem:[%s9140_s3 + $0x420] sm:$0xff] }
 0x375   : > { %v6403_v29 = vpack.c.bf16 %v3645_v20, %v3644_v49  ;;  %6372 = vmatprep.subr.bf16.mxu0 %v6371_v27  ;;  %3766 = vmatmul.mubr.f32.gmra.mrb[158].mxu0 %v3437_v12  ;;  %v3448_v16 = vld [vmem:[#allocation2 + $0x250] sm:$0xff]  ;;  %v3390_v61 = vld [vmem:[#allocation2 + $0x80] sm:$0xff]  ;;  %v3651_v50 = vld [vmem:[%s9140_s3 + $0x428] sm:$0xff] }
 0x376   : > { %3906 = vmatmul.mubr.f32.gmra.mrb[156].mxu1 %v3430_v37  ;;  %3770 = vmatprep.mubr.f32.mxu0 %v8710_v34  ;;  %v3388_v13 = vld [vmem:[#allocation2 + $0x70] sm:$0xff]  ;;  %v3387_v31 = vld [vmem:[#allocation2 + $0x68] sm:$0xff]  ;;  %v3389_v59 = vld [vmem:[#allocation2 + $0x78] sm:$0xff]  ;;  %v6415_v19 = vpack.c.bf16 %v3651_v50, %v3650_v17 }
 0x377   : > { %3910 = vmatprep.mubr.f32.mxu1 %v3440_v2  ;;  %6404 = vmatprep.subr.bf16.mxu1 %v6403_v29  ;;  %v3446_v46 = vld [vmem:[#allocation2 + $0x240] sm:$0xff]  ;;  %v3512_v6 = vld [vmem:[#allocation2 + $0x450] sm:$0xff]  ;;  %v3397_v20 = vld [vmem:[#allocation2 + $0xb8] sm:$0xff] }
 0x378   : > { %6374 = vmatpush3.bf16.msra.mxu0 %v6373_v28  ;;  %6406 = vmatpush3.bf16.msra.mxu1 %v6405_v57  ;;  %v3511_v9 = vld [vmem:[#allocation2 + $0x448] sm:$0xff]  ;;  %v3652_v49 = vld [vmem:[%s9140_s3 + $0x430] sm:$0xff]  ;;  %v3653_v15 = vld [vmem:[%s9140_s3 + $0x438] sm:$0xff] }
 0x379   : > { %6408 = vmatprep.subr.bf16.mxu0 %v8877_v14  ;;  %3771 = vmatmul.mubr.f32.gmra.mrb[160].mxu0 %v3446_v46  ;;  %v3399_v26 = vld [vmem:[#allocation2 + $0xc8] sm:$0xff]  ;;  %v3396_v5 = vld [vmem:[#allocation2 + $0xb0] sm:$0xff]  ;;  %v3398_v36 = vld [vmem:[#allocation2 + $0xc0] sm:$0xff]  ;;  %v6419_v45 = vpack.c.bf16 %v3653_v15, %v3652_v49 }
 0x37a   : > { %3911 = vmatmul.mubr.f32.gmra.mrb[158].mxu1 %v3439_v42  ;;  %3775 = vmatprep.mubr.f32.mxu0 %v8547_v4  ;;  %v3485_v4 = vld [vmem:[#allocation2 + $0x378] sm:$0xff]  ;;  %v3503_v52 = vld [vmem:[#allocation2 + $0x408] sm:$0xff]  ;;  %v3654_v43 = vld [vmem:[%s9140_s3 + $0x440] sm:$0xff] }
 0x37b   : > { %3915 = vmatprep.mubr.f32.mxu1 %v3449_v25  ;;  %v3509_v56 = vld [vmem:[#allocation2 + $0x438] sm:$0xff]  ;;  %v3406_v37 = vld [vmem:[#allocation2 + $0x100] sm:$0xff]  ;;  %v3408_v27 = vld [vmem:[#allocation2 + $0x110] sm:$0xff] }
 0x37c   : > { %v3655_v29 = vld [vmem:[%s9140_s3 + $0x448] sm:$0xff]  ;;  %v3405_v0 = vld [vmem:[#allocation2 + $0xf8] sm:$0xff]  ;;  %v3656_v11 = vld [vmem:[%s9140_s3 + $0x450] sm:$0xff] }
 0x37d   : > { %3776 = vmatmul.mubr.f32.gmra.mrb[162].mxu0 %v3455_v53  ;;  %v3407_v2 = vld [vmem:[#allocation2 + $0x108] sm:$0xff]  ;;  %v6423_v7 = vpack.c.bf16 %v3655_v29, %v3654_v43  ;;  %v3417_v57 = vld [vmem:[#allocation2 + $0x158] sm:$0xff]  ;;  %v3414_v42 = vld [vmem:[#allocation2 + $0x140] sm:$0xff] }
 0x37e   : > { %3916 = vmatmul.mubr.f32.gmra.mrb[160].mxu1 %v3448_v16  ;;  %3780 = vmatprep.mubr.f32.mxu0 %v8519_v24  ;;  %v3494_v24 = vld [vmem:[#allocation2 + $0x3c0] sm:$0xff]  ;;  %v3415_v28 = vld [vmem:[#allocation2 + $0x148] sm:$0xff]  ;;  %v3657_v12 = vld [vmem:[%s9140_s3 + $0x458] sm:$0xff] }
 0x37f   : > { %3920 = vmatprep.mubr.f32.mxu1 %v3458_v32  ;;  %v6427_v25 = vpack.c.bf16 %v3657_v12, %v3656_v11  ;;  %v3658_v46 = vld [vmem:[%s9140_s3 + $0x460] sm:$0xff]  ;;  %v3424_v16 = vld [vmem:[#allocation2 + $0x190] sm:$0xff]  ;;  %v3659_v53 = vld [vmem:[%s9140_s3 + $0x468] sm:$0xff] }
 0x380   : > { %v3426_v32 = vld [vmem:[#allocation2 + $0x1a0] sm:$0xff]  ;;  %v3459_v8 = vld [vmem:[#allocation2 + $0x2a8] sm:$0xff]  ;;  %v3400_v49 = vld [vmem:[#allocation2 + $0xd0] sm:$0xff] }
 0x381   : > { %3781 = vmatmul.mubr.f32.gmra.mrb[164].mxu0 %v3464_v35  ;;  %v3433_v35 = vld [vmem:[#allocation2 + $0x1d8] sm:$0xff]  ;;  %v3470_v3 = vld [vmem:[#allocation2 + $0x300] sm:$0xff]  ;;  %v3487_v17 = vld [vmem:[#allocation2 + $0x388] sm:$0xff] }
 0x382   : > { %3921 = vmatmul.mubr.f32.gmra.mrb[162].mxu1 %v3457_v62  ;;  %3785 = vmatprep.mubr.f32.mxu0 %v8613_v22  ;;  %v3423_v62 = vld [vmem:[#allocation2 + $0x188] sm:$0xff]  ;;  %v3506_v50 = vld [vmem:[#allocation2 + $0x420] sm:$0xff]  ;;  %v3436_v15 = vld [vmem:[#allocation2 + $0x1f0] sm:$0xff] }
 0x383   : > { %3925 = vmatprep.mubr.f32.mxu1 %v3467_v54  ;;  %v3425_v54 = vld [vmem:[#allocation2 + $0x198] sm:$0xff]  ;;  %v3508_v29 = vld [vmem:[#allocation2 + $0x430] sm:$0xff] }
 0x384   : > { %v3481_v43 = vld [vmem:[#allocation2 + $0x358] sm:$0xff] }
 0x385   : > { %3786 = vmatmul.mubr.f32.gmra.mrb[166].mxu0 %v3473_v41  ;;  %v3660_v41 = vld [vmem:[%s9140_s3 + $0x470] sm:$0xff] }
 0x386   : > { %3926 = vmatmul.mubr.f32.gmra.mrb[164].mxu1 %v3466_v63  ;;  %3790 = vmatprep.mubr.f32.mxu0 %v8584_v60  ;;  %v6431_v63 = vpack.c.bf16 %v3659_v53, %v3658_v46  ;;  %v4397_v46 = vld [vmem:[%s9141_s4 + $0x30] sm:$0xff]  ;;  %v4399_v53 = vld [vmem:[%s9141_s4 + $0x40] sm:$0xff] }
 0x387   : > { %3930 = vmatprep.mubr.f32.mxu1 %v3476_v21  ;;  %v3435_v21 = vld [vmem:[#allocation2 + $0x1e8] sm:$0xff] }
 0x389   : > { %3791 = vmatmul.mubr.f32.gmra.mrb[168].mxu0 %v3482_v47  ;;  %v3434_v47 = vld [vmem:[#allocation2 + $0x1e0] sm:$0xff] }
 0x38a   : > { %3931 = vmatmul.mubr.f32.gmra.mrb[166].mxu1 %v3475_v10  ;;  %3795 = vmatprep.mubr.f32.mxu0 %v8660_v55  ;;  %v3661_v10 = vld [vmem:[%s9140_s3 + $0x478] sm:$0xff] }
 0x38b   : > { %3935 = vmatprep.mubr.f32.mxu1 %v3485_v4  ;;  %v3432_v4 = vld [vmem:[#allocation2 + $0x1d0] sm:$0xff] }
 0x38d   : > { %3796 = vmatmul.mubr.f32.gmra.mrb[170].mxu0 %v3491_v18  ;;  %v3444_v18 = vld [vmem:[#allocation2 + $0x230] sm:$0xff] }
 0x38e   : > { %3936 = vmatmul.mubr.f32.gmra.mrb[168].mxu1 %v3484_v39  ;;  %3800 = vmatprep.mubr.f32.mxu0 %v8638_v51  ;;  %v6435_v39 = vpack.c.bf16 %v3661_v10, %v3660_v41  ;;  %v4403_v41 = vld [vmem:[%s9141_s4 + $0x60] sm:$0xff]  ;;  %v4404_v10 = vld [vmem:[%s9141_s4 + $0x68] sm:$0xff] }
 0x38f   : > { %3940 = vmatprep.mubr.f32.mxu1 %v3494_v24  ;;  %v3442_v24 = vld [vmem:[#allocation2 + $0x220] sm:$0xff] }
 0x391   : > { %3801 = vmatmul.mubr.f32.gmra.mrb[172].mxu0 %v3500_v30  ;;  %v3451_v30 = vld [vmem:[#allocation2 + $0x268] sm:$0xff] }
 0x392   : > { %3941 = vmatmul.mubr.f32.gmra.mrb[170].mxu1 %v3493_v38  ;;  %3805 = vmatprep.mubr.f32.mxu0 %v8731_v48  ;;  %v3441_v38 = vld [vmem:[#allocation2 + $0x218] sm:$0xff] }
 0x393   : > { %3945 = vmatprep.mubr.f32.mxu1 %v3503_v52  ;;  %v3443_v52 = vld [vmem:[#allocation2 + $0x228] sm:$0xff] }
 0x395   : > { %3806 = vmatmul.mubr.f32.gmra.mrb[174].mxu0 %v3509_v56  ;;  %v3452_v56 = vld [vmem:[#allocation2 + $0x270] sm:$0xff] }
 0x396   : > { %3946 = vmatmul.mubr.f32.gmra.mrb[172].mxu1 %v3502_v58  ;;  %4020 = vmatprep.mubr.f32.mxu0 %v3379_v40  ;;  %v3453_v58 = vld [vmem:[#allocation2 + $0x278] sm:$0xff] }
 0x397   : > { %3950 = vmatprep.mubr.f32.mxu1 %v3512_v6  ;;  %v3450_v6 = vld [vmem:[#allocation2 + $0x260] sm:$0xff]  ;;  %v3461_v40 = vld [vmem:[#allocation2 + $0x2b8] sm:$0xff] }
 0x399   : > { %4021 = vmatmul.mubr.f32.vlgmr.msra.gmra.mrb[176].mxu0 %v3378_v44  ;;  %v3478_v44 = vld [vmem:[#allocation2 + $0x340] sm:$0xff] }
 0x39a   : > { %3951 = vmatmul.mubr.f32.gmra.mrb[174].mxu1 %v3511_v9  ;;  %4025 = vmatprep.mubr.f32.mxu0 %v3388_v13  ;;  %v3460_v9 = vld [vmem:[#allocation2 + $0x2b0] sm:$0xff] }
 0x39b   : > { %4165 = vmatprep.mubr.f32.mxu1 %v3381_v1  ;;  %6410 = vmatpush3.bf16.msra.mxu0 %v8877_v14  ;;  %v3416_v14 = vld [vmem:[#allocation2 + $0x150] sm:$0xff]  ;;  %v3469_v1 = vld [vmem:[#allocation2 + $0x2f8] sm:$0xff] }
 0x39c   : > { %6412 = vmatprep.subr.bf16.mxu0 %v6411_v33  ;;  %v3488_v13 = vld [vmem:[#allocation2 + $0x390] sm:$0xff] }
 0x39d   : > { %4026 = vmatmul.mubr.f32.gmra.mrb[178].mxu0 %v3387_v31  ;;  %v3514_v31 = vld [vmem:[#allocation2 + $0x460] sm:$0xff] }
 0x39e   : > { %4166 = vmatmul.mubr.f32.vlgmr.msra.gmra.mrb[176].mxu1 %v3380_v23  ;;  %4030 = vmatprep.mubr.f32.mxu0 %v3397_v20  ;;  %v3477_v23 = vld [vmem:[#allocation2 + $0x338] sm:$0xff] }
 0x39f   : > { %4170 = vmatprep.mubr.f32.mxu1 %v3390_v61  ;;  %6414 = vmatpush3.bf16.msra.mxu0 %v6411_v33  ;;  %v3479_v33 = vld [vmem:[#allocation2 + $0x348] sm:$0xff]  ;;  %v3505_v61 = vld [vmem:[#allocation2 + $0x418] sm:$0xff] }
 0x3a0   : > { %6416 = vmatprep.subr.bf16.mxu0 %v6415_v19  ;;  %v3409_v20 = vld [vmem:[#allocation2 + $0x118] sm:$0xff] }
 0x3a1   : > { %4031 = vmatmul.mubr.f32.gmra.mrb[180].mxu0 %v3396_v5  ;;  %v3445_v5 = vld [vmem:[#allocation2 + $0x238] sm:$0xff] }
 0x3a2   : > { %4171 = vmatmul.mubr.f32.gmra.mrb[178].mxu1 %v3389_v59  ;;  %4035 = vmatprep.mubr.f32.mxu0 %v3406_v37  ;;  %v3516_v59 = vld [vmem:[#allocation2 + $0x470] sm:$0xff]  ;;  %v3490_v37 = vld [vmem:[#allocation2 + $0x3a0] sm:$0xff] }
 0x3a3   : > { %4175 = vmatprep.mubr.f32.mxu1 %v3399_v26  ;;  %6418 = vmatpush3.bf16.msra.mxu0 %v6415_v19  ;;  %v3382_v19 = vld [vmem:[#allocation2 + $0x40] sm:$0xff] }
 0x3a4   : > { %6420 = vmatprep.subr.bf16.mxu0 %v6419_v45  ;;  %v3418_v26 = vld [vmem:[#allocation2 + $0x160] sm:$0xff] }
 0x3a5   : > { %4036 = vmatmul.mubr.f32.gmra.mrb[182].mxu0 %v3405_v0  ;;  %v3517_v0 = vld [vmem:[#allocation2 + $0x478] sm:$0xff] }
 0x3a6   : > { %4176 = vmatmul.mubr.f32.gmra.mrb[180].mxu1 %v3398_v36  ;;  %4040 = vmatprep.mubr.f32.mxu0 %v3415_v28  ;;  %v3454_v36 = vld [vmem:[#allocation2 + $0x280] sm:$0xff]  ;;  %v4393_v28 = vld [vmem:[%s9141_s4 + $0x10] sm:$0xff] }
 0x3a7   : > { %4180 = vmatprep.mubr.f32.mxu1 %v3408_v27  ;;  %6422 = vmatpush3.bf16.msra.mxu0 %v6419_v45  ;;  %v3472_v45 = vld [vmem:[#allocation2 + $0x310] sm:$0xff]  ;;  %v3499_v27 = vld [vmem:[#allocation2 + $0x3e8] sm:$0xff] }
 0x3a8   : > { %6424 = vmatprep.subr.bf16.mxu0 %v6423_v7 }
 0x3a9   : > { %4041 = vmatmul.mubr.f32.gmra.mrb[184].mxu0 %v3414_v42  ;;  %v4395_v42 = vld [vmem:[%s9141_s4 + $0x20] sm:$0xff] }
 0x3aa   : > { %4181 = vmatmul.mubr.f32.gmra.mrb[182].mxu1 %v3407_v2  ;;  %4045 = vmatprep.mubr.f32.mxu0 %v3424_v16  ;;  %v4391_v2 = vld [vmem:[%s9141_s4] sm:$0xff]  ;;  %v4398_v16 = vld [vmem:[%s9141_s4 + $0x38] sm:$0xff] }
 0x3ab   : > { %4185 = vmatprep.mubr.f32.mxu1 %v3417_v57  ;;  %6426 = vmatpush3.bf16.msra.mxu0 %v6423_v7  ;;  %v4392_v7 = vld [vmem:[%s9141_s4 + $0x8] sm:$0xff]  ;;  %v4394_v57 = vld [vmem:[%s9141_s4 + $0x18] sm:$0xff] }
 0x3ac   : > { %6428 = vmatprep.subr.bf16.mxu0 %v6427_v25  ;;  %v6439_v11 = vpack.c.bf16 %v4392_v7, %v4391_v2  ;;  %v6443_v12 = vpack.c.bf16 %v4394_v57, %v4393_v28 }
 0x3ad   : > { %4046 = vmatmul.mubr.f32.gmra.mrb[186].mxu0 %v3423_v62  ;;  %v4400_v62 = vld [vmem:[%s9141_s4 + $0x48] sm:$0xff] }
 0x3ae   : > { %4186 = vmatmul.mubr.f32.gmra.mrb[184].mxu1 %v3416_v14  ;;  %4050 = vmatprep.mubr.f32.mxu0 %v3433_v35  ;;  %v4396_v14 = vld [vmem:[%s9141_s4 + $0x28] sm:$0xff]  ;;  %v4401_v35 = vld [vmem:[%s9141_s4 + $0x50] sm:$0xff] }
 0x3af   : > { %4190 = vmatprep.mubr.f32.mxu1 %v3426_v32  ;;  %6430 = vmatpush3.bf16.msra.mxu0 %v6427_v25  ;;  %v6447_v25 = vpack.c.bf16 %v4396_v14, %v4395_v42  ;;  %v6451_v32 = vpack.c.bf16 %v4398_v16, %v4397_v46 }
 0x3b0   : > { %6432 = vmatprep.subr.bf16.mxu0 %v6431_v63  ;;  %6440 = vmatprep.subr.bf16.mxu1 %v6439_v11 }
 0x3b1   : > { %4051 = vmatmul.mubr.f32.gmra.mrb[188].mxu0 %v3432_v4  ;;  %6442 = vmatpush3.bf16.msra.mxu1 %v6439_v11  ;;  %v6463_v4 = vpack.c.bf16 %v4404_v10, %v4403_v41 }
 0x3b2   : > { %4191 = vmatmul.mubr.f32.gmra.mrb[186].mxu1 %v3425_v54  ;;  %4055 = vmatprep.mubr.f32.mxu0 %v3442_v24  ;;  %v6455_v54 = vpack.c.bf16 %v4400_v62, %v4399_v53  ;;  %v4405_v24 = vld [vmem:[%s9141_s4 + $0x70] sm:$0xff] }
 0x3b3   : > { %4195 = vmatprep.mubr.f32.mxu1 %v3435_v21  ;;  %6434 = vmatpush3.bf16.msra.mxu0 %v6431_v63  ;;  %v4402_v63 = vld [vmem:[%s9141_s4 + $0x58] sm:$0xff] }
 0x3b4   : > { %6436 = vmatprep.subr.bf16.mxu0 %v6435_v39  ;;  %6444 = vmatprep.subr.bf16.mxu1 %v6443_v12  ;;  %v6459_v21 = vpack.c.bf16 %v4402_v63, %v4401_v35 }
 0x3b5   : > { %4056 = vmatmul.mubr.f32.gmra.mrb[190].mxu0 %v3441_v38  ;;  %6446 = vmatpush3.bf16.msra.mxu1 %v6443_v12  ;;  %v8993_v38 = vld [vmem:[%s9142_s5 + $0x4] ss:$0 sm:$0xff] }
 0x3b6   : > { %4196 = vmatmul.mubr.f32.gmra.mrb[188].mxu1 %v3434_v47  ;;  %4060 = vmatprep.mubr.f32.mxu0 %v3451_v30 }
 0x3b7   : > { %4200 = vmatprep.mubr.f32.mxu1 %v3444_v18  ;;  %6438 = vmatpush3.bf16.msra.mxu0 %v6435_v39  ;;  %v4406_v18 = vld [vmem:[%s9141_s4 + $0x78] sm:$0xff] }
 0x3b8   : > { %6448 = vmatprep.subr.bf16.mxu1 %v6447_v25 }
 0x3b9   : > { %4061 = vmatmul.mubr.f32.gmra.mrb[192].mxu0 %v3450_v6  ;;  %6450 = vmatpush3.bf16.msra.mxu1 %v6447_v25 }
 0x3ba   : > { %4201 = vmatmul.mubr.f32.gmra.mrb[190].mxu1 %v3443_v52  ;;  %4065 = vmatprep.mubr.f32.mxu0 %v3460_v9 }
 0x3bb   : > { %4205 = vmatprep.mubr.f32.mxu1 %v3453_v58  ;;  %6452 = vmatprep.subr.bf16.mxu1 %v6451_v32  ;;  %v6467_v58 = vpack.c.bf16 %v4406_v18, %v4405_v24 }
 0x3bd   : > { %4066 = vmatmul.mubr.f32.gmra.mrb[194].mxu0 %v3459_v8  ;;  %6454 = vmatpush3.bf16.msra.mxu1 %v6451_v32 }
 0x3be   : > { %4206 = vmatmul.mubr.f32.gmra.mrb[192].mxu1 %v3452_v56  ;;  %4070 = vmatprep.mubr.f32.mxu0 %v3469_v1 }
 0x3bf   : > { %4210 = vmatprep.mubr.f32.mxu1 %v8613_v22  ;;  %6456 = vmatprep.subr.bf16.mxu1 %v6455_v54 }
 0x3c1   : > { %4071 = vmatmul.mubr.f32.gmra.mrb[196].mxu0 %v8613_v22  ;;  %v3497_v22 = vld [vmem:[#allocation2 + $0x3d8] sm:$0xff]  ;;  %6458 = vmatpush3.bf16.msra.mxu1 %v6455_v54 }
 0x3c2   : > { %4211 = vmatmul.mubr.f32.gmra.mrb[194].mxu1 %v3461_v40  ;;  %4075 = vmatprep.mubr.f32.mxu0 %v3478_v44 }
 0x3c3   : > { %4215 = vmatprep.mubr.f32.mxu1 %v8584_v60  ;;  %v3496_v60 = vld [vmem:[#allocation2 + $0x3d0] sm:$0xff]  ;;  %6460 = vmatprep.subr.bf16.mxu1 %v6459_v21 }
 0x3c5   : > { %4076 = vmatmul.mubr.f32.gmra.mrb[198].mxu0 %v3477_v23  ;;  %6462 = vmatpush3.bf16.msra.mxu1 %v6459_v21 }
 0x3c6   : > { %4216 = vmatmul.mubr.f32.gmra.mrb[196].mxu1 %v3470_v3  ;;  %4080 = vmatprep.mubr.f32.mxu0 %v3487_v17 }
 0x3c7   : > { %4220 = vmatprep.mubr.f32.mxu1 %v8660_v55  ;;  %6464 = vmatprep.subr.bf16.mxu1 %v6463_v4 }
 0x3c9   : > { %4081 = vmatmul.mubr.f32.gmra.mrb[200].mxu0 %v8660_v55  ;;  %v3515_v55 = vld [vmem:[#allocation2 + $0x468] sm:$0xff]  ;;  %6466 = vmatpush3.bf16.msra.mxu1 %v6463_v4 }
 0x3ca   : > { %4221 = vmatmul.mubr.f32.gmra.mrb[198].mxu1 %v3479_v33  ;;  %4085 = vmatprep.mubr.f32.mxu0 %v3496_v60 }
 0x3cb   : > { %4225 = vmatprep.mubr.f32.mxu1 %v8638_v51  ;;  %6468 = vmatprep.subr.bf16.mxu1 %v6467_v58 }
 0x3cd   : > { %4086 = vmatmul.mubr.f32.gmra.mrb[202].mxu0 %v8638_v51  ;;  %v3391_v51 = vld [vmem:[#allocation2 + $0x88] sm:$0xff]  ;;  %6470 = vmatpush3.bf16.msra.mxu1 %v6467_v58 }
 0x3ce   : > { %4226 = vmatmul.mubr.f32.gmra.mrb[200].mxu1 %v3488_v13  ;;  %4090 = vmatprep.mubr.f32.mxu0 %v3505_v61 }
 0x3cf   : > { %4230 = vmatprep.mubr.f32.mxu1 %v8731_v48 }
 0x3d1   : > { %4091 = vmatmul.mubr.f32.gmra.mrb[204].mxu0 %v8731_v48  ;;  %v3427_v48 = vld [vmem:[#allocation2 + $0x1a8] sm:$0xff] }
 0x3d2   : > { %4231 = vmatmul.mubr.f32.gmra.mrb[202].mxu1 %v3497_v22  ;;  %4095 = vmatprep.mubr.f32.mxu0 %v3514_v31 }
 0x3d3   : > { %4235 = vmatprep.mubr.f32.mxu1 %v8710_v34 }
 0x3d5   : > { %4096 = vmatmul.mubr.f32.gmra.mrb[206].mxu0 %v8710_v34  ;;  %v3463_v34 = vld [vmem:[#allocation2 + $0x2c8] sm:$0xff] }
 0x3d6   : > { %4236 = vmatmul.mubr.f32.gmra.mrb[204].mxu1 %v3506_v50  ;;  %5879 = vmatprep.mubr.f32.mxu0 %v3382_v19 }
 0x3d7   : > { %4240 = vmatprep.mubr.f32.mxu1 %v3516_v59 }
 0x3d9   : > { %5880 = vmatmul.mubr.f32.vlgmr.msra.gmra.mrb[208].mxu0 %v3391_v51 }
 0x3da   : > { %4241 = vmatmul.mubr.f32.gmra.mrb[206].mxu1 %v3515_v55  ;;  %5882 = vmatprep.mubr.f32.mxu0 %v3400_v49 }
 0x3dd   : > { %5883 = vmatmul.mubr.f32.gmra.mrb[210].mxu0 %v3409_v20 }
 0x3de   : > { %5885 = vmatprep.mubr.f32.mxu0 %v3418_v26 }
 0x3e1   : > { %5886 = vmatmul.mubr.f32.gmra.mrb[212].mxu0 %v3427_v48 }
 0x3e2   : > { %5888 = vmatprep.mubr.f32.mxu0 %v3436_v15 }
 0x3e5   : > { %5889 = vmatmul.mubr.f32.gmra.mrb[214].mxu0 %v3445_v5 }
 0x3e6   : > { %5891 = vmatprep.mubr.f32.mxu0 %v3454_v36 }
 0x3e9   : > { %5892 = vmatmul.mubr.f32.gmra.mrb[216].mxu0 %v3463_v34 }
 0x3ea   : > { %5894 = vmatprep.mubr.f32.mxu0 %v3472_v45 }
 0x3ed   : > { %5895 = vmatmul.mubr.f32.gmra.mrb[218].mxu0 %v3481_v43 }
 0x3ee   : > { %5897 = vmatprep.mubr.f32.mxu0 %v3490_v37 }
 0x3f1   : > { %5898 = vmatmul.mubr.f32.gmra.mrb[220].mxu0 %v3499_v27 }
 0x3f2   : > { %5900 = vmatprep.mubr.f32.mxu0 %v3508_v29 }
 0x3f5   : > { %5901 = vmatmul.mubr.f32.gmra.mrb[222].mxu0 %v3517_v0 }
 0x423   : > { %v5463_v39 = vpop.f32.mrb[144].mxu1 }
 0x424   : > { %v5383_v47 = vpop.f32.mrb[144].mxu0  ;;  %v5464_v30 = vpop.f32.mrb[145].mxu1 }
 0x425   : > { %v5384_v52 = vpop.f32.mrb[145].mxu0  ;;  %v5465_v56 = vadd.f32 %v5464_v30, %v5463_v39 }
 0x426   : > { %v5385_v6 = vadd.f32 %v5384_v52, %v5383_v47 }
 0x428   : > { %v3733_v9 = vadd.f32 %v5385_v6, %v8993_v38  ;;  %v5386_v8 = vpop.f32.mrb[146].mxu0 }
 0x429   : > { %v5387_v1 = vpop.f32.mrb[147].mxu0 }
 0x42a   : > { %v8996_v44 = vadd.f32 %v5465_v56, %v3733_v9  ;;  %v5388_v23 = vadd.f32 %v5387_v1, %v5386_v8 }
 0x42c   : > { %v5466_v40 = vpop.f32.mrb[146].mxu1  ;;  %v3738_v17 = vadd.f32 %v5388_v23, %v8993_v38 }
 0x42d   : > { %v5467_v3 = vpop.f32.mrb[147].mxu1 }
 0x42e   : > { %v5468_v33 = vadd.f32 %v5467_v3, %v5466_v40 }
 0x430   : > { %v5469_v60 = vpop.f32.mrb[148].mxu1  ;;  %v8999_v50 = vadd.f32 %v5468_v33, %v3738_v17 }
 0x431   : > { %v5470_v61 = vpop.f32.mrb[149].mxu1 }
 0x432   : > { %v5471_v59 = vadd.f32 %v5470_v61, %v5469_v60 }
 0x433   : > { %v5389_v13 = vpop.f32.mrb[148].mxu0 }
 0x434   : > { %v5390_v22 = vpop.f32.mrb[149].mxu0  ;;  %v5472_v51 = vpop.f32.mrb[150].mxu1 }
 0x435   : > { %v5391_v31 = vadd.f32 %v5390_v22, %v5389_v13  ;;  %v5473_v20 = vpop.f32.mrb[151].mxu1 }
 0x436   : > { %v5474_v15 = vadd.f32 %v5473_v20, %v5472_v51 }
 0x437   : > { %v3743_v55 = vadd.f32 %v5391_v31, %v8993_v38  ;;  %v5392_v19 = vpop.f32.mrb[150].mxu0 }
 0x438   : > { %v5393_v49 = vpop.f32.mrb[151].mxu0  ;;  %v5475_v34 = vpop.f32.mrb[152].mxu1 }
 0x439   : > { %v9002_v26 = vadd.f32 %v5471_v59, %v3743_v55  ;;  %v5394_v48 = vadd.f32 %v5393_v49, %v5392_v19  ;;  %v5476_v43 = vpop.f32.mrb[153].mxu1 }
 0x43a   : > { %v5477_v29 = vadd.f32 %v5476_v43, %v5475_v34 }
 0x43b   : > { %v3748_v5 = vadd.f32 %v5394_v48, %v8993_v38  ;;  %v5395_v36 = vpop.f32.mrb[152].mxu0 }
 0x43c   : > { %v5396_v45 = vpop.f32.mrb[153].mxu0 }
 0x43d   : > { %v9005_v37 = vadd.f32 %v5474_v15, %v3748_v5  ;;  %v5397_v27 = vadd.f32 %v5396_v45, %v5395_v36 }
 0x43f   : > { %v3753_v0 = vadd.f32 %v5397_v27, %v8993_v38  ;;  %v5398_v2 = vpop.f32.mrb[154].mxu0 }
 0x440   : > { %v5399_v11 = vpop.f32.mrb[155].mxu0 }
 0x441   : > { %v9008_v57 = vadd.f32 %v5477_v29, %v3753_v0  ;;  %v5400_v12 = vadd.f32 %v5399_v11, %v5398_v2 }
 0x443   : > { %v3758_v14 = vadd.f32 %v5400_v12, %v8993_v38  ;;  %v5401_v25 = vpop.f32.mrb[156].mxu0 }
 0x444   : > { %v5402_v16 = vpop.f32.mrb[157].mxu0 }
 0x445   : > { %v5478_v7 = vpop.f32.mrb[154].mxu1  ;;  %v5403_v62 = vadd.f32 %v5402_v16, %v5401_v25 }
 0x446   : > { %v5479_v28 = vpop.f32.mrb[155].mxu1 }
 0x447   : > { %v5480_v42 = vadd.f32 %v5479_v28, %v5478_v7  ;;  %v3763_v35 = vadd.f32 %v5403_v62, %v8993_v38 }
 0x448   : > { %v5404_v63 = vpop.f32.mrb[158].mxu0 }
 0x449   : > { %v5481_v46 = vpop.f32.mrb[156].mxu1  ;;  %v9011_v53 = vadd.f32 %v5480_v42, %v3758_v14  ;;  %v5405_v41 = vpop.f32.mrb[159].mxu0 }
 0x44a   : > { %v5482_v32 = vpop.f32.mrb[157].mxu1  ;;  %v5406_v47 = vadd.f32 %v5405_v41, %v5404_v63 }
 0x44b   : > { %v5483_v54 = vadd.f32 %v5482_v32, %v5481_v46 }
 0x44c   : > { %v3768_v24 = vadd.f32 %v5406_v47, %v8993_v38  ;;  %v5407_v18 = vpop.f32.mrb[160].mxu0 }
 0x44d   : > { %v5484_v21 = vpop.f32.mrb[158].mxu1  ;;  %v9014_v4 = vadd.f32 %v5483_v54, %v3763_v35  ;;  %v5408_v30 = vpop.f32.mrb[161].mxu0 }
 0x44e   : > { %v5485_v10 = vpop.f32.mrb[159].mxu1  ;;  %v5409_v56 = vadd.f32 %v5408_v30, %v5407_v18 }
 0x44f   : > { %v5486_v39 = vadd.f32 %v5485_v10, %v5484_v21 }
 0x450   : > { %v3773_v8 = vadd.f32 %v5409_v56, %v8993_v38  ;;  %v5410_v40 = vpop.f32.mrb[162].mxu0 }
 0x451   : > { %v5487_v52 = vpop.f32.mrb[160].mxu1  ;;  %v9017_v6 = vadd.f32 %v5486_v39, %v3768_v24  ;;  %v5411_v3 = vpop.f32.mrb[163].mxu0 }
 0x452   : > { %v5488_v58 = vpop.f32.mrb[161].mxu1  ;;  %v5412_v17 = vadd.f32 %v5411_v3, %v5410_v40 }
 0x453   : > { %v5489_v9 = vadd.f32 %v5488_v58, %v5487_v52 }
 0x454   : > { %v3778_v60 = vadd.f32 %v5412_v17, %v8993_v38  ;;  %v5413_v22 = vpop.f32.mrb[164].mxu0 }
 0x455   : > { %v5490_v1 = vpop.f32.mrb[162].mxu1  ;;  %v9020_v33 = vadd.f32 %v5489_v9, %v3773_v8  ;;  %v5414_v31 = vpop.f32.mrb[165].mxu0 }
 0x456   : > { %v5491_v23 = vpop.f32.mrb[163].mxu1  ;;  %v5415_v19 = vadd.f32 %v5414_v31, %v5413_v22 }
 0x457   : > { %v5492_v13 = vadd.f32 %v5491_v23, %v5490_v1 }
 0x458   : > { %v3783_v49 = vadd.f32 %v5415_v19, %v8993_v38  ;;  %v5416_v20 = vpop.f32.mrb[166].mxu0 }
 0x459   : > { %v5493_v61 = vpop.f32.mrb[164].mxu1  ;;  %v9023_v55 = vadd.f32 %v5492_v13, %v3778_v60  ;;  %v5417_v15 = vpop.f32.mrb[167].mxu0 }
 0x45a   : > { %v5494_v59 = vpop.f32.mrb[165].mxu1  ;;  %v5418_v34 = vadd.f32 %v5417_v15, %v5416_v20 }
 0x45b   : > { %v5495_v51 = vadd.f32 %v5494_v59, %v5493_v61 }
 0x45c   : > { %v3788_v43 = vadd.f32 %v5418_v34, %v8993_v38  ;;  %v5419_v27 = vpop.f32.mrb[168].mxu0 }
 0x45d   : > { %v5496_v48 = vpop.f32.mrb[166].mxu1  ;;  %v9026_v36 = vadd.f32 %v5495_v51, %v3783_v49  ;;  %v5420_v0 = vpop.f32.mrb[169].mxu0 }
 0x45e   : > { %v5497_v5 = vpop.f32.mrb[167].mxu1  ;;  %v5421_v11 = vadd.f32 %v5420_v0, %v5419_v27 }
 0x45f   : > { %v5498_v45 = vadd.f32 %v5497_v5, %v5496_v48 }
 0x460   : > { %v3793_v12 = vadd.f32 %v5421_v11, %v8993_v38  ;;  %v5422_v42 = vpop.f32.mrb[170].mxu0 }
 0x461   : > { %v5499_v29 = vpop.f32.mrb[168].mxu1  ;;  %v9029_v7 = vadd.f32 %v5498_v45, %v3788_v43  ;;  %v5423_v25 = vpop.f32.mrb[171].mxu0 }
 0x462   : > { %v5500_v2 = vpop.f32.mrb[169].mxu1  ;;  %v5424_v32 = vadd.f32 %v5423_v25, %v5422_v42 }
 0x463   : > { %v5501_v28 = vadd.f32 %v5500_v2, %v5499_v29 }
 0x464   : > { %v3798_v54 = vadd.f32 %v5424_v32, %v8993_v38  ;;  %v5425_v35 = vpop.f32.mrb[172].mxu0 }
 0x465   : > { %v5502_v14 = vpop.f32.mrb[170].mxu1  ;;  %v9032_v16 = vadd.f32 %v5501_v28, %v3793_v12  ;;  %v5426_v21 = vpop.f32.mrb[173].mxu0 }
 0x466   : > { %v5503_v46 = vpop.f32.mrb[171].mxu1  ;;  %v5427_v47 = vadd.f32 %v5426_v21, %v5425_v35 }
 0x467   : > { %v5504_v62 = vadd.f32 %v5503_v46, %v5502_v14 }
 0x468   : > { %v3803_v24 = vadd.f32 %v5427_v47, %v8993_v38  ;;  %v5428_v18 = vpop.f32.mrb[174].mxu0 }
 0x469   : > { %v5505_v63 = vpop.f32.mrb[172].mxu1  ;;  %v9035_v10 = vadd.f32 %v5504_v62, %v3798_v54  ;;  %v5429_v30 = vpop.f32.mrb[175].mxu0 }
 0x46a   : > { %v5506_v41 = vpop.f32.mrb[173].mxu1  ;;  %v5430_v9 = vadd.f32 %v5429_v30, %v5428_v18 }
 0x46b   : > { %v5507_v39 = vadd.f32 %v5506_v41, %v5505_v63 }
 0x46c   : > { %v3808_v40 = vadd.f32 %v5430_v9, %v8993_v38  ;;  %v5543_v1 = vpop.f32.mrb[176].mxu0 }
 0x46d   : > { %v5508_v52 = vpop.f32.mrb[174].mxu1  ;;  %v9038_v56 = vadd.f32 %v5507_v39, %v3803_v24  ;;  %v5544_v23 = vpop.f32.mrb[177].mxu0 }
 0x46e   : > { %v5509_v58 = vpop.f32.mrb[175].mxu1  ;;  %v5545_v60 = vadd.f32 %v5544_v23, %v5543_v1 }
 0x46f   : > { %v5510_v8 = vadd.f32 %v5509_v58, %v5508_v52 }
 0x470   : > { %v4023_v61 = vadd.f32 %v5545_v60, %v8996_v44  ;;  %v5546_v31 = vpop.f32.mrb[178].mxu0 }
 0x471   : > { %v5623_v3 = vpop.f32.mrb[176].mxu1  ;;  %v9041_v13 = vadd.f32 %v5510_v8, %v3808_v40  ;;  %v5547_v19 = vpop.f32.mrb[179].mxu0 }
 0x472   : > { %v5624_v17 = vpop.f32.mrb[177].mxu1  ;;  %v5548_v49 = vadd.f32 %v5547_v19, %v5546_v31 }
 0x473   : > { %v5625_v22 = vadd.f32 %v5624_v17, %v5623_v3 }
 0x474   : > { %v4028_v38 = vadd.f32 %v5548_v49, %v8999_v50  ;;  %v5549_v15 = vpop.f32.mrb[180].mxu0 }
 0x475   : > { %v5626_v59 = vpop.f32.mrb[178].mxu1  ;;  %v9044_v48 = vadd.f32 %v5625_v22, %v4023_v61  ;;  %v5550_v34 = vpop.f32.mrb[181].mxu0 }
 0x476   : > { %v5627_v51 = vpop.f32.mrb[179].mxu1  ;;  %v5551_v43 = vadd.f32 %v5550_v34, %v5549_v15 }
 0x477   : > { %v5628_v20 = vadd.f32 %v5627_v51, %v5626_v59 }
 0x478   : > { %v4033_v44 = vadd.f32 %v5551_v43, %v9002_v26  ;;  %v5552_v0 = vpop.f32.mrb[182].mxu0 }
 0x479   : > { %v5629_v5 = vpop.f32.mrb[180].mxu1  ;;  %v9047_v29 = vadd.f32 %v5628_v20, %v4028_v38  ;;  %v5553_v11 = vpop.f32.mrb[183].mxu0 }
 0x47a   : > { %v5630_v45 = vpop.f32.mrb[181].mxu1  ;;  %v5554_v12 = vadd.f32 %v5553_v11, %v5552_v0 }
 0x47b   : > { %v5631_v27 = vadd.f32 %v5630_v45, %v5629_v5 }
 0x47c   : > { %v4038_v50 = vadd.f32 %v5554_v12, %v9005_v37  ;;  %v5555_v25 = vpop.f32.mrb[184].mxu0 }
 0x47d   : > { %v5632_v2 = vpop.f32.mrb[182].mxu1  ;;  %v9050_v14 = vadd.f32 %v5631_v27, %v4033_v44  ;;  %v5556_v32 = vpop.f32.mrb[185].mxu0 }
 0x47e   : > { %v5633_v28 = vpop.f32.mrb[183].mxu1  ;;  %v5557_v54 = vadd.f32 %v5556_v32, %v5555_v25 }
 0x47f   : > { %v5634_v42 = vadd.f32 %v5633_v28, %v5632_v2 }
 0x480   : > { %v4043_v26 = vadd.f32 %v5557_v54, %v9008_v57  ;;  %v5558_v21 = vpop.f32.mrb[186].mxu0 }
 0x481   : > { %v5635_v46 = vpop.f32.mrb[184].mxu1  ;;  %v9053_v63 = vadd.f32 %v5634_v42, %v4038_v50  ;;  %v5559_v47 = vpop.f32.mrb[187].mxu0 }
 0x482   : > { %v5636_v62 = vpop.f32.mrb[185].mxu1  ;;  %v5560_v24 = vadd.f32 %v5559_v47, %v5558_v21 }
 0x483   : > { %v5637_v35 = vadd.f32 %v5636_v62, %v5635_v46 }
 0x484   : > { %v4048_v37 = vadd.f32 %v5560_v24, %v9011_v53  ;;  %v5561_v30 = vpop.f32.mrb[188].mxu0 }
 0x485   : > { %v5638_v41 = vpop.f32.mrb[186].mxu1  ;;  %v9056_v52 = vadd.f32 %v5637_v35, %v4043_v26  ;;  %v5562_v9 = vpop.f32.mrb[189].mxu0 }
 0x486   : > { %v5639_v39 = vpop.f32.mrb[187].mxu1  ;;  %v5563_v40 = vadd.f32 %v5562_v9, %v5561_v30 }
 0x487   : > { %v5640_v18 = vadd.f32 %v5639_v39, %v5638_v41 }
 0x488   : > { %v4053_v57 = vadd.f32 %v5563_v40, %v9014_v4  ;;  %v5564_v23 = vpop.f32.mrb[190].mxu0 }
 0x489   : > { %v5641_v58 = vpop.f32.mrb[188].mxu1  ;;  %v9059_v3 = vadd.f32 %v5640_v18, %v4048_v37  ;;  %v5565_v60 = vpop.f32.mrb[191].mxu0 }
 0x48a   : > { %v5642_v8 = vpop.f32.mrb[189].mxu1  ;;  %v5566_v61 = vadd.f32 %v5565_v60, %v5564_v23 }
 0x48b   : > { %v5643_v1 = vadd.f32 %v5642_v8, %v5641_v58 }
 0x48c   : > { %v4058_v53 = vadd.f32 %v5566_v61, %v9017_v6  ;;  %v5567_v19 = vpop.f32.mrb[192].mxu0 }
 0x48d   : > { %v5644_v17 = vpop.f32.mrb[190].mxu1  ;;  %v9062_v59 = vadd.f32 %v5643_v1, %v4053_v57  ;;  %v5568_v49 = vpop.f32.mrb[193].mxu0 }
 0x48e   : > { %v5645_v22 = vpop.f32.mrb[191].mxu1  ;;  %v5569_v38 = vadd.f32 %v5568_v49, %v5567_v19 }
 0x48f   : > { %v5646_v31 = vadd.f32 %v5645_v22, %v5644_v17 }
 0x490   : > { %v4063_v4 = vadd.f32 %v5569_v38, %v9020_v33  ;;  %v5570_v34 = vpop.f32.mrb[194].mxu0 }
 0x491   : > { %v5647_v51 = vpop.f32.mrb[192].mxu1  ;;  %v9065_v5 = vadd.f32 %v5646_v31, %v4058_v53  ;;  %v5571_v43 = vpop.f32.mrb[195].mxu0 }
 0x492   : > { %v5648_v20 = vpop.f32.mrb[193].mxu1  ;;  %v5572_v44 = vadd.f32 %v5571_v43, %v5570_v34 }
 0x493   : > { %v5649_v15 = vadd.f32 %v5648_v20, %v5647_v51 }
 0x494   : > { %v4068_v6 = vadd.f32 %v5572_v44, %v9023_v55  ;;  %v5573_v11 = vpop.f32.mrb[196].mxu0 }
 0x495   : > { %v5650_v45 = vpop.f32.mrb[194].mxu1  ;;  %v9068_v2 = vadd.f32 %v5649_v15, %v4063_v4  ;;  %v5574_v12 = vpop.f32.mrb[197].mxu0 }
 0x496   : > { %v5651_v27 = vpop.f32.mrb[195].mxu1  ;;  %v5575_v50 = vadd.f32 %v5574_v12, %v5573_v11 }
 0x497   : > { %v5652_v0 = vadd.f32 %v5651_v27, %v5650_v45 }
 0x498   : > { %v4073_v33 = vadd.f32 %v5575_v50, %v9026_v36  ;;  %v5576_v32 = vpop.f32.mrb[198].mxu0 }
 0x499   : > { %v5653_v28 = vpop.f32.mrb[196].mxu1  ;;  %v9071_v46 = vadd.f32 %v5652_v0, %v4068_v6  ;;  %v5577_v54 = vpop.f32.mrb[199].mxu0 }
 0x49a   : > { %v5654_v42 = vpop.f32.mrb[197].mxu1  ;;  %v5578_v26 = vadd.f32 %v5577_v54, %v5576_v32 }
 0x49b   : > { %v5655_v25 = vadd.f32 %v5654_v42, %v5653_v28 }
 0x49c   : > { %v4078_v55 = vadd.f32 %v5578_v26, %v9029_v7  ;;  %v5579_v47 = vpop.f32.mrb[200].mxu0 }
 0x49d   : > { %v5656_v62 = vpop.f32.mrb[198].mxu1  ;;  %v9074_v41 = vadd.f32 %v5655_v25, %v4073_v33  ;;  %v5580_v24 = vpop.f32.mrb[201].mxu0 }
 0x49e   : > { %v5657_v35 = vpop.f32.mrb[199].mxu1  ;;  %v5581_v37 = vadd.f32 %v5580_v24, %v5579_v47  ;;  %v4644_v24 = vld [vmem:[%s9142_s5 + $0x5] ss:$0 sm:$0xff] }
 0x49f   : > { %v5658_v21 = vadd.f32 %v5657_v35, %v5656_v62 }
 0x4a0   : > { %v4083_v9 = vadd.f32 %v5581_v37, %v9032_v16  ;;  %v5582_v36 = vpop.f32.mrb[202].mxu0 }
 0x4a1   : > { %v5659_v39 = vpop.f32.mrb[200].mxu1  ;;  %v4223_v58 = vadd.f32 %v5658_v21, %v4078_v55  ;;  %v5583_v40 = vpop.f32.mrb[203].mxu0 }
 0x4a2   : > { %v5660_v18 = vpop.f32.mrb[201].mxu1  ;;  %v5584_v57 = vadd.f32 %v5583_v40, %v5582_v36 }
 0x4a3   : > { %v5661_v30 = vadd.f32 %v5660_v18, %v5659_v39 }
 0x4a4   : > { %v4088_v60 = vadd.f32 %v5584_v57, %v9035_v10  ;;  %v5585_v22 = vpop.f32.mrb[204].mxu0 }
 0x4a5   : > { %v5662_v8 = vpop.f32.mrb[202].mxu1  ;;  %v4228_v17 = vadd.f32 %v5661_v30, %v4083_v9  ;;  %v5586_v61 = vpop.f32.mrb[205].mxu0 }
 0x4a6   : > { %v5663_v1 = vpop.f32.mrb[203].mxu1  ;;  %v5587_v53 = vadd.f32 %v5586_v61, %v5585_v22 }
 0x4a7   : > { %v5664_v23 = vadd.f32 %v5663_v1, %v5662_v8 }
 0x4a8   : > { %v4093_v49 = vadd.f32 %v5587_v53, %v9038_v56  ;;  %v5588_v20 = vpop.f32.mrb[206].mxu0 }
 0x4a9   : > { %v5665_v7 = vpop.f32.mrb[204].mxu1  ;;  %v4233_v51 = vadd.f32 %v5664_v23, %v4088_v60  ;;  %v5589_v38 = vpop.f32.mrb[207].mxu0 }
 0x4aa   : > { %v5666_v31 = vpop.f32.mrb[205].mxu1  ;;  %v5590_v4 = vadd.f32 %v5589_v38, %v5588_v20 }
 0x4ab   : > { %v5667_v19 = vadd.f32 %v5666_v31, %v5665_v7 }
 0x4ac   : > { %v4098_v43 = vadd.f32 %v5590_v4, %v9041_v13  ;;  %v5881_v27 = vpop.f32.mrb[208].mxu0 }
 0x4ad   : > { %v5668_v16 = vpop.f32.mrb[206].mxu1  ;;  %v4238_v45 = vadd.f32 %v5667_v19, %v4093_v49  ;;  %v4318_v10 = vadd.f32 %v5881_v27, %v9047_v29  ;;  %v4312_v44 = vpop.f32.mrb[209].mxu0 }
 0x4ae   : > { %v5669_v15 = vpop.f32.mrb[207].mxu1  ;;  %v4313_v0 = vadd.f32 %v4312_v44, %v9044_v48 }
 0x4af   : > { %v5670_v34 = vadd.f32 %v5669_v15, %v5668_v16 }
 0x4b0   : > { %v5884_v11 = vpop.f32.mrb[210].mxu0  ;;  %5935 = vmatprep.mubr.f32.mxu1 %v4313_v0 }
 0x4b1   : > { %v4243_v6 = vadd.f32 %v5670_v34, %v4098_v43  ;;  %v4328_v56 = vadd.f32 %v5884_v11, %v9053_v63  ;;  %v4322_v28 = vpop.f32.mrb[211].mxu0  ;;  %5936 = vmatmul.mubr.f32.vlgmr.msra.gmra.mrb[208].mxu1 %v4318_v10 }
 0x4b2   : > { %v4323_v12 = vadd.f32 %v4322_v28, %v9050_v14 }
 0x4b4   : > { %v5887_v42 = vpop.f32.mrb[212].mxu0  ;;  %5938 = vmatprep.mubr.f32.mxu1 %v4323_v12 }
 0x4b5   : > { %v4338_v50 = vadd.f32 %v5887_v42, %v9059_v3  ;;  %v4332_v13 = vpop.f32.mrb[213].mxu0  ;;  %5939 = vmatmul.mubr.f32.gmra.mrb[210].mxu1 %v4328_v56 }
 0x4b6   : > { %v4333_v29 = vadd.f32 %v4332_v13, %v9056_v52 }
 0x4b8   : > { %v5890_v25 = vpop.f32.mrb[214].mxu0  ;;  %5941 = vmatprep.mubr.f32.mxu1 %v4333_v29 }
 0x4b9   : > { %v4348_v48 = vadd.f32 %v5890_v25, %v9065_v5  ;;  %v4342_v33 = vpop.f32.mrb[215].mxu0  ;;  %5942 = vmatmul.mubr.f32.gmra.mrb[212].mxu1 %v4338_v50 }
 0x4ba   : > { %v4343_v63 = vadd.f32 %v4342_v33, %v9062_v59 }
 0x4bc   : > { %v5893_v32 = vpop.f32.mrb[216].mxu0  ;;  %5944 = vmatprep.mubr.f32.mxu1 %v4343_v63 }
 0x4bd   : > { %v4358_v14 = vadd.f32 %v5893_v32, %v9071_v46  ;;  %v4352_v62 = vpop.f32.mrb[217].mxu0  ;;  %5945 = vmatmul.mubr.f32.gmra.mrb[214].mxu1 %v4348_v48 }
 0x4be   : > { %v4353_v3 = vadd.f32 %v4352_v62, %v9068_v2 }
 0x4c0   : > { %v5896_v54 = vpop.f32.mrb[218].mxu0  ;;  %5947 = vmatprep.mubr.f32.mxu1 %v4353_v3 }
 0x4c1   : > { %v4368_v35 = vadd.f32 %v5896_v54, %v4223_v58  ;;  %v4362_v52 = vpop.f32.mrb[219].mxu0  ;;  %5948 = vmatmul.mubr.f32.gmra.mrb[216].mxu1 %v4358_v14 }
 0x4c2   : > { %v4363_v26 = vadd.f32 %v4362_v52, %v9074_v41 }
 0x4c4   : > { %v5899_v5 = vpop.f32.mrb[220].mxu0  ;;  %5950 = vmatprep.mubr.f32.mxu1 %v4363_v26 }
 0x4c5   : > { %v4378_v21 = vadd.f32 %v5899_v5, %v4233_v51  ;;  %v4372_v59 = vpop.f32.mrb[221].mxu0  ;;  %5951 = vmatmul.mubr.f32.gmra.mrb[218].mxu1 %v4368_v35 }
 0x4c6   : > { %v4373_v55 = vadd.f32 %v4372_v59, %v4228_v17 }
 0x4c8   : > { %v5902_v47 = vpop.f32.mrb[222].mxu0  ;;  %5953 = vmatprep.mubr.f32.mxu1 %v4373_v55 }
 0x4c9   : > { %v4388_v46 = vadd.f32 %v5902_v47, %v4243_v6  ;;  %v4382_v39 = vpop.f32.mrb[223].mxu0  ;;  %5954 = vmatmul.mubr.f32.gmra.mrb[220].mxu1 %v4378_v21 }
 0x4ca   : > { %v4383_v2 = vadd.f32 %v4382_v39, %v4238_v45 }
 0x4cc   : > { %5956 = vmatprep.mubr.f32.mxu1 %v4383_v2 }
 0x4cd   : > { %5957 = vmatmul.mubr.f32.gmra.mrb[222].mxu1 %v4388_v46 }
 0x584   : > { %v5937_v41 = vpop.f32.mrb[208].mxu1 }
 0x585   : > { %v4484_v18 = vadd.f32 %v5937_v41, %v4644_v24  ;;  %v4478_v37 = vpop.f32.mrb[209].mxu1 }
 0x586   : > { %v4479_v30 = vadd.f32 %v4644_v24, %v4478_v37 }
 0x587   : > { %4559 = vst.msk [vmem:[%s9100_s12 + $0x8] sm:$0xff] %vm4557_vm0, %v4484_v18 }
 0x588   : > { %4558 = vst.msk [vmem:[%s9100_s12] sm:$0xff] %vm4557_vm0, %v4479_v30  ;;  %v5940_v58 = vpop.f32.mrb[210].mxu1 }
 0x589   : > { %v4494_v9 = vadd.f32 %v5940_v58, %v4644_v24  ;;  %v4488_v36 = vpop.f32.mrb[211].mxu1 }
 0x58a   : > { %v4489_v8 = vadd.f32 %v4644_v24, %v4488_v36 }
 0x58b   : > { %4561 = vst.msk [vmem:[%s9100_s12 + $0x18] sm:$0xff] %vm4557_vm0, %v4494_v9 }
 0x58c   : > { %4560 = vst.msk [vmem:[%s9100_s12 + $0x10] sm:$0xff] %vm4557_vm0, %v4489_v8  ;;  %v5943_v40 = vpop.f32.mrb[212].mxu1 }
 0x58d   : > { %v4504_v1 = vadd.f32 %v5943_v40, %v4644_v24  ;;  %v4498_v57 = vpop.f32.mrb[213].mxu1 }
 0x58e   : > { %v4499_v23 = vadd.f32 %v4644_v24, %v4498_v57 }
 0x58f   : > { %4563 = vst.msk [vmem:[%s9100_s12 + $0x28] sm:$0xff] %vm4557_vm0, %v4504_v1 }
 0x590   : > { %4562 = vst.msk [vmem:[%s9100_s12 + $0x20] sm:$0xff] %vm4557_vm0, %v4499_v23  ;;  %v5946_v17 = vpop.f32.mrb[214].mxu1 }
 0x591   : > { %v4514_v60 = vadd.f32 %v5946_v17, %v4644_v24  ;;  %v4508_v22 = vpop.f32.mrb[215].mxu1 }
 0x592   : > { %v4509_v7 = vadd.f32 %v4644_v24, %v4508_v22 }
 0x593   : > { %4565 = vst.msk [vmem:[%s9100_s12 + $0x38] sm:$0xff] %vm4557_vm0, %v4514_v60 }
 0x594   : > { %4564 = vst.msk [vmem:[%s9100_s12 + $0x30] sm:$0xff] %vm4557_vm0, %v4509_v7  ;;  %v5949_v61 = vpop.f32.mrb[216].mxu1 }
 0x595   : > { %v4524_v31 = vadd.f32 %v5949_v61, %v4644_v24  ;;  %v4518_v53 = vpop.f32.mrb[217].mxu1 }
 0x596   : > { %v4519_v19 = vadd.f32 %v4644_v24, %v4518_v53 }
 0x597   : > { %4567 = vst.msk [vmem:[%s9100_s12 + $0x48] sm:$0xff] %vm4557_vm0, %v4524_v31 }
 0x598   : > { %4566 = vst.msk [vmem:[%s9100_s12 + $0x40] sm:$0xff] %vm4557_vm0, %v4519_v19  ;;  %v5952_v51 = vpop.f32.mrb[218].mxu1 }
 0x599   : > { %v4534_v49 = vadd.f32 %v5952_v51, %v4644_v24  ;;  %v4528_v20 = vpop.f32.mrb[219].mxu1 }
 0x59a   : > { %v4529_v16 = vadd.f32 %v4644_v24, %v4528_v20 }
 0x59b   : > { %4569 = vst.msk [vmem:[%s9100_s12 + $0x58] sm:$0xff] %vm4557_vm0, %v4534_v49 }
 0x59c   : > { %4568 = vst.msk [vmem:[%s9100_s12 + $0x50] sm:$0xff] %vm4557_vm0, %v4529_v16  ;;  %v5955_v38 = vpop.f32.mrb[220].mxu1 }
 0x59d   : > { %v4544_v15 = vadd.f32 %v5955_v38, %v4644_v24  ;;  %v4538_v4 = vpop.f32.mrb[221].mxu1 }
 0x59e   : > { %v4539_v34 = vadd.f32 %v4644_v24, %v4538_v4 }
 0x59f   : > { %4571 = vst.msk [vmem:[%s9100_s12 + $0x68] sm:$0xff] %vm4557_vm0, %v4544_v15 }
 0x5a0   : > { %4570 = vst.msk [vmem:[%s9100_s12 + $0x60] sm:$0xff] %vm4557_vm0, %v4539_v34  ;;  %v5958_v45 = vpop.f32.mrb[222].mxu1 }
 0x5a1   : > { %v4554_v43 = vadd.f32 %v5958_v45, %v4644_v24  ;;  %v4548_v27 = vpop.f32.mrb[223].mxu1 }
 0x5a2   : > { %v4549_v10 = vadd.f32 %v4644_v24, %v4548_v27 }
 0x5a3   : > { %4573 = vst.msk [vmem:[%s9100_s12 + $0x78] sm:$0xff] %vm4557_vm0, %v4554_v43 }
 0x5a4   : > { %4572 = vst.msk [vmem:[%s9100_s12 + $0x70] sm:$0xff] %vm4557_vm0, %v4549_v10 }
 0x5a5 PF: > { %s16_s21 = sadd.s32 1, %s6485_s21  }
 0x5a6   : > { %p13_p4 = scmp.ge.s32.totalorder %s16_s21, 4  }
 0x5a8   :  { %15 = sbr.rel (!%p13_p4) target bundleno = 1 (0x1), region = 74 }

</bundles_post_ra>
